<compile_context>
chip_gen: v7x
topology: tpu7x:2x2x1
jax: 0.10.0
libtpu: 0.0.40
codegen_flags: <defaults>
</compile_context>

<pallas_src>
import functools

import jax
import jax.numpy as jnp
from jax import lax
from jax.experimental import pallas as pl
from jax.experimental.pallas import tpu as pltpu

PADL = 4  # zero-halo rows on each side of the VMEM activation staging buffers


# ----------------------------------------------------------------------------
# Fused kernel: encoder (6 x conv1d-same + folded BN/ReLU) + cosine-sim head.
# One batch element per grid step.
# ----------------------------------------------------------------------------
def fused_clf_kernel(x_ref, *refs, L, layer_meta):
    """Refs (in order):
      x_ref               : (1, L, K1*C1) bf16  im2col of the layer-1 input
      w1, s1, ..., w6, s6 : folded weights (bf16) and shifts (f32, (1, C_out));
                            w1 is (K1*C1, 128); w2..w6 are (K, C_in, C_out)
      cw_ref              : (F, NC) f32  scale * L2-normalized class weights
      o_ref               : (1, 1, NC) f32 logits
      buf0, buf1          : (L + 2*PADL, C_max) bf16 VMEM ping-pong staging
    """
    n = 2 * (len(layer_meta) + 1)
    w_refs = refs[0:n:2]
    s_refs = refs[1:n:2]
    cw_ref = refs[n]
    o_ref = refs[n + 1]
    buf0, buf1 = refs[n + 2], refs[n + 3]
    bufs = (buf0, buf1)

    # Zero the staging buffers so the halo rows act as 'same' (zero) padding.
    buf0[...] = jnp.zeros_like(buf0)
    buf1[...] = jnp.zeros_like(buf1)

    # --- layer 1: single MXU matmul on the im2col LHS + folded affine + ReLU --
    acc = jnp.dot(x_ref[0], w_refs[0][...], preferred_element_type=jnp.float32)
    y = jnp.maximum(acc + s_refs[0][...], 0.0)                   # (L, 128) f32
    buf0[pl.ds(PADL, L), pl.ds(0, y.shape[1])] = y.astype(buf0.dtype)

    # --- layers 2..6: K tap matmuls from the zero-haloed VMEM staging buffer --
    for i, (K, c_in, c_out, relu) in enumerate(layer_meta):
        src, dst = bufs[i % 2], bufs[(i + 1) % 2]
        w = w_refs[i + 1]
        left = (K - 1) // 2
        acc = jnp.zeros((L, c_out), jnp.float32)
        for k in range(K):                                       # static taps
            xs = src[pl.ds(PADL - left + k, L), pl.ds(0, c_in)]  # bf16 slice
            acc = acc + jnp.dot(xs, w[k], preferred_element_type=jnp.float32)
        y = acc + s_refs[i + 1][...]                             # folded bias+BN
        if relu:
            y = jnp.maximum(y, 0.0)
        if i + 1 < len(layer_meta):                              # stage next input
            dst[pl.ds(PADL, L), pl.ds(0, c_out)] = y.astype(dst.dtype)

    # --- head: temporal mean pool + L2 normalize + scaled cosine similarity ---
    z = jnp.sum(y, axis=0, keepdims=True) * (1.0 / L)            # (1, F) f32
    ssq = jnp.sum(z * z, axis=1, keepdims=True)
    zn = z * lax.rsqrt(jnp.maximum(ssq, 1e-24))
    o_ref[0] = jnp.dot(zn, cw_ref[...], preferred_element_type=jnp.float32)


# ----------------------------------------------------------------------------
# Wrapper (glue): layer-1 im2col, BlockSpecs, grid over batch.
# ----------------------------------------------------------------------------
def cosine_sim_clf_forward(x_bcl, folded):
    """x_bcl: (B, C_in, L) float32, like the PyTorch module. Returns (B, NC)."""
    # TODO(synk): return_feature_vector=True branch (returns pooled z) not exposed.
    ws, ss, relus = folded["weights"], folded["shifts"], folded["relu"]
    cw_t = folded["cw_t"]

    x = jnp.transpose(x_bcl, (0, 2, 1))                          # (B, L, C_in)
    B, L, _ = x.shape
    K1, c1, cout1 = ws[0].shape

    # Layer-1 'same' padding: even kernel puts the extra sample on the right,
    # matching conv1d_same_padding's F.pad(input, [0, 1]).  Then im2col.
    left = (K1 - 1) // 2
    right = (K1 - 1) - left
    xp = jnp.pad(x, ((0, 0), (left, right), (0, 0))).astype(jnp.bfloat16)
    x_i2c = jnp.concatenate([xp[:, k:k + L, :] for k in range(K1)], axis=-1)
    w1 = ws[0].reshape(K1 * c1, cout1)                           # (K1*C1, 128)

    layer_meta = tuple(
        (int(w.shape[0]), int(w.shape[1]), int(w.shape[2]), bool(r))
        for w, r in zip(ws[1:], relus[1:]))
    c_buf = max(int(w.shape[2]) for w in ws)                     # widest layer
    n_classes = int(cw_t.shape[1])

    operands = [x_i2c, w1, ss[0]]
    in_specs = [
        pl.BlockSpec((1, L, K1 * c1), lambda b: (b, 0, 0)),      # per-batch tile
        pl.BlockSpec(w1.shape, lambda b: (0, 0)),                # resident weight
        pl.BlockSpec(ss[0].shape, lambda b: (0, 0)),
    ]
    for w, s in zip(ws[1:], ss[1:]):
        operands += [w, s]
        in_specs += [pl.BlockSpec(w.shape, lambda b: (0, 0, 0)),
                     pl.BlockSpec(s.shape, lambda b: (0, 0))]
    operands.append(cw_t)
    in_specs.append(pl.BlockSpec(cw_t.shape, lambda b: (0, 0)))

    kern = functools.partial(fused_clf_kernel, L=L, layer_meta=layer_meta)
    out = pl.pallas_call(
        kern,
        out_shape=jax.ShapeDtypeStruct((B, 1, n_classes), jnp.float32),
        grid_spec=pltpu.PrefetchScalarGridSpec(
            num_scalar_prefetch=0,
            grid=(B,),
            in_specs=in_specs,
            out_specs=pl.BlockSpec((1, 1, n_classes), lambda b: (b, 0, 0)),
            scratch_shapes=[
                pltpu.VMEM((L + 2 * PADL, c_buf), jnp.bfloat16),
                pltpu.VMEM((L + 2 * PADL, c_buf), jnp.bfloat16),
            ],
        ),
        compiler_params=pltpu.CompilerParams(
            dimension_semantics=("parallel",)),
    )(*operands)
    return out.reshape(B, n_classes)


# ----------------------------------------------------------------------------
# Parameter construction (synthetic, mirrors module __init__) and folding.
# ----------------------------------------------------------------------------
def init_params(key, in_channels, num_classes, init_scale=10.0):
    layer_defs = [
        (in_channels, 128, 8, True),   # ConvBlock(in, 128, 8, 1)
        (128, 256, 5, True),           # ConvBlock(128, 256, 5, 1)
        (256, 256, 5, True),
        (256, 256, 5, True),
        (256, 256, 5, True),
        (256, 128, 3, False),          # final Conv1dSamePadding(256, 128, 3, 1)
    ]
    layers = []
    for cin, cout, k, has_bn in layer_defs:
        key, kw, kb, kg, kbe, km, kv = jax.random.split(key, 7)
        bound = 1.0 / jnp.sqrt(cin * k)
        w = jax.random.uniform(kw, (k, cin, cout), jnp.float32, -bound, bound)
        b = jax.random.uniform(kb, (cout,), jnp.float32, -bound, bound)
        if has_bn:
            gamma = jax.random.uniform(kg, (cout,), jnp.float32, 0.5, 1.5)
            beta = 0.1 * jax.random.normal(kbe, (cout,), jnp.float32)
            mean = 0.1 * jax.random.normal(km, (cout,), jnp.float32)
            var = jax.random.uniform(kv, (cout,), jnp.float32, 0.5, 1.5)
        else:
            gamma = beta = mean = var = None
        layers.append(dict(w=w, b=b, gamma=gamma, beta=beta, mean=mean, var=var,
                           has_bn=has_bn, relu=has_bn))
    key, kcw = jax.random.split(key)
    feature_dim = 128
    cw_bound = float(jnp.sqrt(6.0 / feature_dim))                # kaiming_uniform_
    class_weights = jax.random.uniform(kcw, (num_classes, feature_dim),
                                       jnp.float32, -cw_bound, cw_bound)
    return dict(layers=layers, class_weights=class_weights,
                scale=jnp.asarray(init_scale, jnp.float32), bn_eps=1e-5)


def fold_params(raw):
    """Fold conv bias + eval-mode BatchNorm into weight/shift; bf16 weights,
    pre-normalized & pre-scaled class weights (transposed)."""
    weights, shifts, relus = [], [], []
    for lyr in raw["layers"]:
        if lyr["has_bn"]:
            s = lyr["gamma"] / jnp.sqrt(lyr["var"] + raw["bn_eps"])
            t = lyr["beta"] - lyr["mean"] * s
        else:
            s = jnp.ones_like(lyr["b"])
            t = jnp.zeros_like(lyr["b"])
        weights.append((lyr["w"] * s[None, None, :]).astype(jnp.bfloat16))
        shifts.append((lyr["b"] * s + t).reshape(1, -1).astype(jnp.float32))
        relus.append(lyr["relu"])
    cw = raw["class_weights"]
    wn = cw / jnp.maximum(jnp.linalg.norm(cw, axis=1, keepdims=True), 1e-12)
    cw_t = jnp.asarray((raw["scale"] * wn).T, jnp.float32)       # (F, NC)
    return dict(weights=weights, shifts=shifts, relu=relus, cw_t=cw_t)


# ----------------------------------------------------------------------------
# Pure-JAX reference: the PyTorch module math with the same numerics policy as
# the kernel (bf16 weights/activations, f32 accumulation).
# ----------------------------------------------------------------------------
def reference_forward(x_bcl, raw, folded):
    h = jnp.transpose(x_bcl, (0, 2, 1)).astype(jnp.bfloat16)     # (B, L, C)
    y = None
    for w, s, relu in zip(folded["weights"], folded["shifts"], folded["relu"]):
        K = w.shape[0]
        L = h.shape[1]
        left = (K - 1) // 2
        right = (K - 1) - left
        xp = jnp.pad(h, ((0, 0), (left, right), (0, 0)))
        acc = sum(jnp.einsum("blc,co->blo", xp[:, k:k + L, :], w[k],
                             preferred_element_type=jnp.float32)
                  for k in range(K))
        y = acc + s
        if relu:
            y = jnp.maximum(y, 0.0)
        h = y.astype(jnp.bfloat16)
    z = jnp.mean(y, axis=1)                                      # (B, F) f32
    zn = z / jnp.maximum(jnp.linalg.norm(z, axis=1, keepdims=True), 1e-12)
    cw = raw["class_weights"]
    wn = cw / jnp.maximum(jnp.linalg.norm(cw, axis=1, keepdims=True), 1e-12)
    return raw["scale"] * (zn @ wn.T)


if __name__ == "__main__":
    B, C_IN, L, NUM_CLASSES = 2, 4, 16, 10

    key = jax.random.PRNGKey(0)
    key, kx = jax.random.split(key)
    x = jax.random.normal(kx, (B, C_IN, L), jnp.float32)         # (b, c, l)

    raw = init_params(key, C_IN, NUM_CLASSES)
    folded = fold_params(raw)

    fwd = jax.jit(lambda inp: cosine_sim_clf_forward(inp, folded))
    logits = jax.block_until_ready(fwd(x))
    ref = jax.block_until_ready(reference_forward(x, raw, folded))

    assert logits.shape == (B, NUM_CLASSES)
    err = float(jnp.max(jnp.abs(logits - ref)))
    assert err < 2e-3, f"mismatch: max abs err {err}"
    print("KERNEL_OK")
</pallas_src>

<mosaic_0001>
module attributes {stable_mosaic.version = 11 : i64} {
  func.func @fused_clf_kernel(%arg0: i32, %arg1: memref<1x16x32xbf16, #tpu.memory_space<vmem>>, %arg2: memref<32x128xbf16, #tpu.memory_space<vmem>>, %arg3: memref<1x128xf32, #tpu.memory_space<vmem>>, %arg4: memref<5x128x256xbf16, #tpu.memory_space<vmem>>, %arg5: memref<1x256xf32, #tpu.memory_space<vmem>>, %arg6: memref<5x256x256xbf16, #tpu.memory_space<vmem>>, %arg7: memref<1x256xf32, #tpu.memory_space<vmem>>, %arg8: memref<5x256x256xbf16, #tpu.memory_space<vmem>>, %arg9: memref<1x256xf32, #tpu.memory_space<vmem>>, %arg10: memref<5x256x256xbf16, #tpu.memory_space<vmem>>, %arg11: memref<1x256xf32, #tpu.memory_space<vmem>>, %arg12: memref<3x256x128xbf16, #tpu.memory_space<vmem>>, %arg13: memref<1x128xf32, #tpu.memory_space<vmem>>, %arg14: memref<128x10xf32, #tpu.memory_space<vmem>>, %arg15: memref<1x1x10xf32, #tpu.memory_space<vmem>>, %arg16: memref<24x256xbf16, #tpu.memory_space<vmem>>, %arg17: memref<24x256xbf16, #tpu.memory_space<vmem>>) attributes {dimension_semantics = [#tpu.dimension_semantics<parallel>], iteration_bounds = array<i64: 2>, scalar_prefetch = 0 : i64, scratch_operands = 2 : i64, tpu.core_type = #tpu.core_type<tc>, window_params = [{transform_indices = @transform_0, window_bounds = array<i64: 1, 16, 32>}, {pipeline_mode = #tpu.pipeline_mode<synchronous>, transform_indices = @transform_1, window_bounds = array<i64: 32, 128>}, {pipeline_mode = #tpu.pipeline_mode<synchronous>, transform_indices = @transform_2, window_bounds = array<i64: 1, 128>}, {pipeline_mode = #tpu.pipeline_mode<synchronous>, transform_indices = @transform_3, window_bounds = array<i64: 5, 128, 256>}, {pipeline_mode = #tpu.pipeline_mode<synchronous>, transform_indices = @transform_4, window_bounds = array<i64: 1, 256>}, {pipeline_mode = #tpu.pipeline_mode<synchronous>, transform_indices = @transform_5, window_bounds = array<i64: 5, 256, 256>}, {pipeline_mode = #tpu.pipeline_mode<synchronous>, transform_indices = @transform_6, window_bounds = array<i64: 1, 256>}, {pipeline_mode = #tpu.pipeline_mode<synchronous>, transform_indices = @transform_7, window_bounds = array<i64: 5, 256, 256>}, {pipeline_mode = #tpu.pipeline_mode<synchronous>, transform_indices = @transform_8, window_bounds = array<i64: 1, 256>}, {pipeline_mode = #tpu.pipeline_mode<synchronous>, transform_indices = @transform_9, window_bounds = array<i64: 5, 256, 256>}, {pipeline_mode = #tpu.pipeline_mode<synchronous>, transform_indices = @transform_10, window_bounds = array<i64: 1, 256>}, {pipeline_mode = #tpu.pipeline_mode<synchronous>, transform_indices = @transform_11, window_bounds = array<i64: 3, 256, 128>}, {pipeline_mode = #tpu.pipeline_mode<synchronous>, transform_indices = @transform_12, window_bounds = array<i64: 1, 128>}, {pipeline_mode = #tpu.pipeline_mode<synchronous>, transform_indices = @transform_13, window_bounds = array<i64: 128, 10>}, {transform_indices = @transform_14, window_bounds = array<i64: 1, 1, 10>}]} {
    %cst = arith.constant 0.000000e+00 : bf16
    %0 = vector.broadcast %cst : bf16 to vector<24x256xbf16>
    %c0 = arith.constant 0 : index
    %c0_0 = arith.constant 0 : index
    %1 = vector.load %arg16[%c0, %c0_0] : memref<24x256xbf16, #tpu.memory_space<vmem>>, vector<24x256xbf16>
    tpu.vector_store %arg16[%c0, %c0_0], %0 {strides = array<i32>} : memref<24x256xbf16, #tpu.memory_space<vmem>>, vector<24x256xbf16>,
    %cst_1 = arith.constant 0.000000e+00 : bf16
    %2 = vector.broadcast %cst_1 : bf16 to vector<24x256xbf16>
    %c0_2 = arith.constant 0 : index
    %c0_3 = arith.constant 0 : index
    %3 = vector.load %arg17[%c0_2, %c0_3] : memref<24x256xbf16, #tpu.memory_space<vmem>>, vector<24x256xbf16>
    tpu.vector_store %arg17[%c0_2, %c0_3], %2 {strides = array<i32>} : memref<24x256xbf16, #tpu.memory_space<vmem>>, vector<24x256xbf16>,
    %c0_4 = arith.constant 0 : index
    %c0_5 = arith.constant 0 : index
    %c0_6 = arith.constant 0 : index
    %4 = vector.load %arg1[%c0_4, %c0_5, %c0_6] : memref<1x16x32xbf16, #tpu.memory_space<vmem>>, vector<1x16x32xbf16>
    %5 = vector.shape_cast %4 : vector<1x16x32xbf16> to vector<16x32xbf16>
    %c0_7 = arith.constant 0 : index
    %c0_8 = arith.constant 0 : index
    %6 = vector.load %arg2[%c0_7, %c0_8] : memref<32x128xbf16, #tpu.memory_space<vmem>>, vector<32x128xbf16>
    %cst_9 = arith.constant dense<0.000000e+00> : vector<16x128xf32>
    %7 = tpu.matmul %5, %6, %cst_9 {dimension_numbers = #tpu.dot_dimension_numbers<[1], [0], [0], [1], [0, 0, 1, 1], [], []>} : vector<16x32xbf16>, vector<32x128xbf16>, vector<16x128xf32> -> vector<16x128xf32>
    %c0_10 = arith.constant 0 : index
    %c0_11 = arith.constant 0 : index
    %8 = vector.load %arg3[%c0_10, %c0_11] : memref<1x128xf32, #tpu.memory_space<vmem>>, vector<1x128xf32>
    %9 = vector.broadcast %8 : vector<1x128xf32> to vector<16x128xf32>
    %10 = arith.addf %7, %9 : vector<16x128xf32>
    %cst_12 = arith.constant 0.000000e+00 : f32
    %11 = vector.broadcast %cst_12 : f32 to vector<16x128xf32>
    %12 = arith.maximumf %10, %11 : vector<16x128xf32>
    %13 = arith.truncf %12 : vector<16x128xf32> to vector<16x128xbf16>
    %c4 = arith.constant 4 : index
    %c0_13 = arith.constant 0 : index
    %14 = vector.load %arg16[%c4, %c0_13] : memref<24x256xbf16, #tpu.memory_space<vmem>>, vector<16x128xbf16>
    tpu.vector_store %arg16[%c4, %c0_13], %13 {strides = array<i32>} : memref<24x256xbf16, #tpu.memory_space<vmem>>, vector<16x128xbf16>,
    %cst_14 = arith.constant 0.000000e+00 : f32
    %15 = vector.broadcast %cst_14 : f32 to vector<16x256xf32>
    %c2 = arith.constant 2 : index
    %c0_15 = arith.constant 0 : index
    %16 = vector.load %arg16[%c2, %c0_15] : memref<24x256xbf16, #tpu.memory_space<vmem>>, vector<16x128xbf16>
    %c0_16 = arith.constant 0 : index
    %c0_17 = arith.constant 0 : index
    %c0_18 = arith.constant 0 : index
    %17 = vector.load %arg4[%c0_16, %c0_17, %c0_18] : memref<5x128x256xbf16, #tpu.memory_space<vmem>>, vector<1x128x256xbf16>
    %18 = vector.shape_cast %17 : vector<1x128x256xbf16> to vector<128x256xbf16>
    %cst_19 = arith.constant dense<0.000000e+00> : vector<16x256xf32>
    %19 = tpu.matmul %16, %18, %cst_19 {dimension_numbers = #tpu.dot_dimension_numbers<[1], [0], [0], [1], [0, 0, 1, 1], [], []>} : vector<16x128xbf16>, vector<128x256xbf16>, vector<16x256xf32> -> vector<16x256xf32>
    %20 = arith.addf %15, %19 : vector<16x256xf32>
    %c3 = arith.constant 3 : index
    %c0_20 = arith.constant 0 : index
    %21 = vector.load %arg16[%c3, %c0_20] : memref<24x256xbf16, #tpu.memory_space<vmem>>, vector<16x128xbf16>
    %c1 = arith.constant 1 : index
    %c0_21 = arith.constant 0 : index
    %c0_22 = arith.constant 0 : index
    %22 = vector.load %arg4[%c1, %c0_21, %c0_22] : memref<5x128x256xbf16, #tpu.memory_space<vmem>>, vector<1x128x256xbf16>
    %23 = vector.shape_cast %22 : vector<1x128x256xbf16> to vector<128x256xbf16>
    %cst_23 = arith.constant dense<0.000000e+00> : vector<16x256xf32>
    %24 = tpu.matmul %21, %23, %cst_23 {dimension_numbers = #tpu.dot_dimension_numbers<[1], [0], [0], [1], [0, 0, 1, 1], [], []>} : vector<16x128xbf16>, vector<128x256xbf16>, vector<16x256xf32> -> vector<16x256xf32>
    %25 = arith.addf %20, %24 : vector<16x256xf32>
    %c4_24 = arith.constant 4 : index
    %c0_25 = arith.constant 0 : index
    %26 = vector.load %arg16[%c4_24, %c0_25] : memref<24x256xbf16, #tpu.memory_space<vmem>>, vector<16x128xbf16>
    %c2_26 = arith.constant 2 : index
    %c0_27 = arith.constant 0 : index
    %c0_28 = arith.constant 0 : index
    %27 = vector.load %arg4[%c2_26, %c0_27, %c0_28] : memref<5x128x256xbf16, #tpu.memory_space<vmem>>, vector<1x128x256xbf16>
    %28 = vector.shape_cast %27 : vector<1x128x256xbf16> to vector<128x256xbf16>
    %cst_29 = arith.constant dense<0.000000e+00> : vector<16x256xf32>
    %29 = tpu.matmul %26, %28, %cst_29 {dimension_numbers = #tpu.dot_dimension_numbers<[1], [0], [0], [1], [0, 0, 1, 1], [], []>} : vector<16x128xbf16>, vector<128x256xbf16>, vector<16x256xf32> -> vector<16x256xf32>
    %30 = arith.addf %25, %29 : vector<16x256xf32>
    %c5 = arith.constant 5 : index
    %c0_30 = arith.constant 0 : index
    %31 = vector.load %arg16[%c5, %c0_30] : memref<24x256xbf16, #tpu.memory_space<vmem>>, vector<16x128xbf16>
    %c3_31 = arith.constant 3 : index
    %c0_32 = arith.constant 0 : index
    %c0_33 = arith.constant 0 : index
    %32 = vector.load %arg4[%c3_31, %c0_32, %c0_33] : memref<5x128x256xbf16, #tpu.memory_space<vmem>>, vector<1x128x256xbf16>
    %33 = vector.shape_cast %32 : vector<1x128x256xbf16> to vector<128x256xbf16>
    %cst_34 = arith.constant dense<0.000000e+00> : vector<16x256xf32>
    %34 = tpu.matmul %31, %33, %cst_34 {dimension_numbers = #tpu.dot_dimension_numbers<[1], [0], [0], [1], [0, 0, 1, 1], [], []>} : vector<16x128xbf16>, vector<128x256xbf16>, vector<16x256xf32> -> vector<16x256xf32>
    %35 = arith.addf %30, %34 : vector<16x256xf32>
    %c6 = arith.constant 6 : index
    %c0_35 = arith.constant 0 : index
    %36 = vector.load %arg16[%c6, %c0_35] : memref<24x256xbf16, #tpu.memory_space<vmem>>, vector<16x128xbf16>
    %c4_36 = arith.constant 4 : index
    %c0_37 = arith.constant 0 : index
    %c0_38 = arith.constant 0 : index
    %37 = vector.load %arg4[%c4_36, %c0_37, %c0_38] : memref<5x128x256xbf16, #tpu.memory_space<vmem>>, vector<1x128x256xbf16>
    %38 = vector.shape_cast %37 : vector<1x128x256xbf16> to vector<128x256xbf16>
    %cst_39 = arith.constant dense<0.000000e+00> : vector<16x256xf32>
    %39 = tpu.matmul %36, %38, %cst_39 {dimension_numbers = #tpu.dot_dimension_numbers<[1], [0], [0], [1], [0, 0, 1, 1], [], []>} : vector<16x128xbf16>, vector<128x256xbf16>, vector<16x256xf32> -> vector<16x256xf32>
    %40 = arith.addf %35, %39 : vector<16x256xf32>
    %c0_40 = arith.constant 0 : index
    %c0_41 = arith.constant 0 : index
    %41 = vector.load %arg5[%c0_40, %c0_41] : memref<1x256xf32, #tpu.memory_space<vmem>>, vector<1x256xf32>
    %42 = vector.broadcast %41 : vector<1x256xf32> to vector<16x256xf32>
    %43 = arith.addf %40, %42 : vector<16x256xf32>
    %cst_42 = arith.constant 0.000000e+00 : f32
    %44 = vector.broadcast %cst_42 : f32 to vector<16x256xf32>
    %45 = arith.maximumf %43, %44 : vector<16x256xf32>
    %46 = arith.truncf %45 : vector<16x256xf32> to vector<16x256xbf16>
    %c4_43 = arith.constant 4 : index
    %c0_44 = arith.constant 0 : index
    %47 = vector.load %arg17[%c4_43, %c0_44] : memref<24x256xbf16, #tpu.memory_space<vmem>>, vector<16x256xbf16>
    tpu.vector_store %arg17[%c4_43, %c0_44], %46 {strides = array<i32>} : memref<24x256xbf16, #tpu.memory_space<vmem>>, vector<16x256xbf16>,
    %cst_45 = arith.constant 0.000000e+00 : f32
    %48 = vector.broadcast %cst_45 : f32 to vector<16x256xf32>
    %c2_46 = arith.constant 2 : index
    %c0_47 = arith.constant 0 : index
    %49 = vector.load %arg17[%c2_46, %c0_47] : memref<24x256xbf16, #tpu.memory_space<vmem>>, vector<16x256xbf16>
    %c0_48 = arith.constant 0 : index
    %c0_49 = arith.constant 0 : index
    %c0_50 = arith.constant 0 : index
    %50 = vector.load %arg6[%c0_48, %c0_49, %c0_50] : memref<5x256x256xbf16, #tpu.memory_space<vmem>>, vector<1x256x256xbf16>
    %51 = vector.shape_cast %50 : vector<1x256x256xbf16> to vector<256x256xbf16>
    %cst_51 = arith.constant dense<0.000000e+00> : vector<16x256xf32>
    %52 = tpu.matmul %49, %51, %cst_51 {dimension_numbers = #tpu.dot_dimension_numbers<[1], [0], [0], [1], [0, 0, 1, 1], [], []>} : vector<16x256xbf16>, vector<256x256xbf16>, vector<16x256xf32> -> vector<16x256xf32>
    %53 = arith.addf %48, %52 : vector<16x256xf32>
    %c3_52 = arith.constant 3 : index
    %c0_53 = arith.constant 0 : index
    %54 = vector.load %arg17[%c3_52, %c0_53] : memref<24x256xbf16, #tpu.memory_space<vmem>>, vector<16x256xbf16>
    %c1_54 = arith.constant 1 : index
    %c0_55 = arith.constant 0 : index
    %c0_56 = arith.constant 0 : index
    %55 = vector.load %arg6[%c1_54, %c0_55, %c0_56] : memref<5x256x256xbf16, #tpu.memory_space<vmem>>, vector<1x256x256xbf16>
    %56 = vector.shape_cast %55 : vector<1x256x256xbf16> to vector<256x256xbf16>
    %cst_57 = arith.constant dense<0.000000e+00> : vector<16x256xf32>
    %57 = tpu.matmul %54, %56, %cst_57 {dimension_numbers = #tpu.dot_dimension_numbers<[1], [0], [0], [1], [0, 0, 1, 1], [], []>} : vector<16x256xbf16>, vector<256x256xbf16>, vector<16x256xf32> -> vector<16x256xf32>
    %58 = arith.addf %53, %57 : vector<16x256xf32>
    %c4_58 = arith.constant 4 : index
    %c0_59 = arith.constant 0 : index
    %59 = vector.load %arg17[%c4_58, %c0_59] : memref<24x256xbf16, #tpu.memory_space<vmem>>, vector<16x256xbf16>
    %c2_60 = arith.constant 2 : index
    %c0_61 = arith.constant 0 : index
    %c0_62 = arith.constant 0 : index
    %60 = vector.load %arg6[%c2_60, %c0_61, %c0_62] : memref<5x256x256xbf16, #tpu.memory_space<vmem>>, vector<1x256x256xbf16>
    %61 = vector.shape_cast %60 : vector<1x256x256xbf16> to vector<256x256xbf16>
    %cst_63 = arith.constant dense<0.000000e+00> : vector<16x256xf32>
    %62 = tpu.matmul %59, %61, %cst_63 {dimension_numbers = #tpu.dot_dimension_numbers<[1], [0], [0], [1], [0, 0, 1, 1], [], []>} : vector<16x256xbf16>, vector<256x256xbf16>, vector<16x256xf32> -> vector<16x256xf32>
    %63 = arith.addf %58, %62 : vector<16x256xf32>
    %c5_64 = arith.constant 5 : index
    %c0_65 = arith.constant 0 : index
    %64 = vector.load %arg17[%c5_64, %c0_65] : memref<24x256xbf16, #tpu.memory_space<vmem>>, vector<16x256xbf16>
    %c3_66 = arith.constant 3 : index
    %c0_67 = arith.constant 0 : index
    %c0_68 = arith.constant 0 : index
    %65 = vector.load %arg6[%c3_66, %c0_67, %c0_68] : memref<5x256x256xbf16, #tpu.memory_space<vmem>>, vector<1x256x256xbf16>
    %66 = vector.shape_cast %65 : vector<1x256x256xbf16> to vector<256x256xbf16>
    %cst_69 = arith.constant dense<0.000000e+00> : vector<16x256xf32>
    %67 = tpu.matmul %64, %66, %cst_69 {dimension_numbers = #tpu.dot_dimension_numbers<[1], [0], [0], [1], [0, 0, 1, 1], [], []>} : vector<16x256xbf16>, vector<256x256xbf16>, vector<16x256xf32> -> vector<16x256xf32>
    %68 = arith.addf %63, %67 : vector<16x256xf32>
    %c6_70 = arith.constant 6 : index
    %c0_71 = arith.constant 0 : index
    %69 = vector.load %arg17[%c6_70, %c0_71] : memref<24x256xbf16, #tpu.memory_space<vmem>>, vector<16x256xbf16>
    %c4_72 = arith.constant 4 : index
    %c0_73 = arith.constant 0 : index
    %c0_74 = arith.constant 0 : index
    %70 = vector.load %arg6[%c4_72, %c0_73, %c0_74] : memref<5x256x256xbf16, #tpu.memory_space<vmem>>, vector<1x256x256xbf16>
    %71 = vector.shape_cast %70 : vector<1x256x256xbf16> to vector<256x256xbf16>
    %cst_75 = arith.constant dense<0.000000e+00> : vector<16x256xf32>
    %72 = tpu.matmul %69, %71, %cst_75 {dimension_numbers = #tpu.dot_dimension_numbers<[1], [0], [0], [1], [0, 0, 1, 1], [], []>} : vector<16x256xbf16>, vector<256x256xbf16>, vector<16x256xf32> -> vector<16x256xf32>
    %73 = arith.addf %68, %72 : vector<16x256xf32>
    %c0_76 = arith.constant 0 : index
    %c0_77 = arith.constant 0 : index
    %74 = vector.load %arg7[%c0_76, %c0_77] : memref<1x256xf32, #tpu.memory_space<vmem>>, vector<1x256xf32>
    %75 = vector.broadcast %74 : vector<1x256xf32> to vector<16x256xf32>
    %76 = arith.addf %73, %75 : vector<16x256xf32>
    %cst_78 = arith.constant 0.000000e+00 : f32
    %77 = vector.broadcast %cst_78 : f32 to vector<16x256xf32>
    %78 = arith.maximumf %76, %77 : vector<16x256xf32>
    %79 = arith.truncf %78 : vector<16x256xf32> to vector<16x256xbf16>
    %c4_79 = arith.constant 4 : index
    %c0_80 = arith.constant 0 : index
    %80 = vector.load %arg16[%c4_79, %c0_80] : memref<24x256xbf16, #tpu.memory_space<vmem>>, vector<16x256xbf16>
    tpu.vector_store %arg16[%c4_79, %c0_80], %79 {strides = array<i32>} : memref<24x256xbf16, #tpu.memory_space<vmem>>, vector<16x256xbf16>,
    %cst_81 = arith.constant 0.000000e+00 : f32
    %81 = vector.broadcast %cst_81 : f32 to vector<16x256xf32>
    %c2_82 = arith.constant 2 : index
    %c0_83 = arith.constant 0 : index
    %82 = vector.load %arg16[%c2_82, %c0_83] : memref<24x256xbf16, #tpu.memory_space<vmem>>, vector<16x256xbf16>
    %c0_84 = arith.constant 0 : index
    %c0_85 = arith.constant 0 : index
    %c0_86 = arith.constant 0 : index
    %83 = vector.load %arg8[%c0_84, %c0_85, %c0_86] : memref<5x256x256xbf16, #tpu.memory_space<vmem>>, vector<1x256x256xbf16>
    %84 = vector.shape_cast %83 : vector<1x256x256xbf16> to vector<256x256xbf16>
    %cst_87 = arith.constant dense<0.000000e+00> : vector<16x256xf32>
    %85 = tpu.matmul %82, %84, %cst_87 {dimension_numbers = #tpu.dot_dimension_numbers<[1], [0], [0], [1], [0, 0, 1, 1], [], []>} : vector<16x256xbf16>, vector<256x256xbf16>, vector<16x256xf32> -> vector<16x256xf32>
    %86 = arith.addf %81, %85 : vector<16x256xf32>
    %c3_88 = arith.constant 3 : index
    %c0_89 = arith.constant 0 : index
    %87 = vector.load %arg16[%c3_88, %c0_89] : memref<24x256xbf16, #tpu.memory_space<vmem>>, vector<16x256xbf16>
    %c1_90 = arith.constant 1 : index
    %c0_91 = arith.constant 0 : index
    %c0_92 = arith.constant 0 : index
    %88 = vector.load %arg8[%c1_90, %c0_91, %c0_92] : memref<5x256x256xbf16, #tpu.memory_space<vmem>>, vector<1x256x256xbf16>
    %89 = vector.shape_cast %88 : vector<1x256x256xbf16> to vector<256x256xbf16>
    %cst_93 = arith.constant dense<0.000000e+00> : vector<16x256xf32>
    %90 = tpu.matmul %87, %89, %cst_93 {dimension_numbers = #tpu.dot_dimension_numbers<[1], [0], [0], [1], [0, 0, 1, 1], [], []>} : vector<16x256xbf16>, vector<256x256xbf16>, vector<16x256xf32> -> vector<16x256xf32>
    %91 = arith.addf %86, %90 : vector<16x256xf32>
    %c4_94 = arith.constant 4 : index
    %c0_95 = arith.constant 0 : index
    %92 = vector.load %arg16[%c4_94, %c0_95] : memref<24x256xbf16, #tpu.memory_space<vmem>>, vector<16x256xbf16>
    %c2_96 = arith.constant 2 : index
    %c0_97 = arith.constant 0 : index
    %c0_98 = arith.constant 0 : index
    %93 = vector.load %arg8[%c2_96, %c0_97, %c0_98] : memref<5x256x256xbf16, #tpu.memory_space<vmem>>, vector<1x256x256xbf16>
    %94 = vector.shape_cast %93 : vector<1x256x256xbf16> to vector<256x256xbf16>
    %cst_99 = arith.constant dense<0.000000e+00> : vector<16x256xf32>
    %95 = tpu.matmul %92, %94, %cst_99 {dimension_numbers = #tpu.dot_dimension_numbers<[1], [0], [0], [1], [0, 0, 1, 1], [], []>} : vector<16x256xbf16>, vector<256x256xbf16>, vector<16x256xf32> -> vector<16x256xf32>
    %96 = arith.addf %91, %95 : vector<16x256xf32>
    %c5_100 = arith.constant 5 : index
    %c0_101 = arith.constant 0 : index
    %97 = vector.load %arg16[%c5_100, %c0_101] : memref<24x256xbf16, #tpu.memory_space<vmem>>, vector<16x256xbf16>
    %c3_102 = arith.constant 3 : index
    %c0_103 = arith.constant 0 : index
    %c0_104 = arith.constant 0 : index
    %98 = vector.load %arg8[%c3_102, %c0_103, %c0_104] : memref<5x256x256xbf16, #tpu.memory_space<vmem>>, vector<1x256x256xbf16>
    %99 = vector.shape_cast %98 : vector<1x256x256xbf16> to vector<256x256xbf16>
    %cst_105 = arith.constant dense<0.000000e+00> : vector<16x256xf32>
    %100 = tpu.matmul %97, %99, %cst_105 {dimension_numbers = #tpu.dot_dimension_numbers<[1], [0], [0], [1], [0, 0, 1, 1], [], []>} : vector<16x256xbf16>, vector<256x256xbf16>, vector<16x256xf32> -> vector<16x256xf32>
    %101 = arith.addf %96, %100 : vector<16x256xf32>
    %c6_106 = arith.constant 6 : index
    %c0_107 = arith.constant 0 : index
    %102 = vector.load %arg16[%c6_106, %c0_107] : memref<24x256xbf16, #tpu.memory_space<vmem>>, vector<16x256xbf16>
    %c4_108 = arith.constant 4 : index
    %c0_109 = arith.constant 0 : index
    %c0_110 = arith.constant 0 : index
    %103 = vector.load %arg8[%c4_108, %c0_109, %c0_110] : memref<5x256x256xbf16, #tpu.memory_space<vmem>>, vector<1x256x256xbf16>
    %104 = vector.shape_cast %103 : vector<1x256x256xbf16> to vector<256x256xbf16>
    %cst_111 = arith.constant dense<0.000000e+00> : vector<16x256xf32>
    %105 = tpu.matmul %102, %104, %cst_111 {dimension_numbers = #tpu.dot_dimension_numbers<[1], [0], [0], [1], [0, 0, 1, 1], [], []>} : vector<16x256xbf16>, vector<256x256xbf16>, vector<16x256xf32> -> vector<16x256xf32>
    %106 = arith.addf %101, %105 : vector<16x256xf32>
    %c0_112 = arith.constant 0 : index
    %c0_113 = arith.constant 0 : index
    %107 = vector.load %arg9[%c0_112, %c0_113] : memref<1x256xf32, #tpu.memory_space<vmem>>, vector<1x256xf32>
    %108 = vector.broadcast %107 : vector<1x256xf32> to vector<16x256xf32>
    %109 = arith.addf %106, %108 : vector<16x256xf32>
    %cst_114 = arith.constant 0.000000e+00 : f32
    %110 = vector.broadcast %cst_114 : f32 to vector<16x256xf32>
    %111 = arith.maximumf %109, %110 : vector<16x256xf32>
    %112 = arith.truncf %111 : vector<16x256xf32> to vector<16x256xbf16>
    %c4_115 = arith.constant 4 : index
    %c0_116 = arith.constant 0 : index
    %113 = vector.load %arg17[%c4_115, %c0_116] : memref<24x256xbf16, #tpu.memory_space<vmem>>, vector<16x256xbf16>
    tpu.vector_store %arg17[%c4_115, %c0_116], %112 {strides = array<i32>} : memref<24x256xbf16, #tpu.memory_space<vmem>>, vector<16x256xbf16>,
    %cst_117 = arith.constant 0.000000e+00 : f32
    %114 = vector.broadcast %cst_117 : f32 to vector<16x256xf32>
    %c2_118 = arith.constant 2 : index
    %c0_119 = arith.constant 0 : index
    %115 = vector.load %arg17[%c2_118, %c0_119] : memref<24x256xbf16, #tpu.memory_space<vmem>>, vector<16x256xbf16>
    %c0_120 = arith.constant 0 : index
    %c0_121 = arith.constant 0 : index
    %c0_122 = arith.constant 0 : index
    %116 = vector.load %arg10[%c0_120, %c0_121, %c0_122] : memref<5x256x256xbf16, #tpu.memory_space<vmem>>, vector<1x256x256xbf16>
    %117 = vector.shape_cast %116 : vector<1x256x256xbf16> to vector<256x256xbf16>
    %cst_123 = arith.constant dense<0.000000e+00> : vector<16x256xf32>
    %118 = tpu.matmul %115, %117, %cst_123 {dimension_numbers = #tpu.dot_dimension_numbers<[1], [0], [0], [1], [0, 0, 1, 1], [], []>} : vector<16x256xbf16>, vector<256x256xbf16>, vector<16x256xf32> -> vector<16x256xf32>
    %119 = arith.addf %114, %118 : vector<16x256xf32>
    %c3_124 = arith.constant 3 : index
    %c0_125 = arith.constant 0 : index
    %120 = vector.load %arg17[%c3_124, %c0_125] : memref<24x256xbf16, #tpu.memory_space<vmem>>, vector<16x256xbf16>
    %c1_126 = arith.constant 1 : index
    %c0_127 = arith.constant 0 : index
    %c0_128 = arith.constant 0 : index
    %121 = vector.load %arg10[%c1_126, %c0_127, %c0_128] : memref<5x256x256xbf16, #tpu.memory_space<vmem>>, vector<1x256x256xbf16>
    %122 = vector.shape_cast %121 : vector<1x256x256xbf16> to vector<256x256xbf16>
    %cst_129 = arith.constant dense<0.000000e+00> : vector<16x256xf32>
    %123 = tpu.matmul %120, %122, %cst_129 {dimension_numbers = #tpu.dot_dimension_numbers<[1], [0], [0], [1], [0, 0, 1, 1], [], []>} : vector<16x256xbf16>, vector<256x256xbf16>, vector<16x256xf32> -> vector<16x256xf32>
    %124 = arith.addf %119, %123 : vector<16x256xf32>
    %c4_130 = arith.constant 4 : index
    %c0_131 = arith.constant 0 : index
    %125 = vector.load %arg17[%c4_130, %c0_131] : memref<24x256xbf16, #tpu.memory_space<vmem>>, vector<16x256xbf16>
    %c2_132 = arith.constant 2 : index
    %c0_133 = arith.constant 0 : index
    %c0_134 = arith.constant 0 : index
    %126 = vector.load %arg10[%c2_132, %c0_133, %c0_134] : memref<5x256x256xbf16, #tpu.memory_space<vmem>>, vector<1x256x256xbf16>
    %127 = vector.shape_cast %126 : vector<1x256x256xbf16> to vector<256x256xbf16>
    %cst_135 = arith.constant dense<0.000000e+00> : vector<16x256xf32>
    %128 = tpu.matmul %125, %127, %cst_135 {dimension_numbers = #tpu.dot_dimension_numbers<[1], [0], [0], [1], [0, 0, 1, 1], [], []>} : vector<16x256xbf16>, vector<256x256xbf16>, vector<16x256xf32> -> vector<16x256xf32>
    %129 = arith.addf %124, %128 : vector<16x256xf32>
    %c5_136 = arith.constant 5 : index
    %c0_137 = arith.constant 0 : index
    %130 = vector.load %arg17[%c5_136, %c0_137] : memref<24x256xbf16, #tpu.memory_space<vmem>>, vector<16x256xbf16>
    %c3_138 = arith.constant 3 : index
    %c0_139 = arith.constant 0 : index
    %c0_140 = arith.constant 0 : index
    %131 = vector.load %arg10[%c3_138, %c0_139, %c0_140] : memref<5x256x256xbf16, #tpu.memory_space<vmem>>, vector<1x256x256xbf16>
    %132 = vector.shape_cast %131 : vector<1x256x256xbf16> to vector<256x256xbf16>
    %cst_141 = arith.constant dense<0.000000e+00> : vector<16x256xf32>
    %133 = tpu.matmul %130, %132, %cst_141 {dimension_numbers = #tpu.dot_dimension_numbers<[1], [0], [0], [1], [0, 0, 1, 1], [], []>} : vector<16x256xbf16>, vector<256x256xbf16>, vector<16x256xf32> -> vector<16x256xf32>
    %134 = arith.addf %129, %133 : vector<16x256xf32>
    %c6_142 = arith.constant 6 : index
    %c0_143 = arith.constant 0 : index
    %135 = vector.load %arg17[%c6_142, %c0_143] : memref<24x256xbf16, #tpu.memory_space<vmem>>, vector<16x256xbf16>
    %c4_144 = arith.constant 4 : index
    %c0_145 = arith.constant 0 : index
    %c0_146 = arith.constant 0 : index
    %136 = vector.load %arg10[%c4_144, %c0_145, %c0_146] : memref<5x256x256xbf16, #tpu.memory_space<vmem>>, vector<1x256x256xbf16>
    %137 = vector.shape_cast %136 : vector<1x256x256xbf16> to vector<256x256xbf16>
    %cst_147 = arith.constant dense<0.000000e+00> : vector<16x256xf32>
    %138 = tpu.matmul %135, %137, %cst_147 {dimension_numbers = #tpu.dot_dimension_numbers<[1], [0], [0], [1], [0, 0, 1, 1], [], []>} : vector<16x256xbf16>, vector<256x256xbf16>, vector<16x256xf32> -> vector<16x256xf32>
    %139 = arith.addf %134, %138 : vector<16x256xf32>
    %c0_148 = arith.constant 0 : index
    %c0_149 = arith.constant 0 : index
    %140 = vector.load %arg11[%c0_148, %c0_149] : memref<1x256xf32, #tpu.memory_space<vmem>>, vector<1x256xf32>
    %141 = vector.broadcast %140 : vector<1x256xf32> to vector<16x256xf32>
    %142 = arith.addf %139, %141 : vector<16x256xf32>
    %cst_150 = arith.constant 0.000000e+00 : f32
    %143 = vector.broadcast %cst_150 : f32 to vector<16x256xf32>
    %144 = arith.maximumf %142, %143 : vector<16x256xf32>
    %145 = arith.truncf %144 : vector<16x256xf32> to vector<16x256xbf16>
    %c4_151 = arith.constant 4 : index
    %c0_152 = arith.constant 0 : index
    %146 = vector.load %arg16[%c4_151, %c0_152] : memref<24x256xbf16, #tpu.memory_space<vmem>>, vector<16x256xbf16>
    tpu.vector_store %arg16[%c4_151, %c0_152], %145 {strides = array<i32>} : memref<24x256xbf16, #tpu.memory_space<vmem>>, vector<16x256xbf16>,
    %cst_153 = arith.constant 0.000000e+00 : f32
    %147 = vector.broadcast %cst_153 : f32 to vector<16x128xf32>
    %c3_154 = arith.constant 3 : index
    %c0_155 = arith.constant 0 : index
    %148 = vector.load %arg16[%c3_154, %c0_155] : memref<24x256xbf16, #tpu.memory_space<vmem>>, vector<16x256xbf16>
    %c0_156 = arith.constant 0 : index
    %c0_157 = arith.constant 0 : index
    %c0_158 = arith.constant 0 : index
    %149 = vector.load %arg12[%c0_156, %c0_157, %c0_158] : memref<3x256x128xbf16, #tpu.memory_space<vmem>>, vector<1x256x128xbf16>
    %150 = vector.shape_cast %149 : vector<1x256x128xbf16> to vector<256x128xbf16>
    %cst_159 = arith.constant dense<0.000000e+00> : vector<16x128xf32>
    %151 = tpu.matmul %148, %150, %cst_159 {dimension_numbers = #tpu.dot_dimension_numbers<[1], [0], [0], [1], [0, 0, 1, 1], [], []>} : vector<16x256xbf16>, vector<256x128xbf16>, vector<16x128xf32> -> vector<16x128xf32>
    %152 = arith.addf %147, %151 : vector<16x128xf32>
    %c4_160 = arith.constant 4 : index
    %c0_161 = arith.constant 0 : index
    %153 = vector.load %arg16[%c4_160, %c0_161] : memref<24x256xbf16, #tpu.memory_space<vmem>>, vector<16x256xbf16>
    %c1_162 = arith.constant 1 : index
    %c0_163 = arith.constant 0 : index
    %c0_164 = arith.constant 0 : index
    %154 = vector.load %arg12[%c1_162, %c0_163, %c0_164] : memref<3x256x128xbf16, #tpu.memory_space<vmem>>, vector<1x256x128xbf16>
    %155 = vector.shape_cast %154 : vector<1x256x128xbf16> to vector<256x128xbf16>
    %cst_165 = arith.constant dense<0.000000e+00> : vector<16x128xf32>
    %156 = tpu.matmul %153, %155, %cst_165 {dimension_numbers = #tpu.dot_dimension_numbers<[1], [0], [0], [1], [0, 0, 1, 1], [], []>} : vector<16x256xbf16>, vector<256x128xbf16>, vector<16x128xf32> -> vector<16x128xf32>
    %157 = arith.addf %152, %156 : vector<16x128xf32>
    %c5_166 = arith.constant 5 : index
    %c0_167 = arith.constant 0 : index
    %158 = vector.load %arg16[%c5_166, %c0_167] : memref<24x256xbf16, #tpu.memory_space<vmem>>, vector<16x256xbf16>
    %c2_168 = arith.constant 2 : index
    %c0_169 = arith.constant 0 : index
    %c0_170 = arith.constant 0 : index
    %159 = vector.load %arg12[%c2_168, %c0_169, %c0_170] : memref<3x256x128xbf16, #tpu.memory_space<vmem>>, vector<1x256x128xbf16>
    %160 = vector.shape_cast %159 : vector<1x256x128xbf16> to vector<256x128xbf16>
    %cst_171 = arith.constant dense<0.000000e+00> : vector<16x128xf32>
    %161 = tpu.matmul %158, %160, %cst_171 {dimension_numbers = #tpu.dot_dimension_numbers<[1], [0], [0], [1], [0, 0, 1, 1], [], []>} : vector<16x256xbf16>, vector<256x128xbf16>, vector<16x128xf32> -> vector<16x128xf32>
    %162 = arith.addf %157, %161 : vector<16x128xf32>
    %c0_172 = arith.constant 0 : index
    %c0_173 = arith.constant 0 : index
    %163 = vector.load %arg13[%c0_172, %c0_173] : memref<1x128xf32, #tpu.memory_space<vmem>>, vector<1x128xf32>
    %164 = vector.broadcast %163 : vector<1x128xf32> to vector<16x128xf32>
    %165 = arith.addf %162, %164 : vector<16x128xf32>
    %cst_174 = arith.constant dense<0.000000e+00> : vector<128xf32>
    %166 = vector.multi_reduction <add>, %165, %cst_174 [0] : vector<16x128xf32> to vector<128xf32>
    %167 = vector.shape_cast %166 : vector<128xf32> to vector<1x128xf32>
    %cst_175 = arith.constant 6.250000e-02 : f32
    %168 = vector.broadcast %cst_175 : f32 to vector<1x128xf32>
    %169 = arith.mulf %167, %168 : vector<1x128xf32>
    %170 = arith.mulf %169, %169 : vector<1x128xf32>
    %cst_176 = arith.constant dense<0.000000e+00> : vector<1xf32>
    %171 = vector.multi_reduction <add>, %170, %cst_176 [1] : vector<1x128xf32> to vector<1xf32>
    %172 = vector.shape_cast %171 : vector<1xf32> to vector<1x1xf32>
    %cst_177 = arith.constant 1.000000e-24 : f32
    %173 = vector.broadcast %cst_177 : f32 to vector<1x1xf32>
    %174 = arith.maximumf %172, %173 : vector<1x1xf32>
    %175 = math.rsqrt %174 : vector<1x1xf32>
    %176 = vector.broadcast %175 : vector<1x1xf32> to vector<1x128xf32>
    %177 = arith.mulf %169, %176 : vector<1x128xf32>
    %c0_178 = arith.constant 0 : index
    %c0_179 = arith.constant 0 : index
    %178 = vector.load %arg14[%c0_178, %c0_179] : memref<128x10xf32, #tpu.memory_space<vmem>>, vector<128x10xf32>
    %cst_180 = arith.constant dense<0.000000e+00> : vector<1x10xf32>
    %179 = tpu.matmul %177, %178, %cst_180 {dimension_numbers = #tpu.dot_dimension_numbers<[1], [0], [0], [1], [0, 0, 1, 1], [], []>} : vector<1x128xf32>, vector<128x10xf32>, vector<1x10xf32> -> vector<1x10xf32>
    %c0_181 = arith.constant 0 : index
    %c0_182 = arith.constant 0 : index
    %c0_183 = arith.constant 0 : index
    %180 = vector.load %arg15[%c0_181, %c0_182, %c0_183] : memref<1x1x10xf32, #tpu.memory_space<vmem>>, vector<1x1x10xf32>
    %181 = vector.shape_cast %180 : vector<1x1x10xf32> to vector<1x10xf32>
    %182 = vector.shape_cast %179 : vector<1x10xf32> to vector<1x1x10xf32>
    tpu.vector_store %arg15[%c0_181, %c0_182, %c0_183], %182 {strides = array<i32>} : memref<1x1x10xf32, #tpu.memory_space<vmem>>, vector<1x1x10xf32>,
    return
  }
  func.func @transform_0(%arg0: i32) -> (i32, i32, i32) {
    %c0_i32 = arith.constant 0 : i32
    %c0_i32_0 = arith.constant 0 : i32
    %c0_i32_1 = arith.constant 0 : i32
    return %arg0, %c0_i32, %c0_i32_0 : i32, i32, i32
  }
  func.func @transform_1(%arg0: i32) -> (i32, i32) {
    %c0_i32 = arith.constant 0 : i32
    %c0_i32_0 = arith.constant 0 : i32
    %c0_i32_1 = arith.constant 0 : i32
    return %c0_i32, %c0_i32_0 : i32, i32
  }
  func.func @transform_2(%arg0: i32) -> (i32, i32) {
    %c0_i32 = arith.constant 0 : i32
    %c0_i32_0 = arith.constant 0 : i32
    %c0_i32_1 = arith.constant 0 : i32
    return %c0_i32, %c0_i32_0 : i32, i32
  }
  func.func @transform_3(%arg0: i32) -> (i32, i32, i32) {
    %c0_i32 = arith.constant 0 : i32
    %c0_i32_0 = arith.constant 0 : i32
    %c0_i32_1 = arith.constant 0 : i32
    %c0_i32_2 = arith.constant 0 : i32
    return %c0_i32, %c0_i32_0, %c0_i32_1 : i32, i32, i32
  }
  func.func @transform_4(%arg0: i32) -> (i32, i32) {
    %c0_i32 = arith.constant 0 : i32
    %c0_i32_0 = arith.constant 0 : i32
    %c0_i32_1 = arith.constant 0 : i32
    return %c0_i32, %c0_i32_0 : i32, i32
  }
  func.func @transform_5(%arg0: i32) -> (i32, i32, i32) {
    %c0_i32 = arith.constant 0 : i32
    %c0_i32_0 = arith.constant 0 : i32
    %c0_i32_1 = arith.constant 0 : i32
    %c0_i32_2 = arith.constant 0 : i32
    return %c0_i32, %c0_i32_0, %c0_i32_1 : i32, i32, i32
  }
  func.func @transform_6(%arg0: i32) -> (i32, i32) {
    %c0_i32 = arith.constant 0 : i32
    %c0_i32_0 = arith.constant 0 : i32
    %c0_i32_1 = arith.constant 0 : i32
    return %c0_i32, %c0_i32_0 : i32, i32
  }
  func.func @transform_7(%arg0: i32) -> (i32, i32, i32) {
    %c0_i32 = arith.constant 0 : i32
    %c0_i32_0 = arith.constant 0 : i32
    %c0_i32_1 = arith.constant 0 : i32
    %c0_i32_2 = arith.constant 0 : i32
    return %c0_i32, %c0_i32_0, %c0_i32_1 : i32, i32, i32
  }
  func.func @transform_8(%arg0: i32) -> (i32, i32) {
    %c0_i32 = arith.constant 0 : i32
    %c0_i32_0 = arith.constant 0 : i32
    %c0_i32_1 = arith.constant 0 : i32
    return %c0_i32, %c0_i32_0 : i32, i32
  }
  func.func @transform_9(%arg0: i32) -> (i32, i32, i32) {
    %c0_i32 = arith.constant 0 : i32
    %c0_i32_0 = arith.constant 0 : i32
    %c0_i32_1 = arith.constant 0 : i32
    %c0_i32_2 = arith.constant 0 : i32
    return %c0_i32, %c0_i32_0, %c0_i32_1 : i32, i32, i32
  }
  func.func @transform_10(%arg0: i32) -> (i32, i32) {
    %c0_i32 = arith.constant 0 : i32
    %c0_i32_0 = arith.constant 0 : i32
    %c0_i32_1 = arith.constant 0 : i32
    return %c0_i32, %c0_i32_0 : i32, i32
  }
  func.func @transform_11(%arg0: i32) -> (i32, i32, i32) {
    %c0_i32 = arith.constant 0 : i32
    %c0_i32_0 = arith.constant 0 : i32
    %c0_i32_1 = arith.constant 0 : i32
    %c0_i32_2 = arith.constant 0 : i32
    return %c0_i32, %c0_i32_0, %c0_i32_1 : i32, i32, i32
  }
  func.func @transform_12(%arg0: i32) -> (i32, i32) {
    %c0_i32 = arith.constant 0 : i32
    %c0_i32_0 = arith.constant 0 : i32
    %c0_i32_1 = arith.constant 0 : i32
    return %c0_i32, %c0_i32_0 : i32, i32
  }
  func.func @transform_13(%arg0: i32) -> (i32, i32) {
    %c0_i32 = arith.constant 0 : i32
    %c0_i32_0 = arith.constant 0 : i32
    %c0_i32_1 = arith.constant 0 : i32
    return %c0_i32, %c0_i32_0 : i32, i32
  }
  func.func @transform_14(%arg0: i32) -> (i32, i32, i32) {
    %c0_i32 = arith.constant 0 : i32
    %c0_i32_0 = arith.constant 0 : i32
    %c0_i32_1 = arith.constant 0 : i32
    return %arg0, %c0_i32, %c0_i32_0 : i32, i32, i32
  }
}

</mosaic_0001>

<bundles_post_ra>
// kernel: _lambda_.1
= control target key start
LH: loop header
LB: loop body
LE: loop exit
PB: predicated region body
PF: predicated region fallthrough
CT: control target
= control target key end

     0   :  { %s11077_s0 = inlined_call_operand.vmem [shape: bf16[2,16,32], index: 0, kind: input, shape index: {}]   ;;  %s11078_s1 = inlined_call_operand.vmem [shape: bf16[32,128], index: 1, kind: input, shape index: {}]   ;;  %s11079_s2 = inlined_call_operand.vmem [shape: f32[1,128], index: 2, kind: input, shape index: {}]   ;;  %s11080_s3 = inlined_call_operand.vmem [shape: bf16[5,128,256], index: 3, kind: input, shape index: {}]   ;;  %s11081_s4 = inlined_call_operand.vmem [shape: f32[1,256], index: 4, kind: input, shape index: {}]   ;;  %s11082_s5 = inlined_call_operand.vmem [shape: bf16[5,256,256], index: 5, kind: input, shape index: {}]   ;;  %s11083_s6 = inlined_call_operand.vmem [shape: f32[1,256], index: 6, kind: input, shape index: {}]   ;;  %s11084_s7 = inlined_call_operand.vmem [shape: bf16[5,256,256], index: 7, kind: input, shape index: {}]   ;;  %s11085_s8 = inlined_call_operand.vmem [shape: f32[1,256], index: 8, kind: input, shape index: {}]   ;;  %s11086_s9 = inlined_call_operand.vmem [shape: bf16[5,256,256], index: 9, kind: input, shape index: {}]   ;;  %s11087_s10 = inlined_call_operand.vmem [shape: f32[1,256], index: 10, kind: input, shape index: {}]   ;;  %s11088_s11 = inlined_call_operand.vmem [shape: bf16[3,256,128], index: 11, kind: input, shape index: {}]   ;;  %s11089_s12 = inlined_call_operand.vmem [shape: f32[1,128], index: 12, kind: input, shape index: {}]   ;;  %s11090_s13 = inlined_call_operand.vmem [shape: f32[128,10], index: 13, kind: input, shape index: {}]   ;;  %s11091_s14 = inlined_call_operand.hbm [shape: f32[2,1,10], index: 14, kind: output, shape index: {}]  }
   0x1   :  { %11095 = sst [smem:[#allocation10_spill]] %s11078_s1 }
   0x2   :  { %19 = vsyncpa [#allocation5], 0 }
   0x3   :  { %21 = vsyncpa [#allocation5 + $0x1], 0  ;;  %s8835_s29 = smov 0   ;;  %s8837_s30 = smov 0  }
   0x4   :  { %s8839_s15 = smov 0   ;;  %s8841_s16 = smov 0  }
   0x5 LB: > { %11096 = sst [smem:[#allocation7_spill]] %s8749_s15  ;;  %s8856_s17 = sadd.s32 4294967295, %s8753_s16   ;;  %s8753_s16 = sphi %s8841_s16, %s11104_s16   ;;  %s8749_s15 = sphi %s8839_s15, %s11109_s15   ;;  %s8745_s30 = sphi %s8837_s30, %s11108_s30   ;;  %s8741_s29 = sphi %s8835_s29, %s11107_s29  }
   0x6   : > { %s6303_s18 = sadd.s32 4294967294, %s8753_s16   ;;  %s8860_s19 = sadd.s32 1, %s8753_s16  }
   0x7   : > { %11097 = sst [smem:[#allocation8_spill]] %s8860_s19  ;;  %s333_s20 = sadd.s32 1, %s8749_s15 }
   0x8   : > { %s330_s21 = ssub.s32 %s8753_s16, %s8860_s19  ;;  %p343_p0 = scmp.ne.s32.totalorder %s8749_s15, %s8745_s30 }
   0x9   : > { %p331_p1 = scmp.eq.s32.totalorder %s330_s21, 0  ;;  %p344_p2 = scmp.eq.s32.totalorder %s8856_s17, 1 }
   0xa   : > { %p349_p3 = scmp.ne.s32.totalorder %s8745_s30, %s8741_s29  ;;  %p350_p4 = scmp.eq.s32.totalorder %s6303_s18, 1 }
   0xb   : > { %s8871_s22 = scalar_select %p331_p1, %s8749_s15, %s333_s20  }
   0xc   : > { %p8873_p5 = por %p344_p2, %p343_p0  ;;  %p8877_p6 = por %p350_p4, %p349_p3 }
   0xd   : > { %11098 = sst [smem:[#allocation9_spill]] %s8871_s22  ;;  %p6306_p7 = scmp.ge.s32.totalorder %s8753_s16, 1 }
   0xe   : > { %p415_p8 = scmp.lt.s32.totalorder %s8753_s16, 3 }
  0x10   : > { %p416_p9 = pnand %p6306_p7, %p415_p8 }
  0x11   : > { %s11101_s1 = sld [smem:[#allocation10_spill]] (!%p416_p9)  ;;  %v8755_v1 = vmov (!%p416_p9), 0.0   ;;  %vm8756_vm0 = vmmov (!%p416_p9), 0   ;;  %p460_p10 = scmp.lt.s32.totalorder (!%p416_p9), %s8856_s17, 1  ;;  %v7774_v3 = vld [vmem:[%s11080_s3 + $0x84] ss:$8 sps:$4 sm:$0xff] (!%p416_p9)  }
  0x12   : > { %419 = sbr.rel (%p416_p9) target bundleno = 2821 (0xb05), region = 76  ;;  %7595 = vmatprep.subr.bf16.mxu1 (!%p416_p9), %v8755_v1  ;;  %7599 = vmatprep.mubr.msk.bf16.mxu1 (!%p416_p9), %vm8756_vm0, %v8755_v1  ;;  %v8757_v4 = vmov (!%p416_p9), 0   ;;  %v7772_v5 = vld [vmem:[%s11080_s3 + $0x80] ss:$8 sps:$4 sm:$0xff] (!%p416_p9)   ;;  %vm502_vm1 = vcmask (!%p416_p9), 261120   ;;  %vm555_vm2 = vcmask (!%p416_p9), 1041408  }
  0x13   : > { %466 = vst [vmem:[#allocation2] sm:$0xff] (!%p416_p9), %v8757_v4  ;;  %467 = vst [vmem:[#allocation2 + $0x8] sm:$0xff] (!%p416_p9), %v8757_v4  ;;  %v7777_v7 = vld [vmem:[%s11080_s3 + $0x94] ss:$8 sps:$4 sm:$0xff] (!%p416_p9)   ;;  %v7775_v8 = vld [vmem:[%s11080_s3 + $0x90] ss:$8 sps:$4 sm:$0xff] (!%p416_p9)  }
  0x14   : > { %468 = vst [vmem:[#allocation2 + $0x10] sm:$0xff] (!%p416_p9), %v8757_v4  ;;  %469 = vst [vmem:[#allocation3] sm:$0xff] (!%p416_p9), %v8757_v4  ;;  %v7780_v9 = vld [vmem:[%s11080_s3 + $0xa4] ss:$8 sps:$4 sm:$0xff] (!%p416_p9)   ;;  %v7778_v10 = vld [vmem:[%s11080_s3 + $0xa0] ss:$8 sps:$4 sm:$0xff] (!%p416_p9)  }
  0x15   : > { %471 = vst [vmem:[#allocation3 + $0x10] sm:$0xff] (!%p416_p9), %v8757_v4  ;;  %v7783_v11 = vld [vmem:[%s11080_s3 + $0xb4] ss:$8 sps:$4 sm:$0xff] (!%p416_p9)   ;;  %v7781_v12 = vld [vmem:[%s11080_s3 + $0xb0] ss:$8 sps:$4 sm:$0xff] (!%p416_p9)   ;;  %vm556_vm3 = vcmask (!%p416_p9), 1045508  }
  0x16   : > { %v7786_v13 = vld [vmem:[%s11080_s3 + $0xc4] ss:$8 sps:$4 sm:$0xff] (!%p416_p9)   ;;  %v7784_v14 = vld [vmem:[%s11080_s3 + $0xc0] ss:$8 sps:$4 sm:$0xff] (!%p416_p9)   ;;  %v7787_v15 = vld [vmem:[%s11080_s3 + $0xd0] ss:$8 sps:$4 sm:$0xff] (!%p416_p9)  }
  0x17   : > { %v7769_v0 = vld [vmem:[%s11101_s1] sm:$0xff] (!%p416_p9)   ;;  %v7770_v2 = vld [vmem:[%s11101_s1 + $0x8] sm:$0xff] (!%p416_p9)   ;;  %v7789_v16 = vld [vmem:[%s11080_s3 + $0xd4] ss:$8 sps:$4 sm:$0xff] (!%p416_p9)   ;;  %vm614_vm5 = vsmask.f32 (!%p416_p9), 6400 }
  0x18   : > { %7596 = vmatpush3.bf16.msra.mxu1 (!%p416_p9), %v7769_v0  ;;  %v7792_v17 = vld [vmem:[%s11080_s3 + $0xe4] ss:$8 sps:$4 sm:$0xff] (!%p416_p9)   ;;  %v7790_v18 = vld [vmem:[%s11080_s3 + $0xe0] ss:$8 sps:$4 sm:$0xff] (!%p416_p9)   ;;  %v7795_v19 = vld [vmem:[%s11080_s3 + $0xf4] ss:$8 sps:$4 sm:$0xff] (!%p416_p9)  }
  0x19   : > { %7597 = vmatprep.subr.bf16.mxu1 %v8755_v1  ;;  %s461_s21 = scalar_select %p460_p10, %s8856_s17, 1  ;;  %v7793_v20 = vld [vmem:[%s11080_s3 + $0xf0] ss:$8 sps:$4 sm:$0xff]   ;;  %v7798_v21 = vld [vmem:[%s11080_s3 + $0x4] ss:$8 sps:$4 sm:$0xff]   ;;  %vm8952_vm4 = vmor %vm555_vm2, %vm556_vm3  ;;  %vm759_vm6 = vcmask 1046528  }
  0x1a   : > { %v6309_v22 = vld [vmem:[%s11079_s2] ss:$0 sm:$0xff]  ;;  %v7803_v54 = vld [vmem:[%s11080_s3 + $0x14] ss:$8 sps:$4 sm:$0xff]   ;;  %v7898_v56 = vld [vmem:[%s11082_s5 + $0x104] ss:$8 sps:$4 sm:$0xff]  }
  0x1b   : > { %s7498_s27 = sshll.u32 %s461_s21, 3  ;;  %v7796_v51 = vld [vmem:[%s11080_s3] ss:$8 sps:$4 sm:$0xff]   ;;  %v7801_v58 = vld [vmem:[%s11080_s3 + $0x10] ss:$8 sps:$4 sm:$0xff]   ;;  %1679 = vmatprep.subr.bf16.mxu0 %v7898_v56  ;;  %vm908_vm7 = vcmask 1045504  }
  0x1c   : > { %7598 = vmatpush3.bf16.msra.mxu1 %v7770_v2  ;;  %s464_s22 = scalar_lea.vmem %s11077_s0, %s7498_s27  ;;  %v7900_v57 = vld [vmem:[%s11082_s5 + $0x100] ss:$8 sps:$4 sm:$0xff]   ;;  %v8985_v59 = vld [vmem:[#allocation3] sm:$0xff]  ;;  %v7806_v61 = vld [vmem:[%s11080_s3 + $0x24] ss:$8 sps:$4 sm:$0xff]   ;;  %vm1228_vm9 = vcmask 1044480  }
  0x1d   : > { %713 = vmatprep.subr.bf16.mxu1 %v7774_v3  ;;  %v7771_v6 = vld [vmem:[%s464_s22] sm:$0xff]   ;;  %v7901_v60 = vld [vmem:[%s11082_s5 + $0x114] ss:$8 sps:$4 sm:$0xff]   ;;  %1680 = vmatpush1.bf16.msra.mxu0 %v7900_v57  ;;  %v7903_v62 = vld [vmem:[%s11082_s5 + $0x110] ss:$8 sps:$4 sm:$0xff]   ;;  %s458_s19 = sand.u32 1, %s8745_s30  }
  0x1e   : > { %1681 = vmatprep.subr.bf16.mxu0 %v7901_v60  ;;  %v7904_v63 = vld [vmem:[%s11082_s5 + $0x124] ss:$8 sps:$4 sm:$0xff]   ;;  %v7804_v0 = vld [vmem:[%s11080_s3 + $0x20] ss:$8 sps:$4 sm:$0xff]   ;;  %v7809_v2 = vld [vmem:[%s11080_s3 + $0x34] ss:$8 sps:$4 sm:$0xff]  }
  0x1f   : > { %7600 = vmatmul.mubr.msk.bf16.vlgmr.msra.gmra.mrb[0].mxu1 %vm502_vm1, %v7771_v6  ;;  %v7906_v3 = vld [vmem:[%s11082_s5 + $0x120] ss:$8 sps:$4 sm:$0xff]   ;;  %v7812_v6 = vld [vmem:[%s11080_s3 + $0x44] ss:$8 sps:$4 sm:$0xff]   ;;  %v7859_v57 = vld [vmem:[%s11080_s3 + $0x1b4] ss:$8 sps:$4 sm:$0xff]  }
  0x20   : > { %714 = vmatpush1.bf16.msra.mxu1 %v7772_v5  ;;  %745 = vmatprep.mubr.bf16.mxu1 %v8757_v4  ;;  %v7907_v4 = vld [vmem:[%s11082_s5 + $0x134] ss:$8 sps:$4 sm:$0xff]   ;;  %v7807_v5 = vld [vmem:[%s11080_s3 + $0x30] ss:$8 sps:$4 sm:$0xff]   ;;  %v7854_v56 = vld [vmem:[%s11080_s3 + $0x1a0] ss:$8 sps:$4 sm:$0xff]  }
  0x21   : > { %715 = vmatprep.subr.bf16.mxu1 %v7777_v7  ;;  %1682 = vmatpush1.bf16.msra.mxu0 %v7903_v62  ;;  %v7909_v7 = vld [vmem:[%s11082_s5 + $0x130] ss:$8 sps:$4 sm:$0xff]   ;;  %v7862_v60 = vld [vmem:[%s11080_s3 + $0x1c4] ss:$8 sps:$4 sm:$0xff]   ;;  %v7865_v62 = vld [vmem:[%s11080_s3 + $0x1d4] ss:$8 sps:$4 sm:$0xff]  }
  0x22   : > { %1683 = vmatprep.subr.bf16.mxu0 %v7904_v63  ;;  %vm1061_vm8 = vsmask.f32 5376  ;;  %s7495_s20 = sshll.u32 %s8856_s17, 4  ;;  %s459_s21 = scalar_lea.vmem [#allocation4], %s458_s19  ;;  %vm6233_vm10 = vcmask 73728  }
  0x23   : > { %s6248_s25 = sshll.u32 %s459_s21, 4  ;;  %s11035_s22 = scalar_lea.hbm %s11091_s14, %s7495_s20  ;;  %s11037_s25 = int_to_ptr.vmem [resolvable:$true] %s6248_s25 }
  0x24   : > { %716 = vmatpush1.bf16.msra.mxu1 %v7775_v8  ;;  %v7910_v8 = vld [vmem:[%s11082_s5 + $0x144] ss:$8 sps:$4 sm:$0xff]   ;;  %s6236_s27 = scalar_lea.sflag [#allocation5], %s458_s19  ;;  %s8691_s28 = scalar_lea.vmem %s11037_s25, 16 }
  0x25   : > { %717 = vmatprep.subr.bf16.mxu1 %v7780_v9  ;;  %v7810_v9 = vld [vmem:[%s11080_s3 + $0x40] ss:$8 sps:$4 sm:$0xff]   ;;  %1684 = vmatpush1.bf16.msra.mxu0 %v7906_v3  ;;  %p8692_p11 = scmp.ne.s32.totalorder %s11037_s25, %s8691_s28  ;;  %s8759_s17 = smov [#allocation4]  }
  0x26   : > { %1685 = vmatprep.subr.bf16.mxu0 %v7907_v4  ;;  %s8695_s18 = sshll.u32 %s8759_s17, 4  ;;  %s8696_s18 = int_to_ptr.vmem [resolvable:$false] %s8695_s18 }
  0x27   : > { %p8693_p12 = pnand %p8692_p11, %p8873_p5  ;;  %s8697_s15 = scalar_lea.vmem %s8696_s18, 32 }
  0x28   : > { %718 = vmatpush1.bf16.msra.mxu1 %v7778_v10  ;;  %v7815_v10 = vld [vmem:[%s11080_s3 + $0x54] ss:$8 sps:$4 sm:$0xff]   ;;  %p8698_p0 = scmp.lt.s32.totalorder %s11037_s25, %s8696_s18  ;;  %p8699_p1 = scmp.lt.s32.totalorder %s8697_s15, %s8691_s28 }
  0x29   : > { %719 = vmatprep.subr.bf16.mxu1 %v7783_v11  ;;  %1686 = vmatpush1.bf16.msra.mxu0 %v7909_v7  ;;  %v7912_v11 = vld [vmem:[%s11082_s5 + $0x140] ss:$8 sps:$4 sm:$0xff]   ;;  %p8694_p13 = pneg %p8693_p12 }
  0x2a   : > { %1687 = vmatprep.subr.bf16.mxu0 %v7910_v8  ;;  %v7866_v7 = vld [vmem:[%s11080_s3 + $0x1e0] ss:$8 sps:$4 sm:$0xff]   ;;  %v7871_v8 = vld [vmem:[%s11080_s3 + $0x1f4] ss:$8 sps:$4 sm:$0xff]   ;;  %p8700_p2 = por %p8699_p1, %p8698_p0 }
  0x2c   : > { %720 = vmatpush1.bf16.msra.mxu1 %v7781_v12  ;;  %v7913_v12 = vld [vmem:[%s11082_s5 + $0x154] ss:$8 sps:$4 sm:$0xff]   ;;  %p8701_p3 = pnand %p8700_p2, %p8694_p13 }
  0x2d   : > { %721 = vmatprep.subr.bf16.mxu1 %v7786_v13  ;;  %v7813_v13 = vld [vmem:[%s11080_s3 + $0x50] ss:$8 sps:$4 sm:$0xff]   ;;  %1688 = vmatpush1.bf16.msra.mxu0 %v7912_v11 }
  0x2e   : > { %1689 = vmatprep.subr.bf16.mxu0 %v7913_v12 }
  0x30   : > { %722 = vmatpush1.bf16.msra.mxu1 %v7784_v14  ;;  %v7818_v14 = vld [vmem:[%s11080_s3 + $0x64] ss:$8 sps:$4 sm:$0xff]  }
  0x31   : > { %723 = vmatprep.subr.bf16.mxu1 %v7789_v16  ;;  %v7916_v16 = vld [vmem:[%s11082_s5 + $0x164] ss:$8 sps:$4 sm:$0xff]  }
  0x34   : > { %724 = vmatpush1.bf16.msra.mxu1 %v7787_v15  ;;  %v7915_v15 = vld [vmem:[%s11082_s5 + $0x150] ss:$8 sps:$4 sm:$0xff]  }
  0x35   : > { %725 = vmatprep.subr.bf16.mxu1 %v7792_v17  ;;  %v7816_v17 = vld [vmem:[%s11080_s3 + $0x60] ss:$8 sps:$4 sm:$0xff]   ;;  %1690 = vmatpush1.bf16.msra.mxu0 %v7915_v15 }
  0x36   : > { %1691 = vmatprep.subr.bf16.mxu0 %v7916_v16 }
  0x38   : > { %726 = vmatpush1.bf16.msra.mxu1 %v7790_v18  ;;  %v7821_v18 = vld [vmem:[%s11080_s3 + $0x74] ss:$8 sps:$4 sm:$0xff]  }
  0x39   : > { %727 = vmatprep.subr.bf16.mxu1 %v7795_v19 }
  0x3c   : > { %728 = vmatpush1.bf16.msra.mxu1 %v7793_v20  ;;  %v7918_v20 = vld [vmem:[%s11082_s5 + $0x160] ss:$8 sps:$4 sm:$0xff]  }
  0x3d   : > { %844 = vmatprep.subr.bf16.mxu1 %v7798_v21  ;;  %v7919_v21 = vld [vmem:[%s11082_s5 + $0x174] ss:$8 sps:$4 sm:$0xff]   ;;  %1692 = vmatpush1.bf16.msra.mxu0 %v7918_v20  ;;  %v7876_v20 = vld [vmem:[%s11080_s3 + $0x210] ss:$8 sps:$4 sm:$0xff]  }
  0x3e   : > { %1693 = vmatprep.subr.bf16.mxu0 %v7919_v21  ;;  %v7881_v21 = vld [vmem:[%s11080_s3 + $0x224] ss:$8 sps:$4 sm:$0xff]  }
  0xf2   : > { %v540_v23 = vpop.f32.mrb[0].mxu1 }
  0xf3   : > { %v541_v24 = vadd.f32 %v6309_v22, %v540_v23  ;;  %v7601_v25 = vpop.f32.mrb[1].mxu1  ;;  %v7825_v23 = vld [vmem:[%s11080_s3 + $0x104] ss:$8 sps:$4 sm:$0xff]  }
  0xf4   : > { %v543_v26 = vpop.f32.mrb[2].mxu1 }
  0xf5   : > { %v547_v27 = vmax.f32 %v541_v24, 0.0  ;;  %v544_v28 = vadd.f32 %v6309_v22, %v543_v26  ;;  %v7602_v29 = vpop.f32.mrb[3].mxu1  ;;  %v7819_v22 = vld [vmem:[%s11080_s3 + $0x70] ss:$8 sps:$4 sm:$0xff]  }
  0xf6   : > { %v7921_v26 = vld [vmem:[%s11082_s5 + $0x170] ss:$8 sps:$4 sm:$0xff]   ;;  %v7828_v29 = vld [vmem:[%s11080_s3 + $0x114] ss:$8 sps:$4 sm:$0xff]  }
  0xf7   : > { %v7499_v30 = vpack.c.bf16 %v547_v27, %v547_v27  ;;  %v548_v31 = vmax.f32 %v544_v28, 0.0  ;;  %v7922_v27 = vld [vmem:[%s11082_s5 + $0x184] ss:$8 sps:$4 sm:$0xff]   ;;  %v7823_v28 = vld [vmem:[%s11080_s3 + $0x100] ss:$8 sps:$4 sm:$0xff]   ;;  %1694 = vmatpush1.bf16.msra.mxu0 %v7921_v26 }
  0xf8   : > { %1695 = vmatprep.subr.bf16.mxu0 %v7922_v27  ;;  %v7890_v26 = vld [vmem:[%s11080_s3 + $0x254] ss:$8 sps:$4 sm:$0xff]   ;;  %v7888_v27 = vld [vmem:[%s11080_s3 + $0x250] ss:$8 sps:$4 sm:$0xff]  }
  0xf9   : > { %v558_v32 = vrot.slane %v7499_v30, 6  ;;  %v7500_v33 = vpack.c.bf16 %v548_v31, %v548_v31  ;;  %v7826_v31 = vld [vmem:[%s11080_s3 + $0x110] ss:$8 sps:$4 sm:$0xff]  }
  0xfb   : > { %v559_v35 = vrot.slane %v558_v32, 4  ;;  %566 = vst [vmem:[#allocation2] sm:$0xc] %v558_v32  ;;  %v560_v36 = vrot.slane %v7500_v33, 6  ;;  %v7831_v32 = vld [vmem:[%s11080_s3 + $0x124] ss:$8 sps:$4 sm:$0xff]  }
  0xfc   : > { %v7829_v33 = vld [vmem:[%s11080_s3 + $0x120] ss:$8 sps:$4 sm:$0xff]  }
  0xfd   : > { %v561_v37 = vsel %vm8952_vm4, %v559_v35, %v560_v36  ;;  %v562_v38 = vrot.slane %v560_v36, 4  ;;  %v7834_v35 = vld [vmem:[%s11080_s3 + $0x134] ss:$8 sps:$4 sm:$0xff]   ;;  %v7832_v36 = vld [vmem:[%s11080_s3 + $0x130] ss:$8 sps:$4 sm:$0xff]  }
  0xfe   : > { %567 = vst [vmem:[#allocation2 + $0x8] sm:$0xf] %v561_v37  ;;  %v7837_v37 = vld [vmem:[%s11080_s3 + $0x144] ss:$8 sps:$4 sm:$0xff]  }
  0xff   : > { %568 = vst [vmem:[#allocation2 + $0x10] sm:$0x3] %v562_v38  ;;  %v7835_v38 = vld [vmem:[%s11080_s3 + $0x140] ss:$8 sps:$4 sm:$0xff]  }
 0x102   : > { %v569_v39 = vld [vmem:[#allocation2] sm:$0xe] }
 0x105   : > { %v8958_v40 = vld [vmem:[#allocation2 + $0x8] sm:$0xf] }
 0x106   : > { %v8961_v41 = vcombine.low %v569_v39, %v8958_v40  ;;  %v8963_v42 = vld [vmem:[#allocation2 + $0x10] ss:$0 sps:$4 sm:$0x33]   ;;  %v7840_v39 = vld [vmem:[%s11080_s3 + $0x154] ss:$8 sps:$4 sm:$0xff]  }
 0x107   : > { %v624_v45 = vshrl.u32 %v8963_v42, 16  ;;  %v627_v46 = vshll.u32 %v8963_v42, 16  ;;  %v7822_v19 = vld [vmem:[#allocation2 + $0x10] ss:$0 sps:$4 sm:$0x11]  }
 0x108   : > { %v616_v43 = vshrl.u32 %v8961_v41, 16  ;;  %v619_v44 = vshll.u32 %v8961_v41, 16  ;;  %v760_v24 = vrot.slane %v8961_v41, 1  ;;  %v761_v25 = vrot.slane %v7822_v19, 1  ;;  %v7838_v41 = vld [vmem:[%s11080_s3 + $0x150] ss:$8 sps:$4 sm:$0xff]  }
 0x109   : > { %v626_v49 = vrot.slane %v624_v45, 1  ;;  %v629_v50 = vrot.slane %v627_v46, 2  ;;  %v7846_v45 = vld [vmem:[%s11080_s3 + $0x174] ss:$8 sps:$4 sm:$0xff]   ;;  %v887_v46 = vld [vmem:[#allocation2] sm:$0xc] }
 0x10a   : > { %v618_v47 = vrot.slane %v616_v43, 1  ;;  %v621_v48 = vrot.slane %v619_v44, 2  ;;  %v762_v30 = vsel %vm759_vm6, %v760_v24, %v761_v25  ;;  %v7843_v43 = vld [vmem:[%s11080_s3 + $0x164] ss:$8 sps:$4 sm:$0xff]   ;;  %v7841_v44 = vld [vmem:[%s11080_s3 + $0x160] ss:$8 sps:$4 sm:$0xff]  }
 0x10b   : > { %v630_v53 = vor.u32 %v629_v50, %v626_v49  ;;  %v7850_v49 = vld [vmem:[%s11080_s3 + $0x184] ss:$8 sps:$4 sm:$0xff]   ;;  %v9157_v63 = vld [vmem:[#allocation2 + $0x10] ss:$0 sps:$4 sm:$0x77]  }
 0x10c   : > { %v622_v52 = vor.u32 %v621_v48, %v618_v47  ;;  %v6383_v47 = vcombine.low %v887_v46, %v8958_v40  ;;  %v7844_v48 = vld [vmem:[%s11080_s3 + $0x170] ss:$8 sps:$4 sm:$0xff]   ;;  %v7887_v24 = vld [vmem:[%s11080_s3 + $0x244] ss:$8 sps:$4 sm:$0xff]   ;;  %v7885_v25 = vld [vmem:[%s11080_s3 + $0x240] ss:$8 sps:$4 sm:$0xff]  }
 0x10d   : > { %v7934_v46 = vld [vmem:[%s11082_s5 + $0x1c4] ss:$8 sps:$4 sm:$0xff]  }
 0x10e   : > { %v631_v55 = vsel %vm614_vm5, %v622_v52, %v630_v53  ;;  %v909_v50 = vrot.slane %v6383_v47, 2  ;;  %v7848_v52 = vld [vmem:[%s11080_s3 + $0x180] ss:$8 sps:$4 sm:$0xff]   ;;  %v7853_v53 = vld [vmem:[%s11080_s3 + $0x194] ss:$8 sps:$4 sm:$0xff]   ;;  %v1063_v3 = vshrl.u32 %v6383_v47, 16 }
 0x10f   : > { %746 = vmatmul.mubr.bf16.vlgmr.msra.gmra.mrb[4].mxu1 %v631_v55  ;;  %v7851_v55 = vld [vmem:[%s11080_s3 + $0x190] ss:$8 sps:$4 sm:$0xff]   ;;  %v1066_v4 = vshll.u32 %v6383_v47, 16  ;;  %v7936_v47 = vld [vmem:[%s11082_s5 + $0x1c0] ss:$8 sps:$4 sm:$0xff]  }
 0x110   : > { %845 = vmatpush1.bf16.msra.mxu1 %v7796_v51  ;;  %876 = vmatprep.mubr.bf16.mxu1 %v8985_v59  ;;  %v910_v51 = vrot.slane %v8963_v42, 2  ;;  %v7856_v42 = vld [vmem:[%s11080_s3 + $0x1a4] ss:$8 sps:$4 sm:$0xff]  }
 0x111   : > { %846 = vmatprep.subr.bf16.mxu1 %v7803_v54 }
 0x112   : > { %v911_v54 = vsel %vm908_vm7, %v909_v50, %v910_v51  ;;  %v7940_v50 = vld [vmem:[%s11082_s5 + $0x1e4] ss:$8 sps:$4 sm:$0xff]   ;;  %v7942_v51 = vld [vmem:[%s11082_s5 + $0x1e0] ss:$8 sps:$4 sm:$0xff]  }
 0x114   : > { %847 = vmatpush1.bf16.msra.mxu1 %v7801_v58  ;;  %v7857_v58 = vld [vmem:[%s11080_s3 + $0x1b0] ss:$8 sps:$4 sm:$0xff]  }
 0x115   : > { %848 = vmatprep.subr.bf16.mxu1 %v7806_v61  ;;  %v7860_v61 = vld [vmem:[%s11080_s3 + $0x1c0] ss:$8 sps:$4 sm:$0xff]  }
 0x118   : > { %849 = vmatpush1.bf16.msra.mxu1 %v7804_v0  ;;  %v7863_v0 = vld [vmem:[%s11080_s3 + $0x1d0] ss:$8 sps:$4 sm:$0xff]  }
 0x119   : > { %850 = vmatprep.subr.bf16.mxu1 %v7809_v2  ;;  %v7868_v2 = vld [vmem:[%s11080_s3 + $0x1e4] ss:$8 sps:$4 sm:$0xff]  }
 0x11c   : > { %851 = vmatpush1.bf16.msra.mxu1 %v7807_v5  ;;  %v1071_v5 = vshrl.u32 %v9157_v63, 16 }
 0x11d   : > { %852 = vmatprep.subr.bf16.mxu1 %v7812_v6  ;;  %v1074_v6 = vshll.u32 %v9157_v63, 16 }
 0x11e   : > { %v1073_v11 = vrot.slane %v1071_v5, 2 }
 0x11f   : > { %v1076_v12 = vrot.slane %v1074_v6, 3 }
 0x120   : > { %853 = vmatpush1.bf16.msra.mxu1 %v7810_v9  ;;  %v1065_v9 = vrot.slane %v1063_v3, 2 }
 0x121   : > { %854 = vmatprep.subr.bf16.mxu1 %v7815_v10  ;;  %v1068_v10 = vrot.slane %v1066_v4, 3  ;;  %v1077_v16 = vor.u32 %v1076_v12, %v1073_v11 }
 0x123   : > { %v1069_v15 = vor.u32 %v1068_v10, %v1065_v9 }
 0x124   : > { %855 = vmatpush1.bf16.msra.mxu1 %v7813_v13  ;;  %v7869_v13 = vld [vmem:[%s11080_s3 + $0x1f0] ss:$8 sps:$4 sm:$0xff]  }
 0x125   : > { %856 = vmatprep.subr.bf16.mxu1 %v7818_v14  ;;  %v7875_v14 = vld [vmem:[%s11080_s3 + $0x204] ss:$8 sps:$4 sm:$0xff]   ;;  %v1078_v19 = vsel %vm1061_vm8, %v1069_v15, %v1077_v16 }
 0x128   : > { %857 = vmatpush1.bf16.msra.mxu1 %v7816_v17  ;;  %v7873_v17 = vld [vmem:[%s11080_s3 + $0x200] ss:$8 sps:$4 sm:$0xff]  }
 0x129   : > { %858 = vmatprep.subr.bf16.mxu1 %v7821_v18  ;;  %v7878_v18 = vld [vmem:[%s11080_s3 + $0x214] ss:$8 sps:$4 sm:$0xff]  }
 0x12c   : > { %859 = vmatpush1.bf16.msra.mxu1 %v7819_v22  ;;  %v7879_v22 = vld [vmem:[%s11080_s3 + $0x220] ss:$8 sps:$4 sm:$0xff]  }
 0x12d   : > { %993 = vmatprep.subr.bf16.mxu1 %v7825_v23  ;;  %v7884_v23 = vld [vmem:[%s11080_s3 + $0x234] ss:$8 sps:$4 sm:$0xff]  }
 0x12f   : > { %877 = vmatmul.mubr.bf16.vlgmr.msra.gmra.mrb[4].mxu1 %v762_v30  ;;  %v7896_v30 = vld [vmem:[%s11080_s3 + $0x274] ss:$8 sps:$4 sm:$0xff]  }
 0x130   : > { %994 = vmatpush1.bf16.msra.mxu1 %v7823_v28  ;;  %1025 = vmatprep.mubr.bf16.mxu1 %v8985_v59  ;;  %v7893_v28 = vld [vmem:[%s11080_s3 + $0x264] ss:$8 sps:$4 sm:$0xff]  }
 0x131   : > { %995 = vmatprep.subr.bf16.mxu1 %v7828_v29  ;;  %v7891_v29 = vld [vmem:[%s11080_s3 + $0x260] ss:$8 sps:$4 sm:$0xff]  }
 0x134   : > { %996 = vmatpush1.bf16.msra.mxu1 %v7826_v31  ;;  %v1207_v31 = vld [vmem:[#allocation2] sm:$0x8] }
 0x135   : > { %997 = vmatprep.subr.bf16.mxu1 %v7831_v32  ;;  %v6449_v32 = vcombine.low %v1207_v31, %v8958_v40  ;;  %v7925_v40 = vld [vmem:[%s11082_s5 + $0x194] ss:$8 sps:$4 sm:$0xff]  }
 0x138   : > { %998 = vmatpush1.bf16.msra.mxu1 %v7829_v33  ;;  %v7894_v33 = vld [vmem:[%s11080_s3 + $0x270] ss:$8 sps:$4 sm:$0xff]  }
 0x139   : > { %999 = vmatprep.subr.bf16.mxu1 %v7834_v35  ;;  %v1229_v35 = vrot.slane %v6449_v32, 3 }
 0x13c   : > { %1000 = vmatpush1.bf16.msra.mxu1 %v7832_v36  ;;  %v1230_v36 = vrot.slane %v9157_v63, 3 }
 0x13d   : > { %1001 = vmatprep.subr.bf16.mxu1 %v7837_v37 }
 0x13e   : > { %v1231_v37 = vsel %vm1228_vm9, %v1229_v35, %v1230_v36 }
 0x140   : > { %1002 = vmatpush1.bf16.msra.mxu1 %v7835_v38  ;;  %v7924_v38 = vld [vmem:[%s11082_s5 + $0x180] ss:$8 sps:$4 sm:$0xff]  }
 0x141   : > { %1003 = vmatprep.subr.bf16.mxu1 %v7840_v39  ;;  %1696 = vmatpush1.bf16.msra.mxu0 %v7924_v38  ;;  %v7927_v39 = vld [vmem:[%s11082_s5 + $0x190] ss:$8 sps:$4 sm:$0xff]  }
 0x142   : > { %1697 = vmatprep.subr.bf16.mxu0 %v7925_v40 }
 0x144   : > { %1004 = vmatpush1.bf16.msra.mxu1 %v7838_v41  ;;  %v7928_v41 = vld [vmem:[%s11082_s5 + $0x1a4] ss:$8 sps:$4 sm:$0xff]  }
 0x145   : > { %1005 = vmatprep.subr.bf16.mxu1 %v7843_v43  ;;  %1698 = vmatpush1.bf16.msra.mxu0 %v7927_v39  ;;  %v7930_v43 = vld [vmem:[%s11082_s5 + $0x1a0] ss:$8 sps:$4 sm:$0xff]  }
 0x146   : > { %1699 = vmatprep.subr.bf16.mxu0 %v7928_v41 }
 0x148   : > { %1006 = vmatpush1.bf16.msra.mxu1 %v7841_v44  ;;  %v7931_v44 = vld [vmem:[%s11082_s5 + $0x1b4] ss:$8 sps:$4 sm:$0xff]  }
 0x149   : > { %1007 = vmatprep.subr.bf16.mxu1 %v7846_v45  ;;  %1700 = vmatpush1.bf16.msra.mxu0 %v7930_v43  ;;  %v7933_v45 = vld [vmem:[%s11082_s5 + $0x1b0] ss:$8 sps:$4 sm:$0xff]  }
 0x14a   : > { %1701 = vmatprep.subr.bf16.mxu0 %v7931_v44 }
 0x14c   : > { %1008 = vmatpush1.bf16.msra.mxu1 %v7844_v48  ;;  %v7937_v48 = vld [vmem:[%s11082_s5 + $0x1d4] ss:$8 sps:$4 sm:$0xff]  }
 0x14d   : > { %1160 = vmatprep.subr.bf16.mxu1 %v7850_v49  ;;  %1702 = vmatpush1.bf16.msra.mxu0 %v7933_v45  ;;  %v7939_v49 = vld [vmem:[%s11082_s5 + $0x1d0] ss:$8 sps:$4 sm:$0xff]  }
 0x14e   : > { %1703 = vmatprep.subr.bf16.mxu0 %v7934_v46 }
 0x14f   : > { %1026 = vmatmul.mubr.bf16.vlgmr.msra.gmra.mrb[4].mxu1 %v911_v54  ;;  %v7949_v54 = vld [vmem:[%s11082_s5 + $0x4] ss:$8 sps:$4 sm:$0xff]  }
 0x150   : > { %1161 = vmatpush1.bf16.msra.mxu1 %v7848_v52  ;;  %1192 = vmatprep.mubr.bf16.mxu1 %v8985_v59  ;;  %v7943_v52 = vld [vmem:[%s11082_s5 + $0x1f4] ss:$8 sps:$4 sm:$0xff]  }
 0x151   : > { %1162 = vmatprep.subr.bf16.mxu1 %v7853_v53  ;;  %1704 = vmatpush1.bf16.msra.mxu0 %v7936_v47  ;;  %v7945_v53 = vld [vmem:[%s11082_s5 + $0x1f0] ss:$8 sps:$4 sm:$0xff]  }
 0x152   : > { %1705 = vmatprep.subr.bf16.mxu0 %v7937_v48 }
 0x154   : > { %1163 = vmatpush1.bf16.msra.mxu1 %v7851_v55  ;;  %v1362_v55 = vlaneseq }
 0x155   : > { %1164 = vmatprep.subr.bf16.mxu1 %v7856_v42  ;;  %1706 = vmatpush1.bf16.msra.mxu0 %v7939_v49 }
 0x156   : > { %1707 = vmatprep.subr.bf16.mxu0 %v7940_v50  ;;  %v1363_v42 = vshrl.u32 %v1362_v55, 7  ;;  %v7947_v55 = vld [vmem:[%s11082_s5] ss:$8 sps:$4 sm:$0xff]  }
 0x158   : > { %1165 = vmatpush1.bf16.msra.mxu1 %v7854_v56  ;;  %v9277_v56 = vsub.s32 0, %v1363_v42 }
 0x159   : > { %1166 = vmatprep.subr.bf16.mxu1 %v7859_v57  ;;  %1708 = vmatpush1.bf16.msra.mxu0 %v7942_v51  ;;  %v1360_v57 = vld [vmem:[%s11081_s4] sm:$0x3] }
 0x15a   : > { %1709 = vmatprep.subr.bf16.mxu0 %v7943_v52 }
 0x15c   : > { %1167 = vmatpush1.bf16.msra.mxu1 %v7857_v58  ;;  %v9282_v58 = vsub.s32 1, %v1363_v42 }
 0x15d   : > { %1168 = vmatprep.subr.bf16.mxu1 %v7862_v60  ;;  %1710 = vmatpush1.bf16.msra.mxu0 %v7945_v53  ;;  %v1365_v60 = vrot.slane %v1360_v57, %v9277_v56 }
 0x15e   : > { %1895 = vmatprep.subr.bf16.mxu0 %v7949_v54 }
 0x160   : > { %1169 = vmatpush1.bf16.msra.mxu1 %v7860_v61  ;;  %v1369_v61 = vrot.slane %v1360_v57, %v9282_v58 }
 0x161   : > { %1170 = vmatprep.subr.bf16.mxu1 %v7865_v62 }
 0x164   : > { %1171 = vmatpush1.bf16.msra.mxu1 %v7863_v0 }
 0x165   : > { %1172 = vmatprep.subr.bf16.mxu1 %v7868_v2 }
 0x168   : > { %1173 = vmatpush1.bf16.msra.mxu1 %v7866_v7 }
 0x169   : > { %1174 = vmatprep.subr.bf16.mxu1 %v7871_v8 }
 0x16c   : > { %1175 = vmatpush1.bf16.msra.mxu1 %v7869_v13 }
 0x16d   : > { %1313 = vmatprep.subr.bf16.mxu1 %v7875_v14 }
 0x16f   : > { %1193 = vmatmul.mubr.bf16.vlgmr.msra.gmra.mrb[4].mxu1 %v1078_v19 }
 0x170   : > { %1314 = vmatpush1.bf16.msra.mxu1 %v7873_v17  ;;  %1345 = vmatprep.mubr.bf16.mxu1 %v8985_v59  ;;  %v7882_v59 = vld [vmem:[%s11080_s3 + $0x230] ss:$8 sps:$4 sm:$0xff]  }
 0x171   : > { %1315 = vmatprep.subr.bf16.mxu1 %v7878_v18 }
 0x174   : > { %1316 = vmatpush1.bf16.msra.mxu1 %v7876_v20 }
 0x175   : > { %1317 = vmatprep.subr.bf16.mxu1 %v7881_v21 }
 0x178   : > { %1318 = vmatpush1.bf16.msra.mxu1 %v7879_v22 }
 0x179   : > { %1319 = vmatprep.subr.bf16.mxu1 %v7884_v23 }
 0x17c   : > { %1320 = vmatpush1.bf16.msra.mxu1 %v7882_v59 }
 0x17d   : > { %1321 = vmatprep.subr.bf16.mxu1 %v7887_v24 }
 0x180   : > { %1322 = vmatpush1.bf16.msra.mxu1 %v7885_v25 }
 0x181   : > { %1323 = vmatprep.subr.bf16.mxu1 %v7890_v26 }
 0x184   : > { %1324 = vmatpush1.bf16.msra.mxu1 %v7888_v27 }
 0x185   : > { %1325 = vmatprep.subr.bf16.mxu1 %v7893_v28 }
 0x188   : > { %1326 = vmatpush1.bf16.msra.mxu1 %v7891_v29 }
 0x189   : > { %1327 = vmatprep.subr.bf16.mxu1 %v7896_v30 }
 0x18c   : > { %1328 = vmatpush1.bf16.msra.mxu1 %v7894_v33 }
 0x18f   : > { %1346 = vmatmul.mubr.bf16.vlgmr.msra.gmra.mrb[4].mxu1 %v1231_v37 }
 0x262   : > { %v1347_v62 = vpop.f32.mrb[4].mxu1 }
 0x263   : > { %v1372_v63 = vadd.f32 %v1365_v60, %v1347_v62  ;;  %v1349_v0 = vpop.f32.mrb[5].mxu1 }
 0x264   : > { %v1373_v2 = vadd.f32 %v1369_v61, %v1349_v0  ;;  %v1351_v3 = vpop.f32.mrb[6].mxu1 }
 0x265   : > { %v1376_v4 = vmax.f32 %v1372_v63, 0.0  ;;  %v1374_v5 = vadd.f32 %v1365_v60, %v1351_v3  ;;  %v1353_v6 = vpop.f32.mrb[7].mxu1  ;;  %v7954_v63 = vld [vmem:[%s11082_s5 + $0x14] ss:$8 sps:$4 sm:$0xff]  }
 0x266   : > { %v1377_v7 = vmax.f32 %v1373_v2, 0.0  ;;  %v1375_v8 = vadd.f32 %v1369_v61, %v1353_v6 }
 0x267   : > { %v1378_v9 = vmax.f32 %v1374_v5, 0.0 }
 0x268   : > { %v7501_v10 = vpack.c.bf16 %v1377_v7, %v1376_v4  ;;  %v1379_v11 = vmax.f32 %v1375_v8, 0.0  ;;  %v7952_v8 = vld [vmem:[%s11082_s5 + $0x10] ss:$8 sps:$4 sm:$0xff]  }
 0x26a   : > { %v1390_v12 = vrot.slane %v7501_v10, 6  ;;  %v7502_v13 = vpack.c.bf16 %v1379_v11, %v1378_v9  ;;  %v7957_v9 = vld [vmem:[%s11082_s5 + $0x24] ss:$8 sps:$4 sm:$0xff]  }
 0x26c   : > { %v1391_v14 = vrot.slane %v1390_v12, 4  ;;  %1398 = vst [vmem:[#allocation3] sm:$0xcc] %v1390_v12  ;;  %v1392_v15 = vrot.slane %v7502_v13, 6 }
 0x26e   : > { %v1393_v16 = vsel %vm8952_vm4, %v1391_v14, %v1392_v15  ;;  %v1394_v17 = vrot.slane %v1392_v15, 4  ;;  %v7955_v14 = vld [vmem:[%s11082_s5 + $0x20] ss:$8 sps:$4 sm:$0xff]  }
 0x270   : > { %1400 = vst [vmem:[#allocation3 + $0x10] sm:$0x33] %v1394_v17 }
 0x273   : > { %v1401_v18 = vld [vmem:[#allocation3] sm:$0xee] }
 0x274   : > { %v6501_v19 = vcombine.high %v1401_v18, %v1393_v16  ;;  %v9288_v20 = vcombine.low %v1401_v18, %v1393_v16  ;;  %v1938_v23 = vld [vmem:[#allocation3] sm:$0xcc] }
 0x275   : > { %v9294_v31 = vcombine.high %v1938_v23, %v1393_v16  ;;  %v9296_v32 = vcombine.low %v1938_v23, %v1393_v16  ;;  %v2474_v49 = vld [vmem:[#allocation3] sm:$0x88] }
 0x276   : > { %v1501_v21 = vshrl.u32 %v6501_v19, 16  ;;  %v1504_v22 = vshll.u32 %v6501_v19, 16  ;;  %v1484_v24 = vshrl.u32 %v9288_v20, 16  ;;  %v1487_v25 = vshll.u32 %v9288_v20, 16  ;;  %v7958_v18 = vld [vmem:[%s11082_s5 + $0x30] ss:$8 sps:$4 sm:$0xff]  }
 0x277   : > { %v1436_v59 = vld [vmem:[#allocation3 + $0x10] sm:$0x33]  ;;  %v1980_v47 = vrot.slane %v9294_v31, 2  ;;  %v1977_v52 = vrot.slane %v9296_v32, 2  ;;  %v1730_v62 = vrot.slane %v6501_v19, 1  ;;  %v6735_v4 = vcombine.high %v2474_v49, %v1393_v16 }
 0x278   : > { %v9292_v26 = vld [vmem:[#allocation3 + $0x10] sm:$0x11]  ;;  %v6503_v27 = vcombine.high %v1436_v59, %v1436_v59  ;;  %v6502_v28 = vcombine.low %v1436_v59, %v1436_v59  ;;  %v1503_v29 = vrot.slane %v1501_v21, 1  ;;  %v1506_v30 = vrot.slane %v1504_v22, 2  ;;  %v7966_v22 = vld [vmem:[%s11082_s5 + $0x54] ss:$8 sps:$4 sm:$0xff]  }
 0x279   : > { %v6537_v37 = vcombine.high %v9292_v26, %v9292_v26  ;;  %v1486_v38 = vrot.slane %v1484_v24, 1  ;;  %v1489_v40 = vrot.slane %v1487_v25, 2  ;;  %v2192_v54 = vld [vmem:[#allocation3 + $0x10] sm:$0x77]  ;;  %v6734_v7 = vcombine.low %v2474_v49, %v1393_v16  ;;  %v7960_v16 = vld [vmem:[%s11082_s5 + $0x34] ss:$8 sps:$4 sm:$0xff]  }
 0x27a   : > { %v1509_v33 = vshrl.u32 %v6503_v27, 16  ;;  %v1512_v35 = vshll.u32 %v6503_v27, 16  ;;  %v1492_v36 = vshrl.u32 %v6502_v28, 16  ;;  %v1495_v39 = vshll.u32 %v6502_v28, 16  ;;  %v7963_v19 = vld [vmem:[%s11082_s5 + $0x44] ss:$8 sps:$4 sm:$0xff]  }
 0x27b   : > { %v1507_v45 = vor.u32 %v1506_v30, %v1503_v29  ;;  %v1981_v48 = vrot.slane %v6503_v27, 2  ;;  %v1731_v51 = vrot.slane %v6537_v37, 1  ;;  %v1978_v53 = vrot.slane %v6502_v28, 2  ;;  %v7961_v21 = vld [vmem:[%s11082_s5 + $0x40] ss:$8 sps:$4 sm:$0xff]  }
 0x27c   : > { %v1511_v41 = vrot.slane %v1509_v33, 1  ;;  %v1514_v43 = vrot.slane %v1512_v35, 2  ;;  %v1494_v44 = vrot.slane %v1492_v36, 1  ;;  %v1497_v46 = vrot.slane %v1495_v39, 2  ;;  %v7964_v23 = vld [vmem:[%s11082_s5 + $0x50] ss:$8 sps:$4 sm:$0xff]  }
 0x27d   : > { %v1490_v42 = vor.u32 %v1489_v40, %v1486_v38  ;;  %v9306_v60 = vsel %vm908_vm7, %v1980_v47, %v1981_v48  ;;  %v9313_v0 = vsel %vm908_vm7, %v1977_v52, %v1978_v53  ;;  %v9316_v3 = vcombine.high %v2192_v54, %v2192_v54  ;;  %v7969_v59 = vld [vmem:[%s11082_s5 + $0x64] ss:$8 sps:$4 sm:$0xff]   ;;  %v7967_v24 = vld [vmem:[%s11082_s5 + $0x60] ss:$8 sps:$4 sm:$0xff]   ;;  %v7972_v25 = vld [vmem:[%s11082_s5 + $0x74] ss:$8 sps:$4 sm:$0xff]  }
 0x27e   : > { %v1515_v50 = vor.u32 %v1514_v43, %v1511_v41  ;;  %v1498_v57 = vor.u32 %v1497_v46, %v1494_v44  ;;  %v1732_v5 = vsel %vm759_vm6, %v1730_v62, %v1731_v51  ;;  %v9319_v6 = vcombine.low %v2192_v54, %v2192_v54  ;;  %v7970_v27 = vld [vmem:[%s11082_s5 + $0x70] ss:$8 sps:$4 sm:$0xff]   ;;  %v7975_v28 = vld [vmem:[%s11082_s5 + $0x84] ss:$8 sps:$4 sm:$0xff]   ;;  %v7973_v29 = vld [vmem:[%s11082_s5 + $0x80] ss:$8 sps:$4 sm:$0xff]  }
 0x27f   : > { %v2516_v10 = vrot.slane %v6735_v4, 3  ;;  %v2517_v11 = vrot.slane %v9316_v3, 3  ;;  %v2513_v12 = vrot.slane %v6734_v7, 3  ;;  %v7978_v30 = vld [vmem:[%s11082_s5 + $0x94] ss:$8 sps:$4 sm:$0xff]   ;;  %v6536_v47 = vcombine.low %v9292_v26, %v9292_v26 }
 0x280   : > { %v1516_v61 = vsel %vm614_vm5, %v1507_v45, %v1515_v50  ;;  %v1499_v2 = vsel %vm614_vm5, %v1490_v42, %v1498_v57  ;;  %v2514_v13 = vrot.slane %v9319_v6, 3  ;;  %v7976_v33 = vld [vmem:[%s11082_s5 + $0x90] ss:$8 sps:$4 sm:$0xff]   ;;  %v7981_v35 = vld [vmem:[%s11082_s5 + $0xa4] ss:$8 sps:$4 sm:$0xff]   ;;  %v1727_v51 = vrot.slane %v9288_v20, 1 }
 0x281   : > { %1711 = vmatprep.mubr.bf16.mxu0 %v1516_v61  ;;  %v9333_v15 = vsel %vm1228_vm9, %v2516_v10, %v2517_v11  ;;  %v7979_v36 = vld [vmem:[%s11082_s5 + $0xa0] ss:$8 sps:$4 sm:$0xff]   ;;  %v7984_v37 = vld [vmem:[%s11082_s5 + $0xb4] ss:$8 sps:$4 sm:$0xff]   ;;  %v7982_v38 = vld [vmem:[%s11082_s5 + $0xb0] ss:$8 sps:$4 sm:$0xff]  }
 0x282   : > { %1712 = vmatmul.mubr.bf16.vlgmr.msra.gmra.mrb[0].mxu0 %v1499_v2  ;;  %v9339_v17 = vsel %vm1228_vm9, %v2513_v12, %v2514_v13  ;;  %v7987_v40 = vld [vmem:[%s11082_s5 + $0xc4] ss:$8 sps:$4 sm:$0xff]   ;;  %v7985_v39 = vld [vmem:[%s11082_s5 + $0xc0] ss:$8 sps:$4 sm:$0xff]   ;;  %v7990_v41 = vld [vmem:[%s11082_s5 + $0xd4] ss:$8 sps:$4 sm:$0xff]  }
 0x283   : > { %1896 = vmatpush1.bf16.msra.mxu0 %v7947_v55  ;;  %1927 = vmatprep.mubr.bf16.mxu0 %v1732_v5  ;;  %v7988_v43 = vld [vmem:[%s11082_s5 + $0xd0] ss:$8 sps:$4 sm:$0xff]   ;;  %v7993_v44 = vld [vmem:[%s11082_s5 + $0xe4] ss:$8 sps:$4 sm:$0xff]   ;;  %v7991_v45 = vld [vmem:[%s11082_s5 + $0xe0] ss:$8 sps:$4 sm:$0xff]  }
 0x284   : > { %1897 = vmatprep.subr.bf16.mxu0 %v7954_v63  ;;  %v7996_v46 = vld [vmem:[%s11082_s5 + $0xf4] ss:$8 sps:$4 sm:$0xff]   ;;  %v7994_v48 = vld [vmem:[%s11082_s5 + $0xf0] ss:$8 sps:$4 sm:$0xff]   ;;  %v8000_v49 = vld [vmem:[%s11082_s5 + $0x204] ss:$8 sps:$4 sm:$0xff]  }
 0x285   : > { %v1728_v50 = vrot.slane %v6536_v47, 1  ;;  %v7998_v52 = vld [vmem:[%s11082_s5 + $0x200] ss:$8 sps:$4 sm:$0xff]   ;;  %v8003_v26 = vld [vmem:[%s11082_s5 + $0x214] ss:$8 sps:$4 sm:$0xff]  }
 0x286   : > { %v8001_v54 = vld [vmem:[%s11082_s5 + $0x210] ss:$8 sps:$4 sm:$0xff]   ;;  %v8006_v20 = vld [vmem:[%s11082_s5 + $0x224] ss:$8 sps:$4 sm:$0xff]   ;;  %v8004_v55 = vld [vmem:[%s11082_s5 + $0x220] ss:$8 sps:$4 sm:$0xff]  }
 0x287   : > { %1898 = vmatpush1.bf16.msra.mxu0 %v7952_v8  ;;  %v1729_v53 = vsel %vm759_vm6, %v1727_v51, %v1728_v50  ;;  %v8009_v42 = vld [vmem:[%s11082_s5 + $0x234] ss:$8 sps:$4 sm:$0xff]   ;;  %v8007_v57 = vld [vmem:[%s11082_s5 + $0x230] ss:$8 sps:$4 sm:$0xff]   ;;  %v8010_v61 = vld [vmem:[%s11082_s5 + $0x240] ss:$8 sps:$4 sm:$0xff]  }
 0x288   : > { %1899 = vmatprep.subr.bf16.mxu0 %v7957_v9  ;;  %v8015_v62 = vld [vmem:[%s11082_s5 + $0x254] ss:$8 sps:$4 sm:$0xff]   ;;  %v8013_v63 = vld [vmem:[%s11082_s5 + $0x250] ss:$8 sps:$4 sm:$0xff]   ;;  %v8018_v2 = vld [vmem:[%s11082_s5 + $0x264] ss:$8 sps:$4 sm:$0xff]  }
 0x289   : > { %v8016_v4 = vld [vmem:[%s11082_s5 + $0x260] ss:$8 sps:$4 sm:$0xff]   ;;  %v8021_v5 = vld [vmem:[%s11082_s5 + $0x274] ss:$8 sps:$4 sm:$0xff]   ;;  %v8019_v7 = vld [vmem:[%s11082_s5 + $0x270] ss:$8 sps:$4 sm:$0xff]  }
 0x28a   : > { %v8024_v8 = vld [vmem:[%s11082_s5 + $0x284] ss:$8 sps:$4 sm:$0xff]   ;;  %v8022_v9 = vld [vmem:[%s11082_s5 + $0x280] ss:$8 sps:$4 sm:$0xff]   ;;  %v8027_v10 = vld [vmem:[%s11082_s5 + $0x294] ss:$8 sps:$4 sm:$0xff]  }
 0x28b   : > { %1900 = vmatpush1.bf16.msra.mxu0 %v7955_v14  ;;  %v8025_v11 = vld [vmem:[%s11082_s5 + $0x290] ss:$8 sps:$4 sm:$0xff]   ;;  %v8030_v12 = vld [vmem:[%s11082_s5 + $0x2a4] ss:$8 sps:$4 sm:$0xff]   ;;  %v8028_v13 = vld [vmem:[%s11082_s5 + $0x2a0] ss:$8 sps:$4 sm:$0xff]  }
 0x28c   : > { %1901 = vmatprep.subr.bf16.mxu0 %v7960_v16  ;;  %v8033_v14 = vld [vmem:[%s11082_s5 + $0x2b4] ss:$8 sps:$4 sm:$0xff]   ;;  %v8031_v16 = vld [vmem:[%s11082_s5 + $0x2b0] ss:$8 sps:$4 sm:$0xff]   ;;  %v8150_v51 = vld [vmem:[%s11084_s7 + $0x120] ss:$8 sps:$4 sm:$0xff]  }
 0x28d   : > { %v8147_v47 = vld [vmem:[%s11084_s7 + $0x110] ss:$8 sps:$4 sm:$0xff]   ;;  %v8058_v50 = vld [vmem:[%s11082_s5 + $0x334] ss:$8 sps:$4 sm:$0xff]  }
 0x28f   : > { %1902 = vmatpush1.bf16.msra.mxu0 %v7958_v18  ;;  %v8036_v18 = vld [vmem:[%s11082_s5 + $0x2c4] ss:$8 sps:$4 sm:$0xff]  }
 0x290   : > { %1903 = vmatprep.subr.bf16.mxu0 %v7963_v19  ;;  %v8034_v19 = vld [vmem:[%s11082_s5 + $0x2c0] ss:$8 sps:$4 sm:$0xff]  }
 0x293   : > { %1904 = vmatpush1.bf16.msra.mxu0 %v7961_v21  ;;  %v8039_v21 = vld [vmem:[%s11082_s5 + $0x2d4] ss:$8 sps:$4 sm:$0xff]  }
 0x294   : > { %1905 = vmatprep.subr.bf16.mxu0 %v7966_v22  ;;  %v8037_v22 = vld [vmem:[%s11082_s5 + $0x2d0] ss:$8 sps:$4 sm:$0xff]  }
 0x297   : > { %1906 = vmatpush1.bf16.msra.mxu0 %v7964_v23  ;;  %v8042_v23 = vld [vmem:[%s11082_s5 + $0x2e4] ss:$8 sps:$4 sm:$0xff]  }
 0x298   : > { %1907 = vmatprep.subr.bf16.mxu0 %v7969_v59  ;;  %v2257_v59 = vshrl.u32 %v9316_v3, 16 }
 0x29b   : > { %1908 = vmatpush1.bf16.msra.mxu0 %v7967_v24  ;;  %v2260_v24 = vshll.u32 %v9316_v3, 16  ;;  %v8043_v3 = vld [vmem:[%s11082_s5 + $0x2f0] ss:$8 sps:$4 sm:$0xff]  }
 0x29c   : > { %1909 = vmatprep.subr.bf16.mxu0 %v7972_v25  ;;  %v8040_v25 = vld [vmem:[%s11082_s5 + $0x2e0] ss:$8 sps:$4 sm:$0xff]  }
 0x29f   : > { %1910 = vmatpush1.bf16.msra.mxu0 %v7970_v27  ;;  %v8045_v27 = vld [vmem:[%s11082_s5 + $0x2f4] ss:$8 sps:$4 sm:$0xff]  }
 0x2a0   : > { %1911 = vmatprep.subr.bf16.mxu0 %v7975_v28  ;;  %v2249_v28 = vshrl.u32 %v9294_v31, 16 }
 0x2a3   : > { %1912 = vmatpush1.bf16.msra.mxu0 %v7973_v29  ;;  %v2252_v29 = vshll.u32 %v9294_v31, 16  ;;  %v8046_v31 = vld [vmem:[%s11082_s5 + $0x300] ss:$8 sps:$4 sm:$0xff]  }
 0x2a4   : > { %1913 = vmatprep.subr.bf16.mxu0 %v7978_v30  ;;  %v2259_v30 = vrot.slane %v2257_v59, 2  ;;  %v8085_v59 = vld [vmem:[%s11082_s5 + $0x3c4] ss:$8 sps:$4 sm:$0xff]  }
 0x2a7   : > { %1914 = vmatpush1.bf16.msra.mxu0 %v7976_v33  ;;  %v2262_v33 = vrot.slane %v2260_v24, 3  ;;  %v8083_v24 = vld [vmem:[%s11082_s5 + $0x3c0] ss:$8 sps:$4 sm:$0xff]  }
 0x2a8   : > { %1915 = vmatprep.subr.bf16.mxu0 %v7981_v35  ;;  %v8048_v35 = vld [vmem:[%s11082_s5 + $0x304] ss:$8 sps:$4 sm:$0xff]  }
 0x2ab   : > { %1916 = vmatpush1.bf16.msra.mxu0 %v7979_v36  ;;  %v2251_v36 = vrot.slane %v2249_v28, 2  ;;  %v8091_v28 = vld [vmem:[%s11082_s5 + $0x3e4] ss:$8 sps:$4 sm:$0xff]  }
 0x2ac   : > { %1917 = vmatprep.subr.bf16.mxu0 %v7984_v37  ;;  %v2254_v37 = vrot.slane %v2252_v29, 3  ;;  %v2240_v29 = vshrl.u32 %v9319_v6, 16 }
 0x2af   : > { %1918 = vmatpush1.bf16.msra.mxu0 %v7982_v38  ;;  %v2263_v38 = vor.u32 %v2262_v33, %v2259_v30  ;;  %v2243_v30 = vshll.u32 %v9319_v6, 16  ;;  %v8089_v33 = vld [vmem:[%s11082_s5 + $0x3e0] ss:$8 sps:$4 sm:$0xff]   ;;  %v8092_v6 = vld [vmem:[%s11082_s5 + $0x3f0] ss:$8 sps:$4 sm:$0xff]  }
 0x2b0   : > { %1919 = vmatprep.subr.bf16.mxu0 %v7987_v40  ;;  %v2255_v40 = vor.u32 %v2254_v37, %v2251_v36  ;;  %v8094_v36 = vld [vmem:[%s11082_s5 + $0x3f4] ss:$8 sps:$4 sm:$0xff]   ;;  %v2242_v37 = vrot.slane %v2240_v29, 2  ;;  %v8195_v29 = vld [vmem:[%s11084_s7 + $0x4] ss:$8 sps:$4 sm:$0xff]  }
 0x2b3   : > { %1920 = vmatpush1.bf16.msra.mxu0 %v7985_v39  ;;  %v8052_v39 = vld [vmem:[%s11082_s5 + $0x314] ss:$8 sps:$4 sm:$0xff]  }
 0x2b4   : > { %1921 = vmatprep.subr.bf16.mxu0 %v7990_v41  ;;  %v2264_v41 = vsel %vm1061_vm8, %v2255_v40, %v2263_v38  ;;  %v2245_v38 = vrot.slane %v2243_v30, 3  ;;  %v2728_v30 = vld [vmem:[%s11083_s6] sm:$0x3] }
 0x2b7   : > { %1922 = vmatpush1.bf16.msra.mxu0 %v7988_v43  ;;  %v8144_v43 = vld [vmem:[%s11084_s7 + $0x100] ss:$8 sps:$4 sm:$0xff]  }
 0x2b8   : > { %1923 = vmatprep.subr.bf16.mxu0 %v7993_v44  ;;  %v8146_v44 = vld [vmem:[%s11084_s7 + $0x104] ss:$8 sps:$4 sm:$0xff]  }
 0x2b9   : > { %3047 = vmatprep.subr.bf16.mxu1 %v8146_v44  ;;  %v8101_v44 = vld [vmem:[%s11082_s5 + $0x414] ss:$8 sps:$4 sm:$0xff]  }
 0x2ba   : > { %3048 = vmatpush1.bf16.msra.mxu1 %v8144_v43  ;;  %v8096_v43 = vld [vmem:[%s11082_s5 + $0x400] ss:$8 sps:$4 sm:$0xff]  }
 0x2bb   : > { %1924 = vmatpush1.bf16.msra.mxu0 %v7991_v45  ;;  %v8050_v45 = vld [vmem:[%s11082_s5 + $0x310] ss:$8 sps:$4 sm:$0xff]  }
 0x2bc   : > { %1925 = vmatprep.subr.bf16.mxu0 %v7996_v46  ;;  %v8055_v46 = vld [vmem:[%s11082_s5 + $0x324] ss:$8 sps:$4 sm:$0xff]  }
 0x2bf   : > { %1926 = vmatpush1.bf16.msra.mxu0 %v7994_v48  ;;  %v8152_v48 = vld [vmem:[%s11084_s7 + $0x124] ss:$8 sps:$4 sm:$0xff]  }
 0x2c0   : > { %2145 = vmatprep.subr.bf16.mxu0 %v8000_v49  ;;  %v8053_v49 = vld [vmem:[%s11082_s5 + $0x320] ss:$8 sps:$4 sm:$0xff]  }
 0x2c2   : > { %1928 = vmatmul.mubr.bf16.vlgmr.msra.gmra.mrb[0].mxu0 %v1729_v53  ;;  %v8061_v53 = vld [vmem:[%s11082_s5 + $0x344] ss:$8 sps:$4 sm:$0xff]  }
 0x2c3   : > { %2146 = vmatpush1.bf16.msra.mxu0 %v7998_v52  ;;  %2177 = vmatprep.mubr.bf16.mxu0 %v9306_v60  ;;  %v8012_v60 = vld [vmem:[%s11082_s5 + $0x244] ss:$8 sps:$4 sm:$0xff]   ;;  %v8155_v52 = vld [vmem:[%s11084_s7 + $0x134] ss:$8 sps:$4 sm:$0xff]  }
 0x2c4   : > { %2147 = vmatprep.subr.bf16.mxu0 %v8003_v26  ;;  %v8056_v26 = vld [vmem:[%s11082_s5 + $0x330] ss:$8 sps:$4 sm:$0xff]  }
 0x2c7   : > { %2148 = vmatpush1.bf16.msra.mxu0 %v8001_v54  ;;  %v8153_v54 = vld [vmem:[%s11084_s7 + $0x130] ss:$8 sps:$4 sm:$0xff]  }
 0x2c8   : > { %2149 = vmatprep.subr.bf16.mxu0 %v8006_v20  ;;  %v8158_v20 = vld [vmem:[%s11084_s7 + $0x144] ss:$8 sps:$4 sm:$0xff]  }
 0x2cb   : > { %2150 = vmatpush1.bf16.msra.mxu0 %v8004_v55  ;;  %v8059_v55 = vld [vmem:[%s11082_s5 + $0x340] ss:$8 sps:$4 sm:$0xff]  }
 0x2cc   : > { %2151 = vmatprep.subr.bf16.mxu0 %v8009_v42  ;;  %v8064_v42 = vld [vmem:[%s11082_s5 + $0x354] ss:$8 sps:$4 sm:$0xff]  }
 0x2cf   : > { %2152 = vmatpush1.bf16.msra.mxu0 %v8007_v57  ;;  %v8156_v57 = vld [vmem:[%s11084_s7 + $0x140] ss:$8 sps:$4 sm:$0xff]  }
 0x2d0   : > { %2153 = vmatprep.subr.bf16.mxu0 %v8012_v60  ;;  %v8161_v60 = vld [vmem:[%s11084_s7 + $0x154] ss:$8 sps:$4 sm:$0xff]  }
 0x2d3   : > { %2154 = vmatpush1.bf16.msra.mxu0 %v8010_v61  ;;  %v8062_v61 = vld [vmem:[%s11082_s5 + $0x350] ss:$8 sps:$4 sm:$0xff]  }
 0x2d4   : > { %2155 = vmatprep.subr.bf16.mxu0 %v8015_v62  ;;  %v8067_v62 = vld [vmem:[%s11082_s5 + $0x364] ss:$8 sps:$4 sm:$0xff]  }
 0x2d7   : > { %2156 = vmatpush1.bf16.msra.mxu0 %v8013_v63  ;;  %v8159_v63 = vld [vmem:[%s11084_s7 + $0x150] ss:$8 sps:$4 sm:$0xff]  }
 0x2d8   : > { %2157 = vmatprep.subr.bf16.mxu0 %v8018_v2  ;;  %v8164_v2 = vld [vmem:[%s11084_s7 + $0x164] ss:$8 sps:$4 sm:$0xff]  }
 0x2db   : > { %2158 = vmatpush1.bf16.msra.mxu0 %v8016_v4  ;;  %v8065_v4 = vld [vmem:[%s11082_s5 + $0x360] ss:$8 sps:$4 sm:$0xff]  }
 0x2dc   : > { %2159 = vmatprep.subr.bf16.mxu0 %v8021_v5  ;;  %v8070_v5 = vld [vmem:[%s11082_s5 + $0x374] ss:$8 sps:$4 sm:$0xff]  }
 0x2df   : > { %2160 = vmatpush1.bf16.msra.mxu0 %v8019_v7  ;;  %v8162_v7 = vld [vmem:[%s11084_s7 + $0x160] ss:$8 sps:$4 sm:$0xff]  }
 0x2e0   : > { %2161 = vmatprep.subr.bf16.mxu0 %v8024_v8  ;;  %v8167_v8 = vld [vmem:[%s11084_s7 + $0x174] ss:$8 sps:$4 sm:$0xff]  }
 0x2e3   : > { %2162 = vmatpush1.bf16.msra.mxu0 %v8022_v9  ;;  %v8068_v9 = vld [vmem:[%s11082_s5 + $0x370] ss:$8 sps:$4 sm:$0xff]  }
 0x2e4   : > { %2163 = vmatprep.subr.bf16.mxu0 %v8027_v10  ;;  %v8073_v10 = vld [vmem:[%s11082_s5 + $0x384] ss:$8 sps:$4 sm:$0xff]  }
 0x2e7   : > { %2164 = vmatpush1.bf16.msra.mxu0 %v8025_v11  ;;  %v8165_v11 = vld [vmem:[%s11084_s7 + $0x170] ss:$8 sps:$4 sm:$0xff]  }
 0x2e8   : > { %2165 = vmatprep.subr.bf16.mxu0 %v8030_v12  ;;  %v8170_v12 = vld [vmem:[%s11084_s7 + $0x184] ss:$8 sps:$4 sm:$0xff]  }
 0x2eb   : > { %2166 = vmatpush1.bf16.msra.mxu0 %v8028_v13  ;;  %v8071_v13 = vld [vmem:[%s11082_s5 + $0x380] ss:$8 sps:$4 sm:$0xff]  }
 0x2ec   : > { %2167 = vmatprep.subr.bf16.mxu0 %v8033_v14  ;;  %v8076_v14 = vld [vmem:[%s11082_s5 + $0x394] ss:$8 sps:$4 sm:$0xff]  }
 0x2ef   : > { %2168 = vmatpush1.bf16.msra.mxu0 %v8031_v16  ;;  %v8168_v16 = vld [vmem:[%s11084_s7 + $0x180] ss:$8 sps:$4 sm:$0xff]  }
 0x2f0   : > { %2169 = vmatprep.subr.bf16.mxu0 %v8036_v18  ;;  %v8074_v18 = vld [vmem:[%s11082_s5 + $0x390] ss:$8 sps:$4 sm:$0xff]  }
 0x2f3   : > { %2170 = vmatpush1.bf16.msra.mxu0 %v8034_v19  ;;  %v8079_v19 = vld [vmem:[%s11082_s5 + $0x3a4] ss:$8 sps:$4 sm:$0xff]  }
 0x2f4   : > { %2171 = vmatprep.subr.bf16.mxu0 %v8039_v21  ;;  %v8077_v21 = vld [vmem:[%s11082_s5 + $0x3a0] ss:$8 sps:$4 sm:$0xff]  }
 0x2f7   : > { %2172 = vmatpush1.bf16.msra.mxu0 %v8037_v22  ;;  %v8082_v22 = vld [vmem:[%s11082_s5 + $0x3b4] ss:$8 sps:$4 sm:$0xff]  }
 0x2f8   : > { %2173 = vmatprep.subr.bf16.mxu0 %v8042_v23  ;;  %v8080_v23 = vld [vmem:[%s11082_s5 + $0x3b0] ss:$8 sps:$4 sm:$0xff]  }
 0x2fb   : > { %2174 = vmatpush1.bf16.msra.mxu0 %v8040_v25  ;;  %v8088_v25 = vld [vmem:[%s11082_s5 + $0x3d4] ss:$8 sps:$4 sm:$0xff]  }
 0x2fc   : > { %2175 = vmatprep.subr.bf16.mxu0 %v8045_v27  ;;  %v8086_v27 = vld [vmem:[%s11082_s5 + $0x3d0] ss:$8 sps:$4 sm:$0xff]  }
 0x2ff   : > { %2176 = vmatpush1.bf16.msra.mxu0 %v8043_v3  ;;  %v2232_v3 = vshrl.u32 %v9296_v32, 16 }
 0x300   : > { %2427 = vmatprep.subr.bf16.mxu0 %v8048_v35  ;;  %v2235_v35 = vshll.u32 %v9296_v32, 16  ;;  %v2246_v32 = vor.u32 %v2245_v38, %v2242_v37 }
 0x302   : > { %2178 = vmatmul.mubr.bf16.vlgmr.msra.gmra.mrb[0].mxu0 %v9313_v0  ;;  %v8149_v0 = vld [vmem:[%s11084_s7 + $0x114] ss:$8 sps:$4 sm:$0xff]   ;;  %v2237_v40 = vrot.slane %v2235_v35, 3 }
 0x303   : > { %2428 = vmatpush1.bf16.msra.mxu0 %v8046_v31  ;;  %2459 = vmatprep.mubr.bf16.mxu0 %v2264_v41  ;;  %v2234_v31 = vrot.slane %v2232_v3, 2  ;;  %v2737_v3 = vrot.slane %v2728_v30, %v9282_v58 }
 0x304   : > { %2429 = vmatprep.subr.bf16.mxu0 %v8052_v39  ;;  %3049 = vmatprep.subr.bf16.mxu1 %v8149_v0  ;;  %v8098_v39 = vld [vmem:[%s11082_s5 + $0x404] ss:$8 sps:$4 sm:$0xff]   ;;  %v8099_v0 = vld [vmem:[%s11082_s5 + $0x410] ss:$8 sps:$4 sm:$0xff]  }
 0x305   : > { %3050 = vmatpush1.bf16.msra.mxu1 %v8147_v47  ;;  %v2238_v41 = vor.u32 %v2237_v40, %v2234_v31  ;;  %v8102_v47 = vld [vmem:[%s11082_s5 + $0x420] ss:$8 sps:$4 sm:$0xff]  }
 0x306   : > { %3051 = vmatprep.subr.bf16.mxu1 %v8152_v48  ;;  %v8107_v48 = vld [vmem:[%s11082_s5 + $0x434] ss:$8 sps:$4 sm:$0xff]  }
 0x307   : > { %2430 = vmatpush1.bf16.msra.mxu0 %v8050_v45  ;;  %v2247_v45 = vsel %vm1061_vm8, %v2238_v41, %v2246_v32 }
 0x308   : > { %2431 = vmatprep.subr.bf16.mxu0 %v8055_v46  ;;  %v8104_v46 = vld [vmem:[%s11082_s5 + $0x424] ss:$8 sps:$4 sm:$0xff]  }
 0x309   : > { %3052 = vmatpush1.bf16.msra.mxu1 %v8150_v51  ;;  %v8113_v51 = vld [vmem:[%s11082_s5 + $0x454] ss:$8 sps:$4 sm:$0xff]  }
 0x30a   : > { %3053 = vmatprep.subr.bf16.mxu1 %v8155_v52  ;;  %v8111_v52 = vld [vmem:[%s11082_s5 + $0x450] ss:$8 sps:$4 sm:$0xff]  }
 0x30b   : > { %2432 = vmatpush1.bf16.msra.mxu0 %v8053_v49  ;;  %v8110_v49 = vld [vmem:[%s11082_s5 + $0x444] ss:$8 sps:$4 sm:$0xff]  }
 0x30c   : > { %2433 = vmatprep.subr.bf16.mxu0 %v8058_v50  ;;  %v8108_v50 = vld [vmem:[%s11082_s5 + $0x440] ss:$8 sps:$4 sm:$0xff]  }
 0x30d   : > { %3054 = vmatpush1.bf16.msra.mxu1 %v8153_v54  ;;  %v8119_v54 = vld [vmem:[%s11082_s5 + $0x474] ss:$8 sps:$4 sm:$0xff]  }
 0x30e   : > { %3055 = vmatprep.subr.bf16.mxu1 %v8158_v20  ;;  %v8117_v20 = vld [vmem:[%s11082_s5 + $0x470] ss:$8 sps:$4 sm:$0xff]  }
 0x30f   : > { %2434 = vmatpush1.bf16.msra.mxu0 %v8056_v26  ;;  %v8116_v26 = vld [vmem:[%s11082_s5 + $0x464] ss:$8 sps:$4 sm:$0xff]  }
 0x310   : > { %2435 = vmatprep.subr.bf16.mxu0 %v8061_v53  ;;  %v8114_v53 = vld [vmem:[%s11082_s5 + $0x460] ss:$8 sps:$4 sm:$0xff]  }
 0x311   : > { %3056 = vmatpush1.bf16.msra.mxu1 %v8156_v57  ;;  %v8125_v57 = vld [vmem:[%s11082_s5 + $0x494] ss:$8 sps:$4 sm:$0xff]  }
 0x312   : > { %3057 = vmatprep.subr.bf16.mxu1 %v8161_v60  ;;  %v8123_v60 = vld [vmem:[%s11082_s5 + $0x490] ss:$8 sps:$4 sm:$0xff]  }
 0x313   : > { %2436 = vmatpush1.bf16.msra.mxu0 %v8059_v55  ;;  %v8122_v55 = vld [vmem:[%s11082_s5 + $0x484] ss:$8 sps:$4 sm:$0xff]  }
 0x314   : > { %2437 = vmatprep.subr.bf16.mxu0 %v8064_v42  ;;  %v8120_v42 = vld [vmem:[%s11082_s5 + $0x480] ss:$8 sps:$4 sm:$0xff]  }
 0x315   : > { %3058 = vmatpush1.bf16.msra.mxu1 %v8159_v63  ;;  %v8131_v63 = vld [vmem:[%s11082_s5 + $0x4b4] ss:$8 sps:$4 sm:$0xff]  }
 0x316   : > { %3059 = vmatprep.subr.bf16.mxu1 %v8164_v2  ;;  %v8129_v2 = vld [vmem:[%s11082_s5 + $0x4b0] ss:$8 sps:$4 sm:$0xff]  }
 0x317   : > { %2438 = vmatpush1.bf16.msra.mxu0 %v8062_v61  ;;  %v8128_v61 = vld [vmem:[%s11082_s5 + $0x4a4] ss:$8 sps:$4 sm:$0xff]  }
 0x318   : > { %2439 = vmatprep.subr.bf16.mxu0 %v8067_v62  ;;  %v8126_v62 = vld [vmem:[%s11082_s5 + $0x4a0] ss:$8 sps:$4 sm:$0xff]  }
 0x319   : > { %3060 = vmatpush1.bf16.msra.mxu1 %v8162_v7  ;;  %v8137_v7 = vld [vmem:[%s11082_s5 + $0x4d4] ss:$8 sps:$4 sm:$0xff]  }
 0x31a   : > { %3061 = vmatprep.subr.bf16.mxu1 %v8167_v8  ;;  %v8135_v8 = vld [vmem:[%s11082_s5 + $0x4d0] ss:$8 sps:$4 sm:$0xff]  }
 0x31b   : > { %2440 = vmatpush1.bf16.msra.mxu0 %v8065_v4  ;;  %v8134_v4 = vld [vmem:[%s11082_s5 + $0x4c4] ss:$8 sps:$4 sm:$0xff]  }
 0x31c   : > { %2441 = vmatprep.subr.bf16.mxu0 %v8070_v5  ;;  %v8132_v5 = vld [vmem:[%s11082_s5 + $0x4c0] ss:$8 sps:$4 sm:$0xff]  }
 0x31d   : > { %3062 = vmatpush1.bf16.msra.mxu1 %v8165_v11  ;;  %v8143_v11 = vld [vmem:[%s11082_s5 + $0x4f4] ss:$8 sps:$4 sm:$0xff]  }
 0x31e   : > { %3063 = vmatprep.subr.bf16.mxu1 %v8170_v12  ;;  %v8141_v12 = vld [vmem:[%s11082_s5 + $0x4f0] ss:$8 sps:$4 sm:$0xff]  }
 0x31f   : > { %2442 = vmatpush1.bf16.msra.mxu0 %v8068_v9  ;;  %v8140_v9 = vld [vmem:[%s11082_s5 + $0x4e4] ss:$8 sps:$4 sm:$0xff]  }
 0x320   : > { %2443 = vmatprep.subr.bf16.mxu0 %v8073_v10  ;;  %v8138_v10 = vld [vmem:[%s11082_s5 + $0x4e0] ss:$8 sps:$4 sm:$0xff]  }
 0x321   : > { %3064 = vmatpush1.bf16.msra.mxu1 %v8168_v16  ;;  %v8176_v16 = vld [vmem:[%s11084_s7 + $0x1a4] ss:$8 sps:$4 sm:$0xff]  }
 0x323   : > { %2444 = vmatpush1.bf16.msra.mxu0 %v8071_v13  ;;  %v8171_v13 = vld [vmem:[%s11084_s7 + $0x190] ss:$8 sps:$4 sm:$0xff]  }
 0x324   : > { %2445 = vmatprep.subr.bf16.mxu0 %v8076_v14  ;;  %v8173_v14 = vld [vmem:[%s11084_s7 + $0x194] ss:$8 sps:$4 sm:$0xff]  }
 0x325   : > { %3065 = vmatprep.subr.bf16.mxu1 %v8173_v14 }
 0x326   : > { %3066 = vmatpush1.bf16.msra.mxu1 %v8171_v13 }
 0x327   : > { %2446 = vmatpush1.bf16.msra.mxu0 %v8074_v18  ;;  %v8174_v18 = vld [vmem:[%s11084_s7 + $0x1a0] ss:$8 sps:$4 sm:$0xff]   ;;  %3067 = vmatprep.subr.bf16.mxu1 %v8176_v16 }
 0x328   : > { %2447 = vmatprep.subr.bf16.mxu0 %v8079_v19  ;;  %v8177_v19 = vld [vmem:[%s11084_s7 + $0x1b0] ss:$8 sps:$4 sm:$0xff]  }
 0x32a   : > { %3068 = vmatpush1.bf16.msra.mxu1 %v8174_v18 }
 0x32b   : > { %2448 = vmatpush1.bf16.msra.mxu0 %v8077_v21  ;;  %v8182_v21 = vld [vmem:[%s11084_s7 + $0x1c4] ss:$8 sps:$4 sm:$0xff]  }
 0x32c   : > { %2449 = vmatprep.subr.bf16.mxu0 %v8082_v22  ;;  %v8180_v22 = vld [vmem:[%s11084_s7 + $0x1c0] ss:$8 sps:$4 sm:$0xff]  }
 0x32f   : > { %2450 = vmatpush1.bf16.msra.mxu0 %v8080_v23  ;;  %v8185_v23 = vld [vmem:[%s11084_s7 + $0x1d4] ss:$8 sps:$4 sm:$0xff]  }
 0x330   : > { %2451 = vmatprep.subr.bf16.mxu0 %v8085_v59  ;;  %v8183_v59 = vld [vmem:[%s11084_s7 + $0x1d0] ss:$8 sps:$4 sm:$0xff]  }
 0x333   : > { %2452 = vmatpush1.bf16.msra.mxu0 %v8083_v24  ;;  %v8188_v24 = vld [vmem:[%s11084_s7 + $0x1e4] ss:$8 sps:$4 sm:$0xff]  }
 0x334   : > { %2453 = vmatprep.subr.bf16.mxu0 %v8088_v25  ;;  %v8186_v25 = vld [vmem:[%s11084_s7 + $0x1e0] ss:$8 sps:$4 sm:$0xff]  }
 0x337   : > { %2454 = vmatpush1.bf16.msra.mxu0 %v8086_v27  ;;  %v8191_v27 = vld [vmem:[%s11084_s7 + $0x1f4] ss:$8 sps:$4 sm:$0xff]  }
 0x338   : > { %2455 = vmatprep.subr.bf16.mxu0 %v8091_v28  ;;  %v8189_v28 = vld [vmem:[%s11084_s7 + $0x1f0] ss:$8 sps:$4 sm:$0xff]  }
 0x33b   : > { %2456 = vmatpush1.bf16.msra.mxu0 %v8089_v33  ;;  %v2733_v33 = vrot.slane %v2728_v30, %v9277_v56 }
 0x33c   : > { %2457 = vmatprep.subr.bf16.mxu0 %v8094_v36 }
 0x33f   : > { %2458 = vmatpush1.bf16.msra.mxu0 %v8092_v6 }
 0x340   : > { %2681 = vmatprep.subr.bf16.mxu0 %v8098_v39 }
 0x342   : > { %2460 = vmatmul.mubr.bf16.vlgmr.msra.gmra.mrb[0].mxu0 %v2247_v45 }
 0x343   : > { %2682 = vmatpush1.bf16.msra.mxu0 %v8096_v43  ;;  %2713 = vmatprep.mubr.bf16.mxu0 %v9333_v15  ;;  %v8105_v15 = vld [vmem:[%s11082_s5 + $0x430] ss:$8 sps:$4 sm:$0xff]  }
 0x344   : > { %2683 = vmatprep.subr.bf16.mxu0 %v8101_v44 }
 0x347   : > { %2684 = vmatpush1.bf16.msra.mxu0 %v8099_v0 }
 0x348   : > { %2685 = vmatprep.subr.bf16.mxu0 %v8104_v46 }
 0x34b   : > { %2686 = vmatpush1.bf16.msra.mxu0 %v8102_v47 }
 0x34c   : > { %2687 = vmatprep.subr.bf16.mxu0 %v8107_v48 }
 0x34f   : > { %2688 = vmatpush1.bf16.msra.mxu0 %v8105_v15 }
 0x350   : > { %2689 = vmatprep.subr.bf16.mxu0 %v8110_v49 }
 0x353   : > { %2690 = vmatpush1.bf16.msra.mxu0 %v8108_v50 }
 0x354   : > { %2691 = vmatprep.subr.bf16.mxu0 %v8113_v51 }
 0x357   : > { %2692 = vmatpush1.bf16.msra.mxu0 %v8111_v52 }
 0x358   : > { %2693 = vmatprep.subr.bf16.mxu0 %v8116_v26 }
 0x35b   : > { %2694 = vmatpush1.bf16.msra.mxu0 %v8114_v53 }
 0x35c   : > { %2695 = vmatprep.subr.bf16.mxu0 %v8119_v54 }
 0x35f   : > { %2696 = vmatpush1.bf16.msra.mxu0 %v8117_v20 }
 0x360   : > { %2697 = vmatprep.subr.bf16.mxu0 %v8122_v55 }
 0x363   : > { %2698 = vmatpush1.bf16.msra.mxu0 %v8120_v42 }
 0x364   : > { %2699 = vmatprep.subr.bf16.mxu0 %v8125_v57 }
 0x367   : > { %2700 = vmatpush1.bf16.msra.mxu0 %v8123_v60 }
 0x368   : > { %2701 = vmatprep.subr.bf16.mxu0 %v8128_v61 }
 0x36b   : > { %2702 = vmatpush1.bf16.msra.mxu0 %v8126_v62 }
 0x36c   : > { %2703 = vmatprep.subr.bf16.mxu0 %v8131_v63 }
 0x36f   : > { %2704 = vmatpush1.bf16.msra.mxu0 %v8129_v2 }
 0x370   : > { %2705 = vmatprep.subr.bf16.mxu0 %v8134_v4 }
 0x373   : > { %2706 = vmatpush1.bf16.msra.mxu0 %v8132_v5 }
 0x374   : > { %2707 = vmatprep.subr.bf16.mxu0 %v8137_v7 }
 0x377   : > { %2708 = vmatpush1.bf16.msra.mxu0 %v8135_v8 }
 0x378   : > { %2709 = vmatprep.subr.bf16.mxu0 %v8140_v9 }
 0x37b   : > { %2710 = vmatpush1.bf16.msra.mxu0 %v8138_v10 }
 0x37c   : > { %2711 = vmatprep.subr.bf16.mxu0 %v8143_v11 }
 0x37f   : > { %2712 = vmatpush1.bf16.msra.mxu0 %v8141_v12 }
 0x382   : > { %2714 = vmatmul.mubr.bf16.vlgmr.msra.gmra.mrb[0].mxu0 %v9339_v17  ;;  %v8179_v17 = vld [vmem:[%s11084_s7 + $0x1b4] ss:$8 sps:$4 sm:$0xff]  }
 0x383   : > { %3069 = vmatprep.subr.bf16.mxu1 %v8179_v17 }
 0x384   : > { %3070 = vmatpush1.bf16.msra.mxu1 %v8177_v19 }
 0x385   : > { %3071 = vmatprep.subr.bf16.mxu1 %v8182_v21 }
 0x388   : > { %3072 = vmatpush1.bf16.msra.mxu1 %v8180_v22 }
 0x389   : > { %3073 = vmatprep.subr.bf16.mxu1 %v8185_v23 }
 0x38c   : > { %3074 = vmatpush1.bf16.msra.mxu1 %v8183_v59 }
 0x38d   : > { %3075 = vmatprep.subr.bf16.mxu1 %v8188_v24 }
 0x390   : > { %3076 = vmatpush1.bf16.msra.mxu1 %v8186_v25 }
 0x391   : > { %3077 = vmatprep.subr.bf16.mxu1 %v8191_v27 }
 0x394   : > { %3078 = vmatpush1.bf16.msra.mxu1 %v8189_v28  ;;  %v8193_v28 = vld [vmem:[%s11084_s7] ss:$8 sps:$4 sm:$0xff]  }
 0x395   : > { %3263 = vmatprep.subr.bf16.mxu1 %v8195_v29 }
 0x455   : > { %v2715_v35 = vpop.f32.mrb[0].mxu0 }
 0x456   : > { %v2740_v36 = vadd.f32 %v2733_v33, %v2715_v35  ;;  %v2717_v37 = vpop.f32.mrb[1].mxu0 }
 0x457   : > { %v2741_v38 = vadd.f32 %v2737_v3, %v2717_v37  ;;  %v2719_v6 = vpop.f32.mrb[2].mxu0 }
 0x458   : > { %v2744_v31 = vmax.f32 %v2740_v36, 0.0  ;;  %v2742_v40 = vadd.f32 %v2733_v33, %v2719_v6  ;;  %v2721_v39 = vpop.f32.mrb[3].mxu0  ;;  %v8200_v36 = vld [vmem:[%s11084_s7 + $0x14] ss:$8 sps:$4 sm:$0xff]  }
 0x459   : > { %v2745_v32 = vmax.f32 %v2741_v38, 0.0  ;;  %v2743_v41 = vadd.f32 %v2737_v3, %v2721_v39 }
 0x45a   : > { %v2746_v43 = vmax.f32 %v2742_v40, 0.0 }
 0x45b   : > { %v7503_v44 = vpack.c.bf16 %v2745_v32, %v2744_v31  ;;  %v2747_v45 = vmax.f32 %v2743_v41, 0.0  ;;  %v8198_v41 = vld [vmem:[%s11084_s7 + $0x10] ss:$8 sps:$4 sm:$0xff]  }
 0x45d   : > { %v2758_v0 = vrot.slane %v7503_v44, 6  ;;  %v7504_v46 = vpack.c.bf16 %v2747_v45, %v2746_v43  ;;  %v8203_v43 = vld [vmem:[%s11084_s7 + $0x24] ss:$8 sps:$4 sm:$0xff]  }
 0x45f   : > { %v2759_v47 = vrot.slane %v2758_v0, 4  ;;  %2766 = vst [vmem:[#allocation2] sm:$0xcc] %v2758_v0  ;;  %v2760_v48 = vrot.slane %v7504_v46, 6 }
 0x461   : > { %v2761_v15 = vsel %vm8952_vm4, %v2759_v47, %v2760_v48  ;;  %v2762_v49 = vrot.slane %v2760_v48, 4  ;;  %v8201_v47 = vld [vmem:[%s11084_s7 + $0x20] ss:$8 sps:$4 sm:$0xff]  }
 0x463   : > { %2768 = vst [vmem:[#allocation2 + $0x10] sm:$0x33] %v2762_v49 }
 0x466   : > { %v2769_v50 = vld [vmem:[#allocation2] sm:$0xee] }
 0x467   : > { %v6803_v51 = vcombine.high %v2769_v50, %v2761_v15  ;;  %v9828_v52 = vcombine.low %v2769_v50, %v2761_v15  ;;  %v3306_v54 = vld [vmem:[#allocation2] sm:$0xcc]  ;;  %v8204_v50 = vld [vmem:[%s11084_s7 + $0x30] ss:$8 sps:$4 sm:$0xff]  }
 0x468   : > { %v9834_v2 = vcombine.high %v3306_v54, %v2761_v15  ;;  %v9836_v4 = vcombine.low %v3306_v54, %v2761_v15  ;;  %v3842_v22 = vld [vmem:[#allocation2] sm:$0x88]  ;;  %v8210_v54 = vld [vmem:[%s11084_s7 + $0x50] ss:$8 sps:$4 sm:$0xff]  }
 0x469   : > { %v2869_v26 = vshrl.u32 %v6803_v51, 16  ;;  %v2872_v53 = vshll.u32 %v6803_v51, 16  ;;  %v2852_v55 = vshrl.u32 %v9828_v52, 16  ;;  %v2855_v42 = vshll.u32 %v9828_v52, 16 }
 0x46a   : > { %v2804_v20 = vld [vmem:[#allocation2 + $0x10] sm:$0x33]  ;;  %v3348_v19 = vrot.slane %v9834_v2, 2  ;;  %v3345_v24 = vrot.slane %v9836_v4, 2  ;;  %v3098_v35 = vrot.slane %v6803_v51, 1  ;;  %v7037_v31 = vcombine.high %v3842_v22, %v2761_v15 }
 0x46b   : > { %v9832_v57 = vld [vmem:[#allocation2 + $0x10] sm:$0x11]  ;;  %v6805_v60 = vcombine.high %v2804_v20, %v2804_v20  ;;  %v6804_v61 = vcombine.low %v2804_v20, %v2804_v20  ;;  %v2871_v62 = vrot.slane %v2869_v26, 1  ;;  %v2874_v63 = vrot.slane %v2872_v53, 2  ;;  %v8209_v51 = vld [vmem:[%s11084_s7 + $0x44] ss:$8 sps:$4 sm:$0xff]  }
 0x46c   : > { %v6839_v9 = vcombine.high %v9832_v57, %v9832_v57  ;;  %v2854_v10 = vrot.slane %v2852_v55, 1  ;;  %v2857_v11 = vrot.slane %v2855_v42, 2  ;;  %v3560_v27 = vld [vmem:[#allocation2 + $0x10] sm:$0x77]  ;;  %v7036_v32 = vcombine.low %v3842_v22, %v2761_v15  ;;  %v8207_v26 = vld [vmem:[%s11084_s7 + $0x40] ss:$8 sps:$4 sm:$0xff]  }
 0x46d   : > { %v2877_v5 = vshrl.u32 %v6805_v60, 16  ;;  %v2880_v7 = vshll.u32 %v6805_v60, 16  ;;  %v2860_v8 = vshrl.u32 %v6804_v61, 16  ;;  %v2863_v12 = vshll.u32 %v6804_v61, 16  ;;  %v8206_v15 = vld [vmem:[%s11084_s7 + $0x34] ss:$8 sps:$4 sm:$0xff]  }
 0x46e   : > { %v2875_v18 = vor.u32 %v2874_v63, %v2871_v62  ;;  %v3349_v21 = vrot.slane %v6805_v60, 2  ;;  %v3099_v59 = vrot.slane %v6839_v9, 1  ;;  %v3346_v25 = vrot.slane %v6804_v61, 2  ;;  %v8212_v53 = vld [vmem:[%s11084_s7 + $0x54] ss:$8 sps:$4 sm:$0xff]  }
 0x46f   : > { %v2879_v13 = vrot.slane %v2877_v5, 1  ;;  %v2882_v14 = vrot.slane %v2880_v7, 2  ;;  %v2862_v16 = vrot.slane %v2860_v8, 1  ;;  %v2865_v17 = vrot.slane %v2863_v12, 2  ;;  %v8215_v20 = vld [vmem:[%s11084_s7 + $0x64] ss:$8 sps:$4 sm:$0xff]  }
 0x470   : > { %v2858_v29 = vor.u32 %v2857_v11, %v2854_v10  ;;  %v9846_v33 = vsel %vm908_vm7, %v3348_v19, %v3349_v21  ;;  %v9853_v37 = vsel %vm908_vm7, %v3345_v24, %v3346_v25  ;;  %v9856_v6 = vcombine.high %v3560_v27, %v3560_v27  ;;  %v8213_v55 = vld [vmem:[%s11084_s7 + $0x60] ss:$8 sps:$4 sm:$0xff]   ;;  %v8218_v42 = vld [vmem:[%s11084_s7 + $0x74] ss:$8 sps:$4 sm:$0xff]   ;;  %v8216_v60 = vld [vmem:[%s11084_s7 + $0x70] ss:$8 sps:$4 sm:$0xff]  }
 0x471   : > { %v2883_v23 = vor.u32 %v2882_v14, %v2879_v13  ;;  %v2866_v30 = vor.u32 %v2865_v17, %v2862_v16  ;;  %v3100_v40 = vsel %vm759_vm6, %v3098_v35, %v3099_v59  ;;  %v9859_v39 = vcombine.low %v3560_v27, %v3560_v27  ;;  %v8221_v61 = vld [vmem:[%s11084_s7 + $0x84] ss:$8 sps:$4 sm:$0xff]   ;;  %v8219_v62 = vld [vmem:[%s11084_s7 + $0x80] ss:$8 sps:$4 sm:$0xff]   ;;  %v8224_v63 = vld [vmem:[%s11084_s7 + $0x94] ss:$8 sps:$4 sm:$0xff]  }
 0x472   : > { %v3884_v44 = vrot.slane %v7037_v31, 3  ;;  %v3885_v45 = vrot.slane %v9856_v6, 3  ;;  %v3881_v0 = vrot.slane %v7036_v32, 3  ;;  %v8222_v5 = vld [vmem:[%s11084_s7 + $0x90] ss:$8 sps:$4 sm:$0xff]   ;;  %v6838_v19 = vcombine.low %v9832_v57, %v9832_v57 }
 0x473   : > { %v2884_v3 = vsel %vm614_vm5, %v2875_v18, %v2883_v23  ;;  %v2867_v38 = vsel %vm614_vm5, %v2858_v29, %v2866_v30  ;;  %v3882_v46 = vrot.slane %v9859_v39, 3  ;;  %v8227_v7 = vld [vmem:[%s11084_s7 + $0xa4] ss:$8 sps:$4 sm:$0xff]   ;;  %v8225_v8 = vld [vmem:[%s11084_s7 + $0xa0] ss:$8 sps:$4 sm:$0xff]   ;;  %v3095_v59 = vrot.slane %v9828_v52, 1 }
 0x474   : > { %3079 = vmatprep.mubr.bf16.mxu1 %v2884_v3  ;;  %v9873_v48 = vsel %vm1228_vm9, %v3884_v44, %v3885_v45  ;;  %v8230_v9 = vld [vmem:[%s11084_s7 + $0xb4] ss:$8 sps:$4 sm:$0xff]   ;;  %v8228_v10 = vld [vmem:[%s11084_s7 + $0xb0] ss:$8 sps:$4 sm:$0xff]   ;;  %v8233_v11 = vld [vmem:[%s11084_s7 + $0xc4] ss:$8 sps:$4 sm:$0xff]  }
 0x475   : > { %3080 = vmatmul.mubr.bf16.vlgmr.msra.gmra.mrb[8].mxu1 %v2867_v38  ;;  %v9879_v49 = vsel %vm1228_vm9, %v3881_v0, %v3882_v46  ;;  %v8231_v12 = vld [vmem:[%s11084_s7 + $0xc0] ss:$8 sps:$4 sm:$0xff]   ;;  %v8236_v13 = vld [vmem:[%s11084_s7 + $0xd4] ss:$8 sps:$4 sm:$0xff]   ;;  %v8234_v14 = vld [vmem:[%s11084_s7 + $0xd0] ss:$8 sps:$4 sm:$0xff]  }
 0x476   : > { %3264 = vmatpush1.bf16.msra.mxu1 %v8193_v28  ;;  %3295 = vmatprep.mubr.bf16.mxu1 %v3100_v40  ;;  %v8239_v16 = vld [vmem:[%s11084_s7 + $0xe4] ss:$8 sps:$4 sm:$0xff]   ;;  %v8237_v18 = vld [vmem:[%s11084_s7 + $0xe0] ss:$8 sps:$4 sm:$0xff]   ;;  %v8242_v17 = vld [vmem:[%s11084_s7 + $0xf4] ss:$8 sps:$4 sm:$0xff]  }
 0x477   : > { %3265 = vmatprep.subr.bf16.mxu1 %v8200_v36  ;;  %v8240_v21 = vld [vmem:[%s11084_s7 + $0xf0] ss:$8 sps:$4 sm:$0xff]   ;;  %v8246_v22 = vld [vmem:[%s11084_s7 + $0x204] ss:$8 sps:$4 sm:$0xff]   ;;  %v3096_v23 = vrot.slane %v6838_v19, 1 }
 0x478   : > { %v8244_v24 = vld [vmem:[%s11084_s7 + $0x200] ss:$8 sps:$4 sm:$0xff]   ;;  %v8249_v57 = vld [vmem:[%s11084_s7 + $0x214] ss:$8 sps:$4 sm:$0xff]   ;;  %v8247_v27 = vld [vmem:[%s11084_s7 + $0x210] ss:$8 sps:$4 sm:$0xff]  }
 0x479   : > { %v3097_v25 = vsel %vm759_vm6, %v3095_v59, %v3096_v23  ;;  %v8252_v52 = vld [vmem:[%s11084_s7 + $0x224] ss:$8 sps:$4 sm:$0xff]   ;;  %v8250_v28 = vld [vmem:[%s11084_s7 + $0x220] ss:$8 sps:$4 sm:$0xff]   ;;  %v8255_v29 = vld [vmem:[%s11084_s7 + $0x234] ss:$8 sps:$4 sm:$0xff]  }
 0x47a   : > { %3266 = vmatpush1.bf16.msra.mxu1 %v8198_v41  ;;  %v8253_v30 = vld [vmem:[%s11084_s7 + $0x230] ss:$8 sps:$4 sm:$0xff]   ;;  %v8256_v3 = vld [vmem:[%s11084_s7 + $0x240] ss:$8 sps:$4 sm:$0xff]   ;;  %v8261_v35 = vld [vmem:[%s11084_s7 + $0x254] ss:$8 sps:$4 sm:$0xff]  }
 0x47b   : > { %3267 = vmatprep.subr.bf16.mxu1 %v8203_v43  ;;  %v8259_v36 = vld [vmem:[%s11084_s7 + $0x250] ss:$8 sps:$4 sm:$0xff]   ;;  %v8264_v38 = vld [vmem:[%s11084_s7 + $0x264] ss:$8 sps:$4 sm:$0xff]   ;;  %v8262_v31 = vld [vmem:[%s11084_s7 + $0x260] ss:$8 sps:$4 sm:$0xff]  }
 0x47c   : > { %v8267_v40 = vld [vmem:[%s11084_s7 + $0x274] ss:$8 sps:$4 sm:$0xff]   ;;  %v8265_v32 = vld [vmem:[%s11084_s7 + $0x270] ss:$8 sps:$4 sm:$0xff]   ;;  %v8270_v41 = vld [vmem:[%s11084_s7 + $0x284] ss:$8 sps:$4 sm:$0xff]  }
 0x47d   : > { %v8268_v43 = vld [vmem:[%s11084_s7 + $0x280] ss:$8 sps:$4 sm:$0xff]   ;;  %v8273_v44 = vld [vmem:[%s11084_s7 + $0x294] ss:$8 sps:$4 sm:$0xff]   ;;  %v8271_v45 = vld [vmem:[%s11084_s7 + $0x290] ss:$8 sps:$4 sm:$0xff]  }
 0x47e   : > { %3268 = vmatpush1.bf16.msra.mxu1 %v8201_v47  ;;  %v8276_v0 = vld [vmem:[%s11084_s7 + $0x2a4] ss:$8 sps:$4 sm:$0xff]   ;;  %v8274_v46 = vld [vmem:[%s11084_s7 + $0x2a0] ss:$8 sps:$4 sm:$0xff]   ;;  %v8279_v47 = vld [vmem:[%s11084_s7 + $0x2b4] ss:$8 sps:$4 sm:$0xff]  }
 0x47f   : > { %3269 = vmatprep.subr.bf16.mxu1 %v8206_v15  ;;  %v8277_v15 = vld [vmem:[%s11084_s7 + $0x2b0] ss:$8 sps:$4 sm:$0xff]   ;;  %v8304_v23 = vld [vmem:[%s11084_s7 + $0x334] ss:$8 sps:$4 sm:$0xff]   ;;  %v8396_v59 = vld [vmem:[%s11086_s9 + $0x120] ss:$8 sps:$4 sm:$0xff]  }
 0x480   : > { %v8393_v19 = vld [vmem:[%s11086_s9 + $0x110] ss:$8 sps:$4 sm:$0xff]  }
 0x482   : > { %3270 = vmatpush1.bf16.msra.mxu1 %v8204_v50  ;;  %v8282_v50 = vld [vmem:[%s11084_s7 + $0x2c4] ss:$8 sps:$4 sm:$0xff]  }
 0x483   : > { %3271 = vmatprep.subr.bf16.mxu1 %v8209_v51  ;;  %v8280_v51 = vld [vmem:[%s11084_s7 + $0x2c0] ss:$8 sps:$4 sm:$0xff]  }
 0x486   : > { %3272 = vmatpush1.bf16.msra.mxu1 %v8207_v26  ;;  %v8285_v26 = vld [vmem:[%s11084_s7 + $0x2d4] ss:$8 sps:$4 sm:$0xff]  }
 0x487   : > { %3273 = vmatprep.subr.bf16.mxu1 %v8212_v53  ;;  %v8283_v53 = vld [vmem:[%s11084_s7 + $0x2d0] ss:$8 sps:$4 sm:$0xff]  }
 0x48a   : > { %3274 = vmatpush1.bf16.msra.mxu1 %v8210_v54  ;;  %v8288_v54 = vld [vmem:[%s11084_s7 + $0x2e4] ss:$8 sps:$4 sm:$0xff]  }
 0x48b   : > { %3275 = vmatprep.subr.bf16.mxu1 %v8215_v20  ;;  %v3625_v20 = vshrl.u32 %v9856_v6, 16 }
 0x48e   : > { %3276 = vmatpush1.bf16.msra.mxu1 %v8213_v55  ;;  %v3628_v55 = vshll.u32 %v9856_v6, 16  ;;  %v8289_v6 = vld [vmem:[%s11084_s7 + $0x2f0] ss:$8 sps:$4 sm:$0xff]  }
 0x48f   : > { %3277 = vmatprep.subr.bf16.mxu1 %v8218_v42  ;;  %v8286_v42 = vld [vmem:[%s11084_s7 + $0x2e0] ss:$8 sps:$4 sm:$0xff]  }
 0x492   : > { %3278 = vmatpush1.bf16.msra.mxu1 %v8216_v60  ;;  %v8291_v60 = vld [vmem:[%s11084_s7 + $0x2f4] ss:$8 sps:$4 sm:$0xff]  }
 0x493   : > { %3279 = vmatprep.subr.bf16.mxu1 %v8221_v61  ;;  %v3617_v61 = vshrl.u32 %v9834_v2, 16 }
 0x496   : > { %3280 = vmatpush1.bf16.msra.mxu1 %v8219_v62  ;;  %v3620_v62 = vshll.u32 %v9834_v2, 16  ;;  %v8292_v2 = vld [vmem:[%s11084_s7 + $0x300] ss:$8 sps:$4 sm:$0xff]  }
 0x497   : > { %3281 = vmatprep.subr.bf16.mxu1 %v8224_v63  ;;  %v3627_v63 = vrot.slane %v3625_v20, 2  ;;  %v8331_v20 = vld [vmem:[%s11084_s7 + $0x3c4] ss:$8 sps:$4 sm:$0xff]  }
 0x49a   : > { %3282 = vmatpush1.bf16.msra.mxu1 %v8222_v5  ;;  %v3630_v5 = vrot.slane %v3628_v55, 3  ;;  %v8329_v55 = vld [vmem:[%s11084_s7 + $0x3c0] ss:$8 sps:$4 sm:$0xff]  }
 0x49b   : > { %3283 = vmatprep.subr.bf16.mxu1 %v8227_v7  ;;  %v8294_v7 = vld [vmem:[%s11084_s7 + $0x304] ss:$8 sps:$4 sm:$0xff]  }
 0x49e   : > { %3284 = vmatpush1.bf16.msra.mxu1 %v8225_v8  ;;  %v3619_v8 = vrot.slane %v3617_v61, 2  ;;  %v8337_v61 = vld [vmem:[%s11084_s7 + $0x3e4] ss:$8 sps:$4 sm:$0xff]  }
 0x49f   : > { %3285 = vmatprep.subr.bf16.mxu1 %v8230_v9  ;;  %v3622_v9 = vrot.slane %v3620_v62, 3  ;;  %v3608_v62 = vshrl.u32 %v9859_v39, 16 }
 0x4a2   : > { %3286 = vmatpush1.bf16.msra.mxu1 %v8228_v10  ;;  %v3631_v10 = vor.u32 %v3630_v5, %v3627_v63  ;;  %v3611_v63 = vshll.u32 %v9859_v39, 16  ;;  %v8335_v5 = vld [vmem:[%s11084_s7 + $0x3e0] ss:$8 sps:$4 sm:$0xff]   ;;  %v8338_v39 = vld [vmem:[%s11084_s7 + $0x3f0] ss:$8 sps:$4 sm:$0xff]  }
 0x4a3   : > { %3287 = vmatprep.subr.bf16.mxu1 %v8233_v11  ;;  %v3623_v11 = vor.u32 %v3622_v9, %v3619_v8  ;;  %v8340_v8 = vld [vmem:[%s11084_s7 + $0x3f4] ss:$8 sps:$4 sm:$0xff]   ;;  %v3610_v9 = vrot.slane %v3608_v62, 2  ;;  %v8441_v62 = vld [vmem:[%s11086_s9 + $0x4] ss:$8 sps:$4 sm:$0xff]  }
 0x4a6   : > { %3288 = vmatpush1.bf16.msra.mxu1 %v8231_v12  ;;  %v8298_v12 = vld [vmem:[%s11084_s7 + $0x314] ss:$8 sps:$4 sm:$0xff]  }
 0x4a7   : > { %3289 = vmatprep.subr.bf16.mxu1 %v8236_v13  ;;  %v3632_v13 = vsel %vm1061_vm8, %v3623_v11, %v3631_v10  ;;  %v3613_v10 = vrot.slane %v3611_v63, 3  ;;  %v4096_v63 = vld [vmem:[%s11085_s8] sm:$0x3] }
 0x4aa   : > { %3290 = vmatpush1.bf16.msra.mxu1 %v8234_v14  ;;  %v8390_v14 = vld [vmem:[%s11086_s9 + $0x100] ss:$8 sps:$4 sm:$0xff]  }
 0x4ab   : > { %3291 = vmatprep.subr.bf16.mxu1 %v8239_v16  ;;  %v8392_v16 = vld [vmem:[%s11086_s9 + $0x104] ss:$8 sps:$4 sm:$0xff]  }
 0x4ac   : > { %4415 = vmatprep.subr.bf16.mxu0 %v8392_v16  ;;  %v8347_v16 = vld [vmem:[%s11084_s7 + $0x414] ss:$8 sps:$4 sm:$0xff]  }
 0x4ad   : > { %4416 = vmatpush1.bf16.msra.mxu0 %v8390_v14  ;;  %v8342_v14 = vld [vmem:[%s11084_s7 + $0x400] ss:$8 sps:$4 sm:$0xff]  }
 0x4ae   : > { %3292 = vmatpush1.bf16.msra.mxu1 %v8237_v18  ;;  %v8296_v18 = vld [vmem:[%s11084_s7 + $0x310] ss:$8 sps:$4 sm:$0xff]  }
 0x4af   : > { %3293 = vmatprep.subr.bf16.mxu1 %v8242_v17  ;;  %v8301_v17 = vld [vmem:[%s11084_s7 + $0x324] ss:$8 sps:$4 sm:$0xff]  }
 0x4b2   : > { %3294 = vmatpush1.bf16.msra.mxu1 %v8240_v21  ;;  %v8398_v21 = vld [vmem:[%s11086_s9 + $0x124] ss:$8 sps:$4 sm:$0xff]  }
 0x4b3   : > { %3513 = vmatprep.subr.bf16.mxu1 %v8246_v22  ;;  %v8299_v22 = vld [vmem:[%s11084_s7 + $0x320] ss:$8 sps:$4 sm:$0xff]  }
 0x4b5   : > { %3296 = vmatmul.mubr.bf16.vlgmr.msra.gmra.mrb[8].mxu1 %v3097_v25  ;;  %v8307_v25 = vld [vmem:[%s11084_s7 + $0x344] ss:$8 sps:$4 sm:$0xff]  }
 0x4b6   : > { %3514 = vmatpush1.bf16.msra.mxu1 %v8244_v24  ;;  %3545 = vmatprep.mubr.bf16.mxu1 %v9846_v33  ;;  %v8258_v33 = vld [vmem:[%s11084_s7 + $0x244] ss:$8 sps:$4 sm:$0xff]   ;;  %v8401_v24 = vld [vmem:[%s11086_s9 + $0x134] ss:$8 sps:$4 sm:$0xff]  }
 0x4b7   : > { %3515 = vmatprep.subr.bf16.mxu1 %v8249_v57  ;;  %v8302_v57 = vld [vmem:[%s11084_s7 + $0x330] ss:$8 sps:$4 sm:$0xff]  }
 0x4ba   : > { %3516 = vmatpush1.bf16.msra.mxu1 %v8247_v27  ;;  %v8399_v27 = vld [vmem:[%s11086_s9 + $0x130] ss:$8 sps:$4 sm:$0xff]  }
 0x4bb   : > { %3517 = vmatprep.subr.bf16.mxu1 %v8252_v52  ;;  %v8404_v52 = vld [vmem:[%s11086_s9 + $0x144] ss:$8 sps:$4 sm:$0xff]  }
 0x4be   : > { %3518 = vmatpush1.bf16.msra.mxu1 %v8250_v28  ;;  %v8305_v28 = vld [vmem:[%s11084_s7 + $0x340] ss:$8 sps:$4 sm:$0xff]  }
 0x4bf   : > { %3519 = vmatprep.subr.bf16.mxu1 %v8255_v29  ;;  %v8310_v29 = vld [vmem:[%s11084_s7 + $0x354] ss:$8 sps:$4 sm:$0xff]  }
 0x4c2   : > { %3520 = vmatpush1.bf16.msra.mxu1 %v8253_v30  ;;  %v8402_v30 = vld [vmem:[%s11086_s9 + $0x140] ss:$8 sps:$4 sm:$0xff]  }
 0x4c3   : > { %3521 = vmatprep.subr.bf16.mxu1 %v8258_v33  ;;  %v8407_v33 = vld [vmem:[%s11086_s9 + $0x154] ss:$8 sps:$4 sm:$0xff]  }
 0x4c6   : > { %3522 = vmatpush1.bf16.msra.mxu1 %v8256_v3  ;;  %v8308_v3 = vld [vmem:[%s11084_s7 + $0x350] ss:$8 sps:$4 sm:$0xff]  }
 0x4c7   : > { %3523 = vmatprep.subr.bf16.mxu1 %v8261_v35  ;;  %v8313_v35 = vld [vmem:[%s11084_s7 + $0x364] ss:$8 sps:$4 sm:$0xff]  }
 0x4ca   : > { %3524 = vmatpush1.bf16.msra.mxu1 %v8259_v36  ;;  %v8405_v36 = vld [vmem:[%s11086_s9 + $0x150] ss:$8 sps:$4 sm:$0xff]  }
 0x4cb   : > { %3525 = vmatprep.subr.bf16.mxu1 %v8264_v38  ;;  %v8410_v38 = vld [vmem:[%s11086_s9 + $0x164] ss:$8 sps:$4 sm:$0xff]  }
 0x4ce   : > { %3526 = vmatpush1.bf16.msra.mxu1 %v8262_v31  ;;  %v8311_v31 = vld [vmem:[%s11084_s7 + $0x360] ss:$8 sps:$4 sm:$0xff]  }
 0x4cf   : > { %3527 = vmatprep.subr.bf16.mxu1 %v8267_v40  ;;  %v8316_v40 = vld [vmem:[%s11084_s7 + $0x374] ss:$8 sps:$4 sm:$0xff]  }
 0x4d2   : > { %3528 = vmatpush1.bf16.msra.mxu1 %v8265_v32  ;;  %v8408_v32 = vld [vmem:[%s11086_s9 + $0x160] ss:$8 sps:$4 sm:$0xff]  }
 0x4d3   : > { %3529 = vmatprep.subr.bf16.mxu1 %v8270_v41  ;;  %v8413_v41 = vld [vmem:[%s11086_s9 + $0x174] ss:$8 sps:$4 sm:$0xff]  }
 0x4d6   : > { %3530 = vmatpush1.bf16.msra.mxu1 %v8268_v43  ;;  %v8314_v43 = vld [vmem:[%s11084_s7 + $0x370] ss:$8 sps:$4 sm:$0xff]  }
 0x4d7   : > { %3531 = vmatprep.subr.bf16.mxu1 %v8273_v44  ;;  %v8319_v44 = vld [vmem:[%s11084_s7 + $0x384] ss:$8 sps:$4 sm:$0xff]  }
 0x4da   : > { %3532 = vmatpush1.bf16.msra.mxu1 %v8271_v45  ;;  %v8411_v45 = vld [vmem:[%s11086_s9 + $0x170] ss:$8 sps:$4 sm:$0xff]  }
 0x4db   : > { %3533 = vmatprep.subr.bf16.mxu1 %v8276_v0  ;;  %v8416_v0 = vld [vmem:[%s11086_s9 + $0x184] ss:$8 sps:$4 sm:$0xff]  }
 0x4de   : > { %3534 = vmatpush1.bf16.msra.mxu1 %v8274_v46  ;;  %v8317_v46 = vld [vmem:[%s11084_s7 + $0x380] ss:$8 sps:$4 sm:$0xff]  }
 0x4df   : > { %3535 = vmatprep.subr.bf16.mxu1 %v8279_v47  ;;  %v8322_v47 = vld [vmem:[%s11084_s7 + $0x394] ss:$8 sps:$4 sm:$0xff]  }
 0x4e2   : > { %3536 = vmatpush1.bf16.msra.mxu1 %v8277_v15  ;;  %v8414_v15 = vld [vmem:[%s11086_s9 + $0x180] ss:$8 sps:$4 sm:$0xff]  }
 0x4e3   : > { %3537 = vmatprep.subr.bf16.mxu1 %v8282_v50  ;;  %v8320_v50 = vld [vmem:[%s11084_s7 + $0x390] ss:$8 sps:$4 sm:$0xff]  }
 0x4e6   : > { %3538 = vmatpush1.bf16.msra.mxu1 %v8280_v51  ;;  %v8325_v51 = vld [vmem:[%s11084_s7 + $0x3a4] ss:$8 sps:$4 sm:$0xff]  }
 0x4e7   : > { %3539 = vmatprep.subr.bf16.mxu1 %v8285_v26  ;;  %v8323_v26 = vld [vmem:[%s11084_s7 + $0x3a0] ss:$8 sps:$4 sm:$0xff]  }
 0x4ea   : > { %3540 = vmatpush1.bf16.msra.mxu1 %v8283_v53  ;;  %v8328_v53 = vld [vmem:[%s11084_s7 + $0x3b4] ss:$8 sps:$4 sm:$0xff]  }
 0x4eb   : > { %3541 = vmatprep.subr.bf16.mxu1 %v8288_v54  ;;  %v8326_v54 = vld [vmem:[%s11084_s7 + $0x3b0] ss:$8 sps:$4 sm:$0xff]  }
 0x4ee   : > { %3542 = vmatpush1.bf16.msra.mxu1 %v8286_v42  ;;  %v8334_v42 = vld [vmem:[%s11084_s7 + $0x3d4] ss:$8 sps:$4 sm:$0xff]  }
 0x4ef   : > { %3543 = vmatprep.subr.bf16.mxu1 %v8291_v60  ;;  %v8332_v60 = vld [vmem:[%s11084_s7 + $0x3d0] ss:$8 sps:$4 sm:$0xff]  }
 0x4f2   : > { %3544 = vmatpush1.bf16.msra.mxu1 %v8289_v6  ;;  %v3600_v6 = vshrl.u32 %v9836_v4, 16 }
 0x4f3   : > { %3795 = vmatprep.subr.bf16.mxu1 %v8294_v7  ;;  %v3603_v7 = vshll.u32 %v9836_v4, 16  ;;  %v3614_v4 = vor.u32 %v3613_v10, %v3610_v9 }
 0x4f5   : > { %3546 = vmatmul.mubr.bf16.vlgmr.msra.gmra.mrb[8].mxu1 %v9853_v37  ;;  %v8395_v37 = vld [vmem:[%s11086_s9 + $0x114] ss:$8 sps:$4 sm:$0xff]   ;;  %v3605_v11 = vrot.slane %v3603_v7, 3 }
 0x4f6   : > { %3796 = vmatpush1.bf16.msra.mxu1 %v8292_v2  ;;  %3827 = vmatprep.mubr.bf16.mxu1 %v3632_v13  ;;  %v3602_v2 = vrot.slane %v3600_v6, 2  ;;  %v4105_v6 = vrot.slane %v4096_v63, %v9282_v58 }
 0x4f7   : > { %3797 = vmatprep.subr.bf16.mxu1 %v8298_v12  ;;  %4417 = vmatprep.subr.bf16.mxu0 %v8395_v37  ;;  %v8344_v12 = vld [vmem:[%s11084_s7 + $0x404] ss:$8 sps:$4 sm:$0xff]   ;;  %v8345_v37 = vld [vmem:[%s11084_s7 + $0x410] ss:$8 sps:$4 sm:$0xff]  }
 0x4f8   : > { %4418 = vmatpush1.bf16.msra.mxu0 %v8393_v19  ;;  %v3606_v13 = vor.u32 %v3605_v11, %v3602_v2  ;;  %v8348_v19 = vld [vmem:[%s11084_s7 + $0x420] ss:$8 sps:$4 sm:$0xff]  }
 0x4f9   : > { %4419 = vmatprep.subr.bf16.mxu0 %v8398_v21  ;;  %v8353_v21 = vld [vmem:[%s11084_s7 + $0x434] ss:$8 sps:$4 sm:$0xff]  }
 0x4fa   : > { %3798 = vmatpush1.bf16.msra.mxu1 %v8296_v18  ;;  %v3615_v18 = vsel %vm1061_vm8, %v3606_v13, %v3614_v4 }
 0x4fb   : > { %3799 = vmatprep.subr.bf16.mxu1 %v8301_v17  ;;  %v8350_v17 = vld [vmem:[%s11084_s7 + $0x424] ss:$8 sps:$4 sm:$0xff]  }
 0x4fc   : > { %4420 = vmatpush1.bf16.msra.mxu0 %v8396_v59  ;;  %v8359_v59 = vld [vmem:[%s11084_s7 + $0x454] ss:$8 sps:$4 sm:$0xff]  }
 0x4fd   : > { %4421 = vmatprep.subr.bf16.mxu0 %v8401_v24  ;;  %v8357_v24 = vld [vmem:[%s11084_s7 + $0x450] ss:$8 sps:$4 sm:$0xff]  }
 0x4fe   : > { %3800 = vmatpush1.bf16.msra.mxu1 %v8299_v22  ;;  %v8356_v22 = vld [vmem:[%s11084_s7 + $0x444] ss:$8 sps:$4 sm:$0xff]  }
 0x4ff   : > { %3801 = vmatprep.subr.bf16.mxu1 %v8304_v23  ;;  %v8354_v23 = vld [vmem:[%s11084_s7 + $0x440] ss:$8 sps:$4 sm:$0xff]  }
 0x500   : > { %4422 = vmatpush1.bf16.msra.mxu0 %v8399_v27  ;;  %v8365_v27 = vld [vmem:[%s11084_s7 + $0x474] ss:$8 sps:$4 sm:$0xff]  }
 0x501   : > { %4423 = vmatprep.subr.bf16.mxu0 %v8404_v52  ;;  %v8363_v52 = vld [vmem:[%s11084_s7 + $0x470] ss:$8 sps:$4 sm:$0xff]  }
 0x502   : > { %3802 = vmatpush1.bf16.msra.mxu1 %v8302_v57  ;;  %v8362_v57 = vld [vmem:[%s11084_s7 + $0x464] ss:$8 sps:$4 sm:$0xff]  }
 0x503   : > { %3803 = vmatprep.subr.bf16.mxu1 %v8307_v25  ;;  %v8360_v25 = vld [vmem:[%s11084_s7 + $0x460] ss:$8 sps:$4 sm:$0xff]  }
 0x504   : > { %4424 = vmatpush1.bf16.msra.mxu0 %v8402_v30  ;;  %v8371_v30 = vld [vmem:[%s11084_s7 + $0x494] ss:$8 sps:$4 sm:$0xff]  }
 0x505   : > { %4425 = vmatprep.subr.bf16.mxu0 %v8407_v33  ;;  %v8369_v33 = vld [vmem:[%s11084_s7 + $0x490] ss:$8 sps:$4 sm:$0xff]  }
 0x506   : > { %3804 = vmatpush1.bf16.msra.mxu1 %v8305_v28  ;;  %v8368_v28 = vld [vmem:[%s11084_s7 + $0x484] ss:$8 sps:$4 sm:$0xff]  }
 0x507   : > { %3805 = vmatprep.subr.bf16.mxu1 %v8310_v29  ;;  %v8366_v29 = vld [vmem:[%s11084_s7 + $0x480] ss:$8 sps:$4 sm:$0xff]  }
 0x508   : > { %4426 = vmatpush1.bf16.msra.mxu0 %v8405_v36  ;;  %v8377_v36 = vld [vmem:[%s11084_s7 + $0x4b4] ss:$8 sps:$4 sm:$0xff]  }
 0x509   : > { %4427 = vmatprep.subr.bf16.mxu0 %v8410_v38  ;;  %v8375_v38 = vld [vmem:[%s11084_s7 + $0x4b0] ss:$8 sps:$4 sm:$0xff]  }
 0x50a   : > { %3806 = vmatpush1.bf16.msra.mxu1 %v8308_v3  ;;  %v8374_v3 = vld [vmem:[%s11084_s7 + $0x4a4] ss:$8 sps:$4 sm:$0xff]  }
 0x50b   : > { %3807 = vmatprep.subr.bf16.mxu1 %v8313_v35  ;;  %v8372_v35 = vld [vmem:[%s11084_s7 + $0x4a0] ss:$8 sps:$4 sm:$0xff]  }
 0x50c   : > { %4428 = vmatpush1.bf16.msra.mxu0 %v8408_v32  ;;  %v8383_v32 = vld [vmem:[%s11084_s7 + $0x4d4] ss:$8 sps:$4 sm:$0xff]  }
 0x50d   : > { %4429 = vmatprep.subr.bf16.mxu0 %v8413_v41  ;;  %v8381_v41 = vld [vmem:[%s11084_s7 + $0x4d0] ss:$8 sps:$4 sm:$0xff]  }
 0x50e   : > { %3808 = vmatpush1.bf16.msra.mxu1 %v8311_v31  ;;  %v8380_v31 = vld [vmem:[%s11084_s7 + $0x4c4] ss:$8 sps:$4 sm:$0xff]  }
 0x50f   : > { %3809 = vmatprep.subr.bf16.mxu1 %v8316_v40  ;;  %v8378_v40 = vld [vmem:[%s11084_s7 + $0x4c0] ss:$8 sps:$4 sm:$0xff]  }
 0x510   : > { %4430 = vmatpush1.bf16.msra.mxu0 %v8411_v45  ;;  %v8389_v45 = vld [vmem:[%s11084_s7 + $0x4f4] ss:$8 sps:$4 sm:$0xff]  }
 0x511   : > { %4431 = vmatprep.subr.bf16.mxu0 %v8416_v0  ;;  %v8387_v0 = vld [vmem:[%s11084_s7 + $0x4f0] ss:$8 sps:$4 sm:$0xff]  }
 0x512   : > { %3810 = vmatpush1.bf16.msra.mxu1 %v8314_v43  ;;  %v8386_v43 = vld [vmem:[%s11084_s7 + $0x4e4] ss:$8 sps:$4 sm:$0xff]  }
 0x513   : > { %3811 = vmatprep.subr.bf16.mxu1 %v8319_v44  ;;  %v8384_v44 = vld [vmem:[%s11084_s7 + $0x4e0] ss:$8 sps:$4 sm:$0xff]  }
 0x514   : > { %4432 = vmatpush1.bf16.msra.mxu0 %v8414_v15  ;;  %v8422_v15 = vld [vmem:[%s11086_s9 + $0x1a4] ss:$8 sps:$4 sm:$0xff]  }
 0x516   : > { %3812 = vmatpush1.bf16.msra.mxu1 %v8317_v46  ;;  %v8417_v46 = vld [vmem:[%s11086_s9 + $0x190] ss:$8 sps:$4 sm:$0xff]  }
 0x517   : > { %3813 = vmatprep.subr.bf16.mxu1 %v8322_v47  ;;  %v8419_v47 = vld [vmem:[%s11086_s9 + $0x194] ss:$8 sps:$4 sm:$0xff]  }
 0x518   : > { %4433 = vmatprep.subr.bf16.mxu0 %v8419_v47 }
 0x519   : > { %4434 = vmatpush1.bf16.msra.mxu0 %v8417_v46 }
 0x51a   : > { %3814 = vmatpush1.bf16.msra.mxu1 %v8320_v50  ;;  %v8420_v50 = vld [vmem:[%s11086_s9 + $0x1a0] ss:$8 sps:$4 sm:$0xff]   ;;  %4435 = vmatprep.subr.bf16.mxu0 %v8422_v15 }
 0x51b   : > { %3815 = vmatprep.subr.bf16.mxu1 %v8325_v51  ;;  %v8423_v51 = vld [vmem:[%s11086_s9 + $0x1b0] ss:$8 sps:$4 sm:$0xff]  }
 0x51d   : > { %4436 = vmatpush1.bf16.msra.mxu0 %v8420_v50 }
 0x51e   : > { %3816 = vmatpush1.bf16.msra.mxu1 %v8323_v26  ;;  %v8428_v26 = vld [vmem:[%s11086_s9 + $0x1c4] ss:$8 sps:$4 sm:$0xff]  }
 0x51f   : > { %3817 = vmatprep.subr.bf16.mxu1 %v8328_v53  ;;  %v8426_v53 = vld [vmem:[%s11086_s9 + $0x1c0] ss:$8 sps:$4 sm:$0xff]  }
 0x522   : > { %3818 = vmatpush1.bf16.msra.mxu1 %v8326_v54  ;;  %v8431_v54 = vld [vmem:[%s11086_s9 + $0x1d4] ss:$8 sps:$4 sm:$0xff]  }
 0x523   : > { %3819 = vmatprep.subr.bf16.mxu1 %v8331_v20  ;;  %v8429_v20 = vld [vmem:[%s11086_s9 + $0x1d0] ss:$8 sps:$4 sm:$0xff]  }
 0x526   : > { %3820 = vmatpush1.bf16.msra.mxu1 %v8329_v55  ;;  %v8434_v55 = vld [vmem:[%s11086_s9 + $0x1e4] ss:$8 sps:$4 sm:$0xff]  }
 0x527   : > { %3821 = vmatprep.subr.bf16.mxu1 %v8334_v42  ;;  %v8432_v42 = vld [vmem:[%s11086_s9 + $0x1e0] ss:$8 sps:$4 sm:$0xff]  }
 0x52a   : > { %3822 = vmatpush1.bf16.msra.mxu1 %v8332_v60  ;;  %v8437_v60 = vld [vmem:[%s11086_s9 + $0x1f4] ss:$8 sps:$4 sm:$0xff]  }
 0x52b   : > { %3823 = vmatprep.subr.bf16.mxu1 %v8337_v61  ;;  %v8435_v61 = vld [vmem:[%s11086_s9 + $0x1f0] ss:$8 sps:$4 sm:$0xff]  }
 0x52e   : > { %3824 = vmatpush1.bf16.msra.mxu1 %v8335_v5  ;;  %v4101_v5 = vrot.slane %v4096_v63, %v9277_v56 }
 0x52f   : > { %3825 = vmatprep.subr.bf16.mxu1 %v8340_v8 }
 0x532   : > { %3826 = vmatpush1.bf16.msra.mxu1 %v8338_v39 }
 0x533   : > { %4049 = vmatprep.subr.bf16.mxu1 %v8344_v12 }
 0x535   : > { %3828 = vmatmul.mubr.bf16.vlgmr.msra.gmra.mrb[8].mxu1 %v3615_v18 }
 0x536   : > { %4050 = vmatpush1.bf16.msra.mxu1 %v8342_v14  ;;  %4081 = vmatprep.mubr.bf16.mxu1 %v9873_v48  ;;  %v8351_v48 = vld [vmem:[%s11084_s7 + $0x430] ss:$8 sps:$4 sm:$0xff]  }
 0x537   : > { %4051 = vmatprep.subr.bf16.mxu1 %v8347_v16 }
 0x53a   : > { %4052 = vmatpush1.bf16.msra.mxu1 %v8345_v37 }
 0x53b   : > { %4053 = vmatprep.subr.bf16.mxu1 %v8350_v17 }
 0x53e   : > { %4054 = vmatpush1.bf16.msra.mxu1 %v8348_v19 }
 0x53f   : > { %4055 = vmatprep.subr.bf16.mxu1 %v8353_v21 }
 0x542   : > { %4056 = vmatpush1.bf16.msra.mxu1 %v8351_v48 }
 0x543   : > { %4057 = vmatprep.subr.bf16.mxu1 %v8356_v22 }
 0x546   : > { %4058 = vmatpush1.bf16.msra.mxu1 %v8354_v23 }
 0x547   : > { %4059 = vmatprep.subr.bf16.mxu1 %v8359_v59 }
 0x54a   : > { %4060 = vmatpush1.bf16.msra.mxu1 %v8357_v24 }
 0x54b   : > { %4061 = vmatprep.subr.bf16.mxu1 %v8362_v57 }
 0x54e   : > { %4062 = vmatpush1.bf16.msra.mxu1 %v8360_v25 }
 0x54f   : > { %4063 = vmatprep.subr.bf16.mxu1 %v8365_v27 }
 0x552   : > { %4064 = vmatpush1.bf16.msra.mxu1 %v8363_v52 }
 0x553   : > { %4065 = vmatprep.subr.bf16.mxu1 %v8368_v28 }
 0x556   : > { %4066 = vmatpush1.bf16.msra.mxu1 %v8366_v29 }
 0x557   : > { %4067 = vmatprep.subr.bf16.mxu1 %v8371_v30 }
 0x55a   : > { %4068 = vmatpush1.bf16.msra.mxu1 %v8369_v33 }
 0x55b   : > { %4069 = vmatprep.subr.bf16.mxu1 %v8374_v3 }
 0x55e   : > { %4070 = vmatpush1.bf16.msra.mxu1 %v8372_v35 }
 0x55f   : > { %4071 = vmatprep.subr.bf16.mxu1 %v8377_v36 }
 0x562   : > { %4072 = vmatpush1.bf16.msra.mxu1 %v8375_v38 }
 0x563   : > { %4073 = vmatprep.subr.bf16.mxu1 %v8380_v31 }
 0x566   : > { %4074 = vmatpush1.bf16.msra.mxu1 %v8378_v40 }
 0x567   : > { %4075 = vmatprep.subr.bf16.mxu1 %v8383_v32 }
 0x56a   : > { %4076 = vmatpush1.bf16.msra.mxu1 %v8381_v41 }
 0x56b   : > { %4077 = vmatprep.subr.bf16.mxu1 %v8386_v43 }
 0x56e   : > { %4078 = vmatpush1.bf16.msra.mxu1 %v8384_v44 }
 0x56f   : > { %4079 = vmatprep.subr.bf16.mxu1 %v8389_v45 }
 0x572   : > { %4080 = vmatpush1.bf16.msra.mxu1 %v8387_v0 }
 0x575   : > { %4082 = vmatmul.mubr.bf16.vlgmr.msra.gmra.mrb[8].mxu1 %v9879_v49  ;;  %v8425_v49 = vld [vmem:[%s11086_s9 + $0x1b4] ss:$8 sps:$4 sm:$0xff]  }
 0x576   : > { %4437 = vmatprep.subr.bf16.mxu0 %v8425_v49 }
 0x577   : > { %4438 = vmatpush1.bf16.msra.mxu0 %v8423_v51 }
 0x578   : > { %4439 = vmatprep.subr.bf16.mxu0 %v8428_v26 }
 0x57b   : > { %4440 = vmatpush1.bf16.msra.mxu0 %v8426_v53 }
 0x57c   : > { %4441 = vmatprep.subr.bf16.mxu0 %v8431_v54 }
 0x57f   : > { %4442 = vmatpush1.bf16.msra.mxu0 %v8429_v20 }
 0x580   : > { %4443 = vmatprep.subr.bf16.mxu0 %v8434_v55 }
 0x583   : > { %4444 = vmatpush1.bf16.msra.mxu0 %v8432_v42 }
 0x584   : > { %4445 = vmatprep.subr.bf16.mxu0 %v8437_v60 }
 0x587   : > { %4446 = vmatpush1.bf16.msra.mxu0 %v8435_v61  ;;  %v8439_v61 = vld [vmem:[%s11086_s9] ss:$8 sps:$4 sm:$0xff]  }
 0x588   : > { %4631 = vmatprep.subr.bf16.mxu0 %v8441_v62 }
 0x648   : > { %v4083_v7 = vpop.f32.mrb[8].mxu1 }
 0x649   : > { %v4108_v8 = vadd.f32 %v4101_v5, %v4083_v7  ;;  %v4085_v9 = vpop.f32.mrb[9].mxu1 }
 0x64a   : > { %v4109_v10 = vadd.f32 %v4105_v6, %v4085_v9  ;;  %v4087_v39 = vpop.f32.mrb[10].mxu1 }
 0x64b   : > { %v4112_v2 = vmax.f32 %v4108_v8, 0.0  ;;  %v4110_v11 = vadd.f32 %v4101_v5, %v4087_v39  ;;  %v4089_v12 = vpop.f32.mrb[11].mxu1  ;;  %v8446_v8 = vld [vmem:[%s11086_s9 + $0x14] ss:$8 sps:$4 sm:$0xff]  }
 0x64c   : > { %v4113_v4 = vmax.f32 %v4109_v10, 0.0  ;;  %v4111_v13 = vadd.f32 %v4105_v6, %v4089_v12 }
 0x64d   : > { %v4114_v14 = vmax.f32 %v4110_v11, 0.0 }
 0x64e   : > { %v7505_v16 = vpack.c.bf16 %v4113_v4, %v4112_v2  ;;  %v4115_v18 = vmax.f32 %v4111_v13, 0.0  ;;  %v8444_v13 = vld [vmem:[%s11086_s9 + $0x10] ss:$8 sps:$4 sm:$0xff]  }
 0x650   : > { %v4126_v37 = vrot.slane %v7505_v16, 6  ;;  %v7506_v17 = vpack.c.bf16 %v4115_v18, %v4114_v14  ;;  %v8449_v14 = vld [vmem:[%s11086_s9 + $0x24] ss:$8 sps:$4 sm:$0xff]  }
 0x652   : > { %v4127_v19 = vrot.slane %v4126_v37, 4  ;;  %4134 = vst [vmem:[#allocation3] sm:$0xcc] %v4126_v37  ;;  %v4128_v21 = vrot.slane %v7506_v17, 6 }
 0x654   : > { %v4129_v48 = vsel %vm8952_vm4, %v4127_v19, %v4128_v21  ;;  %v4130_v22 = vrot.slane %v4128_v21, 4  ;;  %v8447_v19 = vld [vmem:[%s11086_s9 + $0x20] ss:$8 sps:$4 sm:$0xff]  }
 0x656   : > { %4136 = vst [vmem:[#allocation3 + $0x10] sm:$0x33] %v4130_v22 }
 0x659   : > { %v4137_v23 = vld [vmem:[#allocation3] sm:$0xee] }
 0x65a   : > { %v7105_v59 = vcombine.high %v4137_v23, %v4129_v48  ;;  %v10368_v24 = vcombine.low %v4137_v23, %v4129_v48  ;;  %v4674_v27 = vld [vmem:[#allocation3] sm:$0xcc] }
 0x65b   : > { %v10374_v38 = vcombine.high %v4674_v27, %v4129_v48  ;;  %v10376_v31 = vcombine.low %v4674_v27, %v4129_v48  ;;  %v5210_v53 = vld [vmem:[#allocation3] sm:$0x88] }
 0x65c   : > { %v4237_v57 = vshrl.u32 %v7105_v59, 16  ;;  %v4240_v25 = vshll.u32 %v7105_v59, 16  ;;  %v4220_v28 = vshrl.u32 %v10368_v24, 16  ;;  %v4223_v29 = vshll.u32 %v10368_v24, 16  ;;  %v8450_v23 = vld [vmem:[%s11086_s9 + $0x30] ss:$8 sps:$4 sm:$0xff]  }
 0x65d   : > { %v4172_v52 = vld [vmem:[#allocation3 + $0x10] sm:$0x33]  ;;  %v4716_v51 = vrot.slane %v10374_v38, 2  ;;  %v4713_v55 = vrot.slane %v10376_v31, 2  ;;  %v4466_v7 = vrot.slane %v7105_v59, 1  ;;  %v7339_v2 = vcombine.high %v5210_v53, %v4129_v48 }
 0x65e   : > { %v10372_v30 = vld [vmem:[#allocation3 + $0x10] sm:$0x11]  ;;  %v7107_v33 = vcombine.high %v4172_v52, %v4172_v52  ;;  %v7106_v3 = vcombine.low %v4172_v52, %v4172_v52  ;;  %v4239_v35 = vrot.slane %v4237_v57, 1  ;;  %v4242_v36 = vrot.slane %v4240_v25, 2  ;;  %v8458_v25 = vld [vmem:[%s11086_s9 + $0x54] ss:$8 sps:$4 sm:$0xff]  }
 0x65f   : > { %v7141_v43 = vcombine.high %v10372_v30, %v10372_v30  ;;  %v4222_v44 = vrot.slane %v4220_v28, 1  ;;  %v4225_v45 = vrot.slane %v4223_v29, 2  ;;  %v4928_v60 = vld [vmem:[#allocation3 + $0x10] sm:$0x77]  ;;  %v7338_v4 = vcombine.low %v5210_v53, %v4129_v48  ;;  %v8452_v48 = vld [vmem:[%s11086_s9 + $0x34] ss:$8 sps:$4 sm:$0xff]  }
 0x660   : > { %v4245_v40 = vshrl.u32 %v7107_v33, 16  ;;  %v4248_v32 = vshll.u32 %v7107_v33, 16  ;;  %v4228_v41 = vshrl.u32 %v7106_v3, 16  ;;  %v4231_v0 = vshll.u32 %v7106_v3, 16  ;;  %v8455_v59 = vld [vmem:[%s11086_s9 + $0x44] ss:$8 sps:$4 sm:$0xff]  }
 0x661   : > { %v4243_v50 = vor.u32 %v4242_v36, %v4239_v35  ;;  %v4717_v26 = vrot.slane %v7107_v33, 2  ;;  %v4467_v20 = vrot.slane %v7141_v43, 1  ;;  %v4714_v42 = vrot.slane %v7106_v3, 2  ;;  %v8453_v57 = vld [vmem:[%s11086_s9 + $0x40] ss:$8 sps:$4 sm:$0xff]  }
 0x662   : > { %v4247_v46 = vrot.slane %v4245_v40, 1  ;;  %v4250_v47 = vrot.slane %v4248_v32, 2  ;;  %v4230_v15 = vrot.slane %v4228_v41, 1  ;;  %v4233_v49 = vrot.slane %v4231_v0, 2  ;;  %v8456_v27 = vld [vmem:[%s11086_s9 + $0x50] ss:$8 sps:$4 sm:$0xff]  }
 0x663   : > { %v4226_v62 = vor.u32 %v4225_v45, %v4222_v44  ;;  %v10386_v5 = vsel %vm908_vm7, %v4716_v51, %v4717_v26  ;;  %v10393_v9 = vsel %vm908_vm7, %v4713_v55, %v4714_v42  ;;  %v10396_v39 = vcombine.high %v4928_v60, %v4928_v60  ;;  %v8461_v52 = vld [vmem:[%s11086_s9 + $0x64] ss:$8 sps:$4 sm:$0xff]   ;;  %v8459_v28 = vld [vmem:[%s11086_s9 + $0x60] ss:$8 sps:$4 sm:$0xff]   ;;  %v8464_v29 = vld [vmem:[%s11086_s9 + $0x74] ss:$8 sps:$4 sm:$0xff]  }
 0x664   : > { %v4251_v54 = vor.u32 %v4250_v47, %v4247_v46  ;;  %v4234_v63 = vor.u32 %v4233_v49, %v4230_v15  ;;  %v4468_v11 = vsel %vm759_vm6, %v4466_v7, %v4467_v20  ;;  %v10399_v12 = vcombine.low %v4928_v60, %v4928_v60  ;;  %v8462_v33 = vld [vmem:[%s11086_s9 + $0x70] ss:$8 sps:$4 sm:$0xff]   ;;  %v8467_v3 = vld [vmem:[%s11086_s9 + $0x84] ss:$8 sps:$4 sm:$0xff]   ;;  %v8465_v35 = vld [vmem:[%s11086_s9 + $0x80] ss:$8 sps:$4 sm:$0xff]  }
 0x665   : > { %v5252_v16 = vrot.slane %v7339_v2, 3  ;;  %v5253_v18 = vrot.slane %v10396_v39, 3  ;;  %v5249_v37 = vrot.slane %v7338_v4, 3  ;;  %v8470_v36 = vld [vmem:[%s11086_s9 + $0x94] ss:$8 sps:$4 sm:$0xff]   ;;  %v7140_v51 = vcombine.low %v10372_v30, %v10372_v30 }
 0x666   : > { %v4252_v6 = vsel %vm614_vm5, %v4243_v50, %v4251_v54  ;;  %v4235_v10 = vsel %vm614_vm5, %v4226_v62, %v4234_v63  ;;  %v5250_v17 = vrot.slane %v10399_v12, 3  ;;  %v8468_v40 = vld [vmem:[%s11086_s9 + $0x90] ss:$8 sps:$4 sm:$0xff]   ;;  %v8473_v32 = vld [vmem:[%s11086_s9 + $0xa4] ss:$8 sps:$4 sm:$0xff]   ;;  %v4463_v20 = vrot.slane %v10368_v24, 1 }
 0x667   : > { %4447 = vmatprep.mubr.bf16.mxu0 %v4252_v6  ;;  %v10413_v21 = vsel %vm1228_vm9, %v5252_v16, %v5253_v18  ;;  %v8471_v41 = vld [vmem:[%s11086_s9 + $0xa0] ss:$8 sps:$4 sm:$0xff]   ;;  %v8476_v43 = vld [vmem:[%s11086_s9 + $0xb4] ss:$8 sps:$4 sm:$0xff]   ;;  %v8474_v44 = vld [vmem:[%s11086_s9 + $0xb0] ss:$8 sps:$4 sm:$0xff]  }
 0x668   : > { %4448 = vmatmul.mubr.bf16.vlgmr.msra.gmra.mrb[4].mxu0 %v4235_v10  ;;  %v10419_v22 = vsel %vm1228_vm9, %v5249_v37, %v5250_v17  ;;  %v8479_v45 = vld [vmem:[%s11086_s9 + $0xc4] ss:$8 sps:$4 sm:$0xff]   ;;  %v8477_v0 = vld [vmem:[%s11086_s9 + $0xc0] ss:$8 sps:$4 sm:$0xff]   ;;  %v8482_v46 = vld [vmem:[%s11086_s9 + $0xd4] ss:$8 sps:$4 sm:$0xff]  }
 0x669   : > { %4632 = vmatpush1.bf16.msra.mxu0 %v8439_v61  ;;  %4663 = vmatprep.mubr.bf16.mxu0 %v4468_v11  ;;  %v8480_v47 = vld [vmem:[%s11086_s9 + $0xd0] ss:$8 sps:$4 sm:$0xff]   ;;  %v8485_v15 = vld [vmem:[%s11086_s9 + $0xe4] ss:$8 sps:$4 sm:$0xff]   ;;  %v8483_v50 = vld [vmem:[%s11086_s9 + $0xe0] ss:$8 sps:$4 sm:$0xff]  }
 0x66a   : > { %4633 = vmatprep.subr.bf16.mxu0 %v8446_v8  ;;  %v8488_v49 = vld [vmem:[%s11086_s9 + $0xf4] ss:$8 sps:$4 sm:$0xff]   ;;  %v8486_v26 = vld [vmem:[%s11086_s9 + $0xf0] ss:$8 sps:$4 sm:$0xff]   ;;  %v8492_v53 = vld [vmem:[%s11086_s9 + $0x204] ss:$8 sps:$4 sm:$0xff]  }
 0x66b   : > { %v4464_v54 = vrot.slane %v7140_v51, 1  ;;  %v8490_v55 = vld [vmem:[%s11086_s9 + $0x200] ss:$8 sps:$4 sm:$0xff]   ;;  %v8495_v30 = vld [vmem:[%s11086_s9 + $0x214] ss:$8 sps:$4 sm:$0xff]  }
 0x66c   : > { %v8493_v60 = vld [vmem:[%s11086_s9 + $0x210] ss:$8 sps:$4 sm:$0xff]   ;;  %v8498_v24 = vld [vmem:[%s11086_s9 + $0x224] ss:$8 sps:$4 sm:$0xff]   ;;  %v8496_v61 = vld [vmem:[%s11086_s9 + $0x220] ss:$8 sps:$4 sm:$0xff]  }
 0x66d   : > { %4634 = vmatpush1.bf16.msra.mxu0 %v8444_v13  ;;  %v4465_v42 = vsel %vm759_vm6, %v4463_v20, %v4464_v54  ;;  %v8501_v62 = vld [vmem:[%s11086_s9 + $0x234] ss:$8 sps:$4 sm:$0xff]   ;;  %v8499_v63 = vld [vmem:[%s11086_s9 + $0x230] ss:$8 sps:$4 sm:$0xff]   ;;  %v8502_v6 = vld [vmem:[%s11086_s9 + $0x240] ss:$8 sps:$4 sm:$0xff]  }
 0x66e   : > { %4635 = vmatprep.subr.bf16.mxu0 %v8449_v14  ;;  %v8507_v7 = vld [vmem:[%s11086_s9 + $0x254] ss:$8 sps:$4 sm:$0xff]   ;;  %v8505_v8 = vld [vmem:[%s11086_s9 + $0x250] ss:$8 sps:$4 sm:$0xff]   ;;  %v8510_v10 = vld [vmem:[%s11086_s9 + $0x264] ss:$8 sps:$4 sm:$0xff]  }
 0x66f   : > { %v8508_v2 = vld [vmem:[%s11086_s9 + $0x260] ss:$8 sps:$4 sm:$0xff]   ;;  %v8513_v11 = vld [vmem:[%s11086_s9 + $0x274] ss:$8 sps:$4 sm:$0xff]   ;;  %v8511_v4 = vld [vmem:[%s11086_s9 + $0x270] ss:$8 sps:$4 sm:$0xff]  }
 0x670   : > { %v8516_v13 = vld [vmem:[%s11086_s9 + $0x284] ss:$8 sps:$4 sm:$0xff]   ;;  %v8514_v14 = vld [vmem:[%s11086_s9 + $0x280] ss:$8 sps:$4 sm:$0xff]   ;;  %v8519_v16 = vld [vmem:[%s11086_s9 + $0x294] ss:$8 sps:$4 sm:$0xff]  }
 0x671   : > { %4636 = vmatpush1.bf16.msra.mxu0 %v8447_v19  ;;  %v8517_v18 = vld [vmem:[%s11086_s9 + $0x290] ss:$8 sps:$4 sm:$0xff]   ;;  %v8522_v37 = vld [vmem:[%s11086_s9 + $0x2a4] ss:$8 sps:$4 sm:$0xff]   ;;  %v8520_v17 = vld [vmem:[%s11086_s9 + $0x2a0] ss:$8 sps:$4 sm:$0xff]  }
 0x672   : > { %4637 = vmatprep.subr.bf16.mxu0 %v8452_v48  ;;  %v8525_v19 = vld [vmem:[%s11086_s9 + $0x2b4] ss:$8 sps:$4 sm:$0xff]   ;;  %v8523_v48 = vld [vmem:[%s11086_s9 + $0x2b0] ss:$8 sps:$4 sm:$0xff]   ;;  %v8545_v51 = vld [vmem:[%s11086_s9 + $0x320] ss:$8 sps:$4 sm:$0xff]  }
 0x673   : > { %v8553_v54 = vld [vmem:[%s11086_s9 + $0x344] ss:$8 sps:$4 sm:$0xff]   ;;  %v8551_v20 = vld [vmem:[%s11086_s9 + $0x340] ss:$8 sps:$4 sm:$0xff]  }
 0x675   : > { %4638 = vmatpush1.bf16.msra.mxu0 %v8450_v23  ;;  %v8528_v23 = vld [vmem:[%s11086_s9 + $0x2c4] ss:$8 sps:$4 sm:$0xff]  }
 0x676   : > { %4639 = vmatprep.subr.bf16.mxu0 %v8455_v59  ;;  %v8526_v59 = vld [vmem:[%s11086_s9 + $0x2c0] ss:$8 sps:$4 sm:$0xff]  }
 0x679   : > { %4640 = vmatpush1.bf16.msra.mxu0 %v8453_v57  ;;  %v8531_v57 = vld [vmem:[%s11086_s9 + $0x2d4] ss:$8 sps:$4 sm:$0xff]  }
 0x67a   : > { %4641 = vmatprep.subr.bf16.mxu0 %v8458_v25  ;;  %v8529_v25 = vld [vmem:[%s11086_s9 + $0x2d0] ss:$8 sps:$4 sm:$0xff]  }
 0x67d   : > { %4642 = vmatpush1.bf16.msra.mxu0 %v8456_v27  ;;  %v8534_v27 = vld [vmem:[%s11086_s9 + $0x2e4] ss:$8 sps:$4 sm:$0xff]  }
 0x67e   : > { %4643 = vmatprep.subr.bf16.mxu0 %v8461_v52  ;;  %v4993_v52 = vshrl.u32 %v10396_v39, 16 }
 0x681   : > { %4644 = vmatpush1.bf16.msra.mxu0 %v8459_v28  ;;  %v4996_v28 = vshll.u32 %v10396_v39, 16  ;;  %v8535_v39 = vld [vmem:[%s11086_s9 + $0x2f0] ss:$8 sps:$4 sm:$0xff]  }
 0x682   : > { %4645 = vmatprep.subr.bf16.mxu0 %v8464_v29  ;;  %v8532_v29 = vld [vmem:[%s11086_s9 + $0x2e0] ss:$8 sps:$4 sm:$0xff]  }
 0x685   : > { %4646 = vmatpush1.bf16.msra.mxu0 %v8462_v33  ;;  %v8537_v33 = vld [vmem:[%s11086_s9 + $0x2f4] ss:$8 sps:$4 sm:$0xff]  }
 0x686   : > { %4647 = vmatprep.subr.bf16.mxu0 %v8467_v3  ;;  %v4985_v3 = vshrl.u32 %v10374_v38, 16 }
 0x689   : > { %4648 = vmatpush1.bf16.msra.mxu0 %v8465_v35  ;;  %v4988_v35 = vshll.u32 %v10374_v38, 16  ;;  %v8538_v38 = vld [vmem:[%s11086_s9 + $0x300] ss:$8 sps:$4 sm:$0xff]  }
 0x68a   : > { %4649 = vmatprep.subr.bf16.mxu0 %v8470_v36  ;;  %v4995_v36 = vrot.slane %v4993_v52, 2  ;;  %v8590_v52 = vld [vmem:[%s11086_s9 + $0x404] ss:$8 sps:$4 sm:$0xff]  }
 0x68d   : > { %4650 = vmatpush1.bf16.msra.mxu0 %v8468_v40  ;;  %v4998_v40 = vrot.slane %v4996_v28, 3 }
 0x68e   : > { %4651 = vmatprep.subr.bf16.mxu0 %v8473_v32  ;;  %v8540_v32 = vld [vmem:[%s11086_s9 + $0x304] ss:$8 sps:$4 sm:$0xff]  }
 0x691   : > { %4652 = vmatpush1.bf16.msra.mxu0 %v8471_v41  ;;  %v4987_v41 = vrot.slane %v4985_v3, 2 }
 0x692   : > { %4653 = vmatprep.subr.bf16.mxu0 %v8476_v43  ;;  %v4990_v43 = vrot.slane %v4988_v35, 3  ;;  %v8591_v35 = vld [vmem:[%s11086_s9 + $0x410] ss:$8 sps:$4 sm:$0xff]  }
 0x695   : > { %4654 = vmatpush1.bf16.msra.mxu0 %v8474_v44  ;;  %v4999_v44 = vor.u32 %v4998_v40, %v4995_v36  ;;  %v8596_v36 = vld [vmem:[%s11086_s9 + $0x424] ss:$8 sps:$4 sm:$0xff]   ;;  %v8594_v40 = vld [vmem:[%s11086_s9 + $0x420] ss:$8 sps:$4 sm:$0xff]  }
 0x696   : > { %4655 = vmatprep.subr.bf16.mxu0 %v8479_v45  ;;  %v4991_v45 = vor.u32 %v4990_v43, %v4987_v41  ;;  %v8600_v41 = vld [vmem:[%s11086_s9 + $0x440] ss:$8 sps:$4 sm:$0xff]   ;;  %v8605_v43 = vld [vmem:[%s11086_s9 + $0x454] ss:$8 sps:$4 sm:$0xff]  }
 0x699   : > { %4656 = vmatpush1.bf16.msra.mxu0 %v8477_v0  ;;  %v8544_v0 = vld [vmem:[%s11086_s9 + $0x314] ss:$8 sps:$4 sm:$0xff]  }
 0x69a   : > { %4657 = vmatprep.subr.bf16.mxu0 %v8482_v46  ;;  %v5000_v46 = vsel %vm1061_vm8, %v4991_v45, %v4999_v44  ;;  %v8603_v44 = vld [vmem:[%s11086_s9 + $0x450] ss:$8 sps:$4 sm:$0xff]   ;;  %v8606_v45 = vld [vmem:[%s11086_s9 + $0x460] ss:$8 sps:$4 sm:$0xff]  }
 0x69d   : > { %4658 = vmatpush1.bf16.msra.mxu0 %v8480_v47  ;;  %v8636_v47 = vld [vmem:[%s11088_s11 + $0xc0] sm:$0xff]  }
 0x69e   : > { %4659 = vmatprep.subr.bf16.mxu0 %v8485_v15  ;;  %v8637_v15 = vld [vmem:[%s11088_s11 + $0x80] sm:$0xff]   ;;  %7512 = vmatprep.subr.bf16.mxu1 %v8636_v47 }
 0x69f   : > { %7513 = vmatpush3.bf16.msra.mxu1 %v8637_v15  ;;  %v8614_v47 = vld [vmem:[%s11086_s9 + $0x484] ss:$8 sps:$4 sm:$0xff]   ;;  %v8612_v15 = vld [vmem:[%s11086_s9 + $0x480] ss:$8 sps:$4 sm:$0xff]  }
 0x6a1   : > { %4660 = vmatpush1.bf16.msra.mxu0 %v8483_v50  ;;  %v8638_v50 = vld [vmem:[%s11088_s11 + $0xc8] sm:$0xff]  }
 0x6a2   : > { %4661 = vmatprep.subr.bf16.mxu0 %v8488_v49  ;;  %v8547_v49 = vld [vmem:[%s11086_s9 + $0x324] ss:$8 sps:$4 sm:$0xff]   ;;  %7514 = vmatprep.subr.bf16.mxu1 %v8638_v50  ;;  %v8617_v50 = vld [vmem:[%s11086_s9 + $0x494] ss:$8 sps:$4 sm:$0xff]  }
 0x6a5   : > { %4662 = vmatpush1.bf16.msra.mxu0 %v8486_v26  ;;  %v8550_v26 = vld [vmem:[%s11086_s9 + $0x334] ss:$8 sps:$4 sm:$0xff]  }
 0x6a6   : > { %4881 = vmatprep.subr.bf16.mxu0 %v8492_v53  ;;  %v8548_v53 = vld [vmem:[%s11086_s9 + $0x330] ss:$8 sps:$4 sm:$0xff]  }
 0x6a8   : > { %4664 = vmatmul.mubr.bf16.vlgmr.msra.gmra.mrb[4].mxu0 %v4465_v42  ;;  %v8559_v42 = vld [vmem:[%s11086_s9 + $0x364] ss:$8 sps:$4 sm:$0xff]  }
 0x6a9   : > { %4882 = vmatpush1.bf16.msra.mxu0 %v8490_v55  ;;  %4913 = vmatprep.mubr.bf16.mxu0 %v10386_v5  ;;  %v8504_v5 = vld [vmem:[%s11086_s9 + $0x244] ss:$8 sps:$4 sm:$0xff]   ;;  %v8556_v55 = vld [vmem:[%s11086_s9 + $0x354] ss:$8 sps:$4 sm:$0xff]  }
 0x6aa   : > { %4883 = vmatprep.subr.bf16.mxu0 %v8495_v30  ;;  %v8554_v30 = vld [vmem:[%s11086_s9 + $0x350] ss:$8 sps:$4 sm:$0xff]  }
 0x6ad   : > { %4884 = vmatpush1.bf16.msra.mxu0 %v8493_v60  ;;  %v8557_v60 = vld [vmem:[%s11086_s9 + $0x360] ss:$8 sps:$4 sm:$0xff]  }
 0x6ae   : > { %4885 = vmatprep.subr.bf16.mxu0 %v8498_v24  ;;  %v8562_v24 = vld [vmem:[%s11086_s9 + $0x374] ss:$8 sps:$4 sm:$0xff]  }
 0x6b1   : > { %4886 = vmatpush1.bf16.msra.mxu0 %v8496_v61  ;;  %v8560_v61 = vld [vmem:[%s11086_s9 + $0x370] ss:$8 sps:$4 sm:$0xff]  }
 0x6b2   : > { %4887 = vmatprep.subr.bf16.mxu0 %v8501_v62  ;;  %v8565_v62 = vld [vmem:[%s11086_s9 + $0x384] ss:$8 sps:$4 sm:$0xff]  }
 0x6b5   : > { %4888 = vmatpush1.bf16.msra.mxu0 %v8499_v63  ;;  %v8563_v63 = vld [vmem:[%s11086_s9 + $0x380] ss:$8 sps:$4 sm:$0xff]  }
 0x6b6   : > { %4889 = vmatprep.subr.bf16.mxu0 %v8504_v5  ;;  %v8568_v5 = vld [vmem:[%s11086_s9 + $0x394] ss:$8 sps:$4 sm:$0xff]  }
 0x6b9   : > { %4890 = vmatpush1.bf16.msra.mxu0 %v8502_v6  ;;  %v8566_v6 = vld [vmem:[%s11086_s9 + $0x390] ss:$8 sps:$4 sm:$0xff]  }
 0x6ba   : > { %4891 = vmatprep.subr.bf16.mxu0 %v8507_v7  ;;  %v8571_v7 = vld [vmem:[%s11086_s9 + $0x3a4] ss:$8 sps:$4 sm:$0xff]  }
 0x6bd   : > { %4892 = vmatpush1.bf16.msra.mxu0 %v8505_v8  ;;  %v8569_v8 = vld [vmem:[%s11086_s9 + $0x3a0] ss:$8 sps:$4 sm:$0xff]  }
 0x6be   : > { %4893 = vmatprep.subr.bf16.mxu0 %v8510_v10  ;;  %v8574_v10 = vld [vmem:[%s11086_s9 + $0x3b4] ss:$8 sps:$4 sm:$0xff]  }
 0x6c1   : > { %4894 = vmatpush1.bf16.msra.mxu0 %v8508_v2  ;;  %v8572_v2 = vld [vmem:[%s11086_s9 + $0x3b0] ss:$8 sps:$4 sm:$0xff]  }
 0x6c2   : > { %4895 = vmatprep.subr.bf16.mxu0 %v8513_v11  ;;  %v8577_v11 = vld [vmem:[%s11086_s9 + $0x3c4] ss:$8 sps:$4 sm:$0xff]  }
 0x6c5   : > { %4896 = vmatpush1.bf16.msra.mxu0 %v8511_v4  ;;  %v8575_v4 = vld [vmem:[%s11086_s9 + $0x3c0] ss:$8 sps:$4 sm:$0xff]  }
 0x6c6   : > { %4897 = vmatprep.subr.bf16.mxu0 %v8516_v13  ;;  %v8580_v13 = vld [vmem:[%s11086_s9 + $0x3d4] ss:$8 sps:$4 sm:$0xff]  }
 0x6c9   : > { %4898 = vmatpush1.bf16.msra.mxu0 %v8514_v14  ;;  %v8578_v14 = vld [vmem:[%s11086_s9 + $0x3d0] ss:$8 sps:$4 sm:$0xff]  }
 0x6ca   : > { %4899 = vmatprep.subr.bf16.mxu0 %v8519_v16  ;;  %v8583_v16 = vld [vmem:[%s11086_s9 + $0x3e4] ss:$8 sps:$4 sm:$0xff]  }
 0x6cd   : > { %4900 = vmatpush1.bf16.msra.mxu0 %v8517_v18  ;;  %v4976_v18 = vshrl.u32 %v10399_v12, 16 }
 0x6ce   : > { %4901 = vmatprep.subr.bf16.mxu0 %v8522_v37  ;;  %v4979_v37 = vshll.u32 %v10399_v12, 16  ;;  %v8584_v12 = vld [vmem:[%s11086_s9 + $0x3f0] ss:$8 sps:$4 sm:$0xff]  }
 0x6d1   : > { %4902 = vmatpush1.bf16.msra.mxu0 %v8520_v17  ;;  %v8581_v17 = vld [vmem:[%s11086_s9 + $0x3e0] ss:$8 sps:$4 sm:$0xff]  }
 0x6d2   : > { %4903 = vmatprep.subr.bf16.mxu0 %v8525_v19  ;;  %v4968_v19 = vshrl.u32 %v10376_v31, 16 }
 0x6d5   : > { %4904 = vmatpush1.bf16.msra.mxu0 %v8523_v48  ;;  %v4971_v48 = vshll.u32 %v10376_v31, 16 }
 0x6d6   : > { %4905 = vmatprep.subr.bf16.mxu0 %v8528_v23  ;;  %v8586_v23 = vld [vmem:[%s11086_s9 + $0x3f4] ss:$8 sps:$4 sm:$0xff]  }
 0x6d9   : > { %4906 = vmatpush1.bf16.msra.mxu0 %v8526_v59  ;;  %v4978_v59 = vrot.slane %v4976_v18, 2  ;;  %v5464_v18 = vld [vmem:[%s11087_s10] sm:$0x3] }
 0x6da   : > { %4907 = vmatprep.subr.bf16.mxu0 %v8531_v57  ;;  %v4981_v57 = vrot.slane %v4979_v37, 3  ;;  %v5469_v37 = vrot.slane %v5464_v18, %v9277_v56 }
 0x6dc   : > { %v4982_v31 = vor.u32 %v4981_v57, %v4978_v59 }
 0x6dd   : > { %4908 = vmatpush1.bf16.msra.mxu0 %v8529_v25  ;;  %v4970_v25 = vrot.slane %v4968_v19, 2 }
 0x6de   : > { %4909 = vmatprep.subr.bf16.mxu0 %v8534_v27  ;;  %v4973_v27 = vrot.slane %v4971_v48, 3 }
 0x6e0   : > { %v4974_v28 = vor.u32 %v4973_v27, %v4970_v25 }
 0x6e1   : > { %4910 = vmatpush1.bf16.msra.mxu0 %v8532_v29  ;;  %v8588_v29 = vld [vmem:[%s11086_s9 + $0x400] ss:$8 sps:$4 sm:$0xff]  }
 0x6e2   : > { %4911 = vmatprep.subr.bf16.mxu0 %v8537_v33  ;;  %v8593_v33 = vld [vmem:[%s11086_s9 + $0x414] ss:$8 sps:$4 sm:$0xff]   ;;  %v4983_v3 = vsel %vm1061_vm8, %v4974_v28, %v4982_v31 }
 0x6e5   : > { %4912 = vmatpush1.bf16.msra.mxu0 %v8535_v39  ;;  %v8599_v39 = vld [vmem:[%s11086_s9 + $0x434] ss:$8 sps:$4 sm:$0xff]  }
 0x6e6   : > { %5163 = vmatprep.subr.bf16.mxu0 %v8540_v32  ;;  %v8602_v32 = vld [vmem:[%s11086_s9 + $0x444] ss:$8 sps:$4 sm:$0xff]  }
 0x6e8   : > { %4914 = vmatmul.mubr.bf16.vlgmr.msra.gmra.mrb[4].mxu0 %v10393_v9  ;;  %v8542_v9 = vld [vmem:[%s11086_s9 + $0x310] ss:$8 sps:$4 sm:$0xff]  }
 0x6e9   : > { %5164 = vmatpush1.bf16.msra.mxu0 %v8538_v38  ;;  %5195 = vmatprep.mubr.bf16.mxu0 %v5000_v46  ;;  %v8608_v38 = vld [vmem:[%s11086_s9 + $0x464] ss:$8 sps:$4 sm:$0xff]   ;;  %v8609_v46 = vld [vmem:[%s11086_s9 + $0x470] ss:$8 sps:$4 sm:$0xff]  }
 0x6ea   : > { %5165 = vmatprep.subr.bf16.mxu0 %v8544_v0  ;;  %v8611_v0 = vld [vmem:[%s11086_s9 + $0x474] ss:$8 sps:$4 sm:$0xff]  }
 0x6ed   : > { %5166 = vmatpush1.bf16.msra.mxu0 %v8542_v9  ;;  %v8615_v9 = vld [vmem:[%s11086_s9 + $0x490] ss:$8 sps:$4 sm:$0xff]  }
 0x6ee   : > { %5167 = vmatprep.subr.bf16.mxu0 %v8547_v49  ;;  %v8620_v49 = vld [vmem:[%s11086_s9 + $0x4a4] ss:$8 sps:$4 sm:$0xff]  }
 0x6f1   : > { %5168 = vmatpush1.bf16.msra.mxu0 %v8545_v51  ;;  %v8618_v51 = vld [vmem:[%s11086_s9 + $0x4a0] ss:$8 sps:$4 sm:$0xff]  }
 0x6f2   : > { %5169 = vmatprep.subr.bf16.mxu0 %v8550_v26  ;;  %v8623_v26 = vld [vmem:[%s11086_s9 + $0x4b4] ss:$8 sps:$4 sm:$0xff]  }
 0x6f5   : > { %5170 = vmatpush1.bf16.msra.mxu0 %v8548_v53  ;;  %v8621_v53 = vld [vmem:[%s11086_s9 + $0x4b0] ss:$8 sps:$4 sm:$0xff]  }
 0x6f6   : > { %5171 = vmatprep.subr.bf16.mxu0 %v8553_v54  ;;  %v8626_v54 = vld [vmem:[%s11086_s9 + $0x4c4] ss:$8 sps:$4 sm:$0xff]  }
 0x6f9   : > { %5172 = vmatpush1.bf16.msra.mxu0 %v8551_v20  ;;  %v8624_v20 = vld [vmem:[%s11086_s9 + $0x4c0] ss:$8 sps:$4 sm:$0xff]  }
 0x6fa   : > { %5173 = vmatprep.subr.bf16.mxu0 %v8556_v55  ;;  %v8629_v55 = vld [vmem:[%s11086_s9 + $0x4d4] ss:$8 sps:$4 sm:$0xff]  }
 0x6fd   : > { %5174 = vmatpush1.bf16.msra.mxu0 %v8554_v30  ;;  %v8627_v30 = vld [vmem:[%s11086_s9 + $0x4d0] ss:$8 sps:$4 sm:$0xff]  }
 0x6fe   : > { %5175 = vmatprep.subr.bf16.mxu0 %v8559_v42  ;;  %v8632_v42 = vld [vmem:[%s11086_s9 + $0x4e4] ss:$8 sps:$4 sm:$0xff]  }
 0x701   : > { %5176 = vmatpush1.bf16.msra.mxu0 %v8557_v60  ;;  %v8630_v60 = vld [vmem:[%s11086_s9 + $0x4e0] ss:$8 sps:$4 sm:$0xff]  }
 0x702   : > { %5177 = vmatprep.subr.bf16.mxu0 %v8562_v24  ;;  %v8635_v24 = vld [vmem:[%s11086_s9 + $0x4f4] ss:$8 sps:$4 sm:$0xff]  }
 0x705   : > { %5178 = vmatpush1.bf16.msra.mxu0 %v8560_v61  ;;  %v8633_v61 = vld [vmem:[%s11086_s9 + $0x4f0] ss:$8 sps:$4 sm:$0xff]  }
 0x706   : > { %5179 = vmatprep.subr.bf16.mxu0 %v8565_v62  ;;  %v8639_v62 = vld [vmem:[%s11088_s11 + $0x88] sm:$0xff]  }
 0x707   : > { %7515 = vmatpush3.bf16.msra.mxu1 %v8639_v62  ;;  %v8658_v62 = vld [vmem:[%s11088_s11 + $0x50] sm:$0xff]  }
 0x709   : > { %5180 = vmatpush1.bf16.msra.mxu0 %v8563_v63  ;;  %v8640_v63 = vld [vmem:[%s11088_s11 + $0xd0] sm:$0xff]  }
 0x70a   : > { %5181 = vmatprep.subr.bf16.mxu0 %v8568_v5  ;;  %v8641_v5 = vld [vmem:[%s11088_s11 + $0x90] sm:$0xff]   ;;  %7516 = vmatprep.subr.bf16.mxu1 %v8640_v63 }
 0x70b   : > { %7517 = vmatpush3.bf16.msra.mxu1 %v8641_v5  ;;  %v8659_v5 = vld [vmem:[%s11088_s11 + $0x10] sm:$0xff]  }
 0x70d   : > { %5182 = vmatpush1.bf16.msra.mxu0 %v8566_v6  ;;  %v8642_v6 = vld [vmem:[%s11088_s11 + $0xd8] sm:$0xff]  }
 0x70e   : > { %5183 = vmatprep.subr.bf16.mxu0 %v8571_v7  ;;  %7518 = vmatprep.subr.bf16.mxu1 %v8642_v6  ;;  %v8644_v7 = vld [vmem:[%s11088_s11 + $0xe0] sm:$0xff]   ;;  %v8660_v6 = vld [vmem:[%s11088_s11 + $0x58] sm:$0xff]  }
 0x711   : > { %5184 = vmatpush1.bf16.msra.mxu0 %v8569_v8  ;;  %v8645_v8 = vld [vmem:[%s11088_s11 + $0xa0] sm:$0xff]  }
 0x712   : > { %5185 = vmatprep.subr.bf16.mxu0 %v8574_v10  ;;  %v8646_v10 = vld [vmem:[%s11088_s11 + $0xe8] sm:$0xff]  }
 0x715   : > { %5186 = vmatpush1.bf16.msra.mxu0 %v8572_v2  ;;  %v8647_v2 = vld [vmem:[%s11088_s11 + $0xa8] sm:$0xff]  }
 0x716   : > { %5187 = vmatprep.subr.bf16.mxu0 %v8577_v11  ;;  %v8648_v11 = vld [vmem:[%s11088_s11 + $0xf0] sm:$0xff]  }
 0x719   : > { %5188 = vmatpush1.bf16.msra.mxu0 %v8575_v4  ;;  %v8649_v4 = vld [vmem:[%s11088_s11 + $0xb0] sm:$0xff]  }
 0x71a   : > { %5189 = vmatprep.subr.bf16.mxu0 %v8580_v13  ;;  %v8650_v13 = vld [vmem:[%s11088_s11 + $0xf8] sm:$0xff]  }
 0x71d   : > { %5190 = vmatpush1.bf16.msra.mxu0 %v8578_v14  ;;  %v8651_v14 = vld [vmem:[%s11088_s11 + $0xb8] sm:$0xff]  }
 0x71e   : > { %5191 = vmatprep.subr.bf16.mxu0 %v8583_v16  ;;  %v8653_v16 = vld [vmem:[%s11088_s11 + $0x40] sm:$0xff]  }
 0x721   : > { %5192 = vmatpush1.bf16.msra.mxu0 %v8581_v17  ;;  %v5473_v17 = vrot.slane %v5464_v18, %v9282_v58 }
 0x722   : > { %5193 = vmatprep.subr.bf16.mxu0 %v8586_v23 }
 0x725   : > { %5194 = vmatpush1.bf16.msra.mxu0 %v8584_v12 }
 0x726   : > { %5417 = vmatprep.subr.bf16.mxu0 %v8590_v52 }
 0x728   : > { %5196 = vmatmul.mubr.bf16.vlgmr.msra.gmra.mrb[4].mxu0 %v4983_v3 }
 0x729   : > { %5418 = vmatpush1.bf16.msra.mxu0 %v8588_v29  ;;  %5449 = vmatprep.mubr.bf16.mxu0 %v10413_v21  ;;  %v8597_v21 = vld [vmem:[%s11086_s9 + $0x430] ss:$8 sps:$4 sm:$0xff]  }
 0x72a   : > { %5419 = vmatprep.subr.bf16.mxu0 %v8593_v33 }
 0x72d   : > { %5420 = vmatpush1.bf16.msra.mxu0 %v8591_v35 }
 0x72e   : > { %5421 = vmatprep.subr.bf16.mxu0 %v8596_v36 }
 0x731   : > { %5422 = vmatpush1.bf16.msra.mxu0 %v8594_v40 }
 0x732   : > { %5423 = vmatprep.subr.bf16.mxu0 %v8599_v39 }
 0x735   : > { %5424 = vmatpush1.bf16.msra.mxu0 %v8597_v21 }
 0x736   : > { %5425 = vmatprep.subr.bf16.mxu0 %v8602_v32 }
 0x739   : > { %5426 = vmatpush1.bf16.msra.mxu0 %v8600_v41 }
 0x73a   : > { %5427 = vmatprep.subr.bf16.mxu0 %v8605_v43 }
 0x73d   : > { %5428 = vmatpush1.bf16.msra.mxu0 %v8603_v44 }
 0x73e   : > { %5429 = vmatprep.subr.bf16.mxu0 %v8608_v38 }
 0x741   : > { %5430 = vmatpush1.bf16.msra.mxu0 %v8606_v45 }
 0x742   : > { %5431 = vmatprep.subr.bf16.mxu0 %v8611_v0 }
 0x745   : > { %5432 = vmatpush1.bf16.msra.mxu0 %v8609_v46 }
 0x746   : > { %5433 = vmatprep.subr.bf16.mxu0 %v8614_v47 }
 0x749   : > { %5434 = vmatpush1.bf16.msra.mxu0 %v8612_v15 }
 0x74a   : > { %5435 = vmatprep.subr.bf16.mxu0 %v8617_v50 }
 0x74d   : > { %5436 = vmatpush1.bf16.msra.mxu0 %v8615_v9 }
 0x74e   : > { %5437 = vmatprep.subr.bf16.mxu0 %v8620_v49  ;;  %v8655_v49 = vld [vmem:[%s11088_s11] sm:$0xff]  }
 0x751   : > { %5438 = vmatpush1.bf16.msra.mxu0 %v8618_v51 }
 0x752   : > { %5439 = vmatprep.subr.bf16.mxu0 %v8623_v26 }
 0x755   : > { %5440 = vmatpush1.bf16.msra.mxu0 %v8621_v53 }
 0x756   : > { %5441 = vmatprep.subr.bf16.mxu0 %v8626_v54 }
 0x759   : > { %5442 = vmatpush1.bf16.msra.mxu0 %v8624_v20 }
 0x75a   : > { %5443 = vmatprep.subr.bf16.mxu0 %v8629_v55  ;;  %v8656_v55 = vld [vmem:[%s11088_s11 + $0x48] sm:$0xff]  }
 0x75d   : > { %5444 = vmatpush1.bf16.msra.mxu0 %v8627_v30 }
 0x75e   : > { %5445 = vmatprep.subr.bf16.mxu0 %v8632_v42 }
 0x761   : > { %5446 = vmatpush1.bf16.msra.mxu0 %v8630_v60 }
 0x762   : > { %5447 = vmatprep.subr.bf16.mxu0 %v8635_v24 }
 0x765   : > { %5448 = vmatpush1.bf16.msra.mxu0 %v8633_v61  ;;  %v8657_v61 = vld [vmem:[%s11088_s11 + $0x8] sm:$0xff]  }
 0x768   : > { %5450 = vmatmul.mubr.bf16.vlgmr.msra.gmra.mrb[4].mxu0 %v10419_v22  ;;  %v8643_v22 = vld [vmem:[%s11088_s11 + $0x98] sm:$0xff]  }
 0x769   : > { %7519 = vmatpush3.bf16.msra.mxu1 %v8643_v22  ;;  %v8661_v22 = vld [vmem:[%s11088_s11 + $0x18] sm:$0xff]  }
 0x76a   : > { %7520 = vmatprep.subr.bf16.mxu1 %v8644_v7  ;;  %v8662_v7 = vld [vmem:[%s11088_s11 + $0x60] sm:$0xff]  }
 0x76d   : > { %7521 = vmatpush3.bf16.msra.mxu1 %v8645_v8  ;;  %v8663_v8 = vld [vmem:[%s11088_s11 + $0x20] sm:$0xff]  }
 0x76e   : > { %7522 = vmatprep.subr.bf16.mxu1 %v8646_v10 }
 0x771   : > { %7523 = vmatpush3.bf16.msra.mxu1 %v8647_v2  ;;  %v8664_v2 = vld [vmem:[%s11088_s11 + $0x68] sm:$0xff]  }
 0x772   : > { %7524 = vmatprep.subr.bf16.mxu1 %v8648_v11 }
 0x775   : > { %7525 = vmatpush3.bf16.msra.mxu1 %v8649_v4  ;;  %v8665_v4 = vld [vmem:[%s11088_s11 + $0x28] sm:$0xff]  }
 0x776   : > { %7526 = vmatprep.subr.bf16.mxu1 %v8650_v13 }
 0x779   : > { %7527 = vmatpush3.bf16.msra.mxu1 %v8651_v14  ;;  %v8666_v14 = vld [vmem:[%s11088_s11 + $0x70] sm:$0xff]  }
 0x77a   : > { %7534 = vmatprep.subr.bf16.mxu1 %v8653_v16 }
 0x83b   : > { %v5451_v19 = vpop.f32.mrb[4].mxu0 }
 0x83c   : > { %v5476_v48 = vadd.f32 %v5469_v37, %v5451_v19  ;;  %v5453_v23 = vpop.f32.mrb[5].mxu0  ;;  %v8667_v19 = vld [vmem:[%s11088_s11 + $0x30] sm:$0xff]  }
 0x83d   : > { %v5477_v59 = vadd.f32 %v5473_v17, %v5453_v23  ;;  %v5455_v57 = vpop.f32.mrb[6].mxu0 }
 0x83e   : > { %v5480_v12 = vmax.f32 %v5476_v48, 0.0  ;;  %v5478_v25 = vadd.f32 %v5469_v37, %v5455_v57  ;;  %v5457_v27 = vpop.f32.mrb[7].mxu0 }
 0x83f   : > { %v5481_v52 = vmax.f32 %v5477_v59, 0.0  ;;  %v5479_v31 = vadd.f32 %v5473_v17, %v5457_v27  ;;  %v8668_v59 = vld [vmem:[%s11088_s11 + $0x78] sm:$0xff]  }
 0x840   : > { %v5482_v28 = vmax.f32 %v5478_v25, 0.0 }
 0x841   : > { %v7507_v29 = vpack.c.bf16 %v5481_v52, %v5480_v12  ;;  %v5483_v33 = vmax.f32 %v5479_v31, 0.0 }
 0x843   : > { %v5494_v3 = vrot.slane %v7507_v29, 6  ;;  %v7508_v35 = vpack.c.bf16 %v5483_v33, %v5482_v28  ;;  %v8669_v28 = vld [vmem:[%s11088_s11 + $0x38] sm:$0xff]  }
 0x845   : > { %v5495_v36 = vrot.slane %v5494_v3, 4  ;;  %5502 = vst [vmem:[#allocation2] sm:$0xcc] %v5494_v3  ;;  %v5496_v56 = vrot.slane %v7508_v35, 6  ;;  %v8670_v3 = vld [vmem:[%s11088_s11 + $0x140] sm:$0xff]  }
 0x847   : > { %v5497_v58 = vsel %vm8952_vm4, %v5495_v36, %v5496_v56  ;;  %v5498_v40 = vrot.slane %v5496_v56, 4 }
 0x848   : > { %5503 = vst [vmem:[#allocation2 + $0x8] sm:$0xff] %v5497_v58 }
 0x849   : > { %5504 = vst [vmem:[#allocation2 + $0x10] sm:$0x33] %v5498_v40 }
 0x84c   : > { %v5540_v39 = vld [vmem:[#allocation2] sm:$0xcc] }
 0x84d   : > { %v5505_v21 = vld [vmem:[#allocation2] sm:$0xee]  ;;  %v10860_v41 = vcombine.high %v5540_v39, %v5497_v58  ;;  %v10862_v43 = vcombine.low %v5540_v39, %v5497_v58 }
 0x84e   : > { %v7427_v32 = vcombine.high %v5505_v21, %v5497_v58  ;;  %v7426_v13 = vcombine.low %v5505_v21, %v5497_v58  ;;  %v8671_v39 = vld [vmem:[%s11088_s11 + $0x100] sm:$0xff]  }
 0x84f   : > { %v5590_v47 = vrot.slane %v10860_v41, 2  ;;  %v5587_v34 = vrot.slane %v10862_v43, 2  ;;  %v5967_v57 = vshrl.u32 %v10860_v41, 16  ;;  %v5970_v12 = vshll.u32 %v10860_v41, 16 }
 0x850   : > { %v5507_v44 = vld [vmem:[#allocation2 + $0x10] sm:$0x33]  ;;  %v5755_v38 = vshrl.u32 %v7427_v32, 16  ;;  %v5758_v45 = vshll.u32 %v7427_v32, 16  ;;  %v5738_v48 = vshrl.u32 %v7426_v13, 16  ;;  %v5741_v23 = vshll.u32 %v7426_v13, 16 }
 0x851   : > { %v7409_v0 = vcombine.high %v5507_v44, %v5507_v44  ;;  %v7408_v46 = vcombine.low %v5507_v44, %v5507_v44  ;;  %v5910_v10 = vld [vmem:[#allocation2 + $0x10] sm:$0x77]  ;;  %v5969_v35 = vrot.slane %v5967_v57, 2  ;;  %v5972_v36 = vrot.slane %v5970_v12, 3  ;;  %v8673_v32 = vld [vmem:[%s11088_s11 + $0x148] sm:$0xff]  }
 0x852   : > { %v5757_v51 = vrot.slane %v5755_v38, 1  ;;  %v5760_v26 = vrot.slane %v5758_v45, 2  ;;  %v7477_v11 = vcombine.high %v5910_v10, %v5910_v10  ;;  %v5740_v29 = vrot.slane %v5738_v48, 1  ;;  %v8674_v38 = vld [vmem:[%s11088_s11 + $0x108] sm:$0xff]   ;;  %v8675_v45 = vld [vmem:[%s11088_s11 + $0x150] sm:$0xff]  }
 0x853   : > { %v5591_v15 = vrot.slane %v7409_v0, 2  ;;  %v5588_v50 = vrot.slane %v7408_v46, 2  ;;  %v5763_v9 = vshrl.u32 %v7409_v0, 16  ;;  %v5766_v53 = vshll.u32 %v7409_v0, 16  ;;  %v8676_v0 = vld [vmem:[%s11088_s11 + $0x110] sm:$0xff]  }
 0x854   : > { %v5761_v60 = vor.u32 %v5760_v26, %v5757_v51  ;;  %v5746_v16 = vshrl.u32 %v7408_v46, 16  ;;  %v5749_v18 = vshll.u32 %v7408_v46, 16  ;;  %v5975_v37 = vshrl.u32 %v7477_v11, 16  ;;  %v8677_v46 = vld [vmem:[%s11088_s11 + $0x158] sm:$0xff]   ;;  %v8683_v51 = vld [vmem:[%s11088_s11 + $0x170] sm:$0xff]  }
 0x855   : > { %v5592_v54 = vsel %vm908_vm7, %v5590_v47, %v5591_v15  ;;  %v5589_v20 = vsel %vm908_vm7, %v5587_v34, %v5588_v50  ;;  %v5765_v30 = vrot.slane %v5763_v9, 1  ;;  %v5768_v42 = vrot.slane %v5766_v53, 2  ;;  %v8678_v47 = vld [vmem:[%s11088_s11 + $0x118] sm:$0xff]   ;;  %v8679_v15 = vld [vmem:[%s11088_s11 + $0x160] sm:$0xff]   ;;  %v8681_v50 = vld [vmem:[%s11088_s11 + $0x168] sm:$0xff]  }
 0x856   : > { %5723 = vmatprep.mubr.bf16.mxu1 %v5592_v54  ;;  %v5978_v17 = vshll.u32 %v7477_v11, 16  ;;  %v5748_v25 = vrot.slane %v5746_v16, 1  ;;  %v5751_v27 = vrot.slane %v5749_v18, 2  ;;  %v5977_v52 = vrot.slane %v5975_v37, 2  ;;  %v8680_v34 = vld [vmem:[%s11088_s11 + $0x120] sm:$0xff]   ;;  %v8684_v54 = vld [vmem:[%s11088_s11 + $0x130] sm:$0xff]  }
 0x857   : > { %5724 = vmatmul.mubr.bf16.vlgmr.msra.gmra.mrb[12].mxu1 %v5589_v20  ;;  %v5769_v24 = vor.u32 %v5768_v42, %v5765_v30  ;;  %v5743_v33 = vrot.slane %v5741_v23, 2  ;;  %v5973_v21 = vor.u32 %v5972_v36, %v5969_v35  ;;  %v7476_v9 = vcombine.low %v5910_v10, %v5910_v10  ;;  %v8685_v30 = vld [vmem:[%s11088_s11 + $0x178] sm:$0xff]   ;;  %v6151_v11 = vld [vmem:[%s11090_s13 + $0x20] sm:$0xff] }
 0x858   : > { %7535 = vmatpush3.bf16.msra.mxu1 %v8655_v49  ;;  %v5980_v31 = vrot.slane %v5978_v17, 3  ;;  %v5752_v56 = vor.u32 %v5751_v27, %v5748_v25  ;;  %v8682_v49 = vld [vmem:[%s11088_s11 + $0x128] sm:$0xff]   ;;  %v5950_v20 = vshrl.u32 %v10862_v43, 16  ;;  %v6154_v16 = vld [vmem:[%s11090_s13 + $0x38] sm:$0xff] }
 0x859   : > { %7536 = vmatprep.subr.bf16.mxu1 %v8656_v55  ;;  %v5770_v63 = vsel %vm614_vm5, %v5761_v60, %v5769_v24  ;;  %v5744_v40 = vor.u32 %v5743_v33, %v5740_v29  ;;  %v5958_v26 = vshrl.u32 %v7476_v9, 16  ;;  %v5961_v53 = vshll.u32 %v7476_v9, 16  ;;  %v8686_v24 = vld [vmem:[%s11088_s11 + $0x138] sm:$0xff]   ;;  %v6155_v9 = vld [vmem:[%s11090_s13 + $0x40] sm:$0xff] }
 0x85a   : > { %5901 = vmatprep.mubr.bf16.mxu1 %v5770_v63  ;;  %v5981_v58 = vor.u32 %v5980_v31, %v5977_v52  ;;  %v5953_v55 = vshll.u32 %v10862_v43, 16 }
 0x85b   : > { %v5753_v41 = vsel %vm614_vm5, %v5744_v40, %v5752_v56  ;;  %v5960_v42 = vrot.slane %v5958_v26, 2  ;;  %v5963_v60 = vrot.slane %v5961_v53, 3  ;;  %v6158_v53 = vld [vmem:[%s11090_s13 + $0x58] sm:$0xff] }
 0x85c   : > { %7537 = vmatpush3.bf16.msra.mxu1 %v8657_v61  ;;  %v5982_v44 = vsel %vm1061_vm8, %v5973_v21, %v5981_v58  ;;  %v5952_v61 = vrot.slane %v5950_v20, 2  ;;  %v6159_v20 = vld [vmem:[%s11090_s13 + $0x60] sm:$0xff] }
 0x85d   : > { %7538 = vmatprep.subr.bf16.mxu1 %v8658_v62  ;;  %v5955_v62 = vrot.slane %v5953_v55, 3  ;;  %v5964_v63 = vor.u32 %v5963_v60, %v5960_v42  ;;  %v6160_v55 = vld [vmem:[%s11090_s13 + $0x68] sm:$0xff]  ;;  %v6161_v42 = vld [vmem:[%s11090_s13 + $0x70] sm:$0xff]  ;;  %v6162_v60 = vld [vmem:[%s11090_s13 + $0x78] sm:$0xff] }
 0x860   : > { %7539 = vmatpush3.bf16.msra.mxu1 %v8659_v5  ;;  %v5956_v5 = vor.u32 %v5955_v62, %v5952_v61 }
 0x861   : > { %7540 = vmatprep.subr.bf16.mxu1 %v8660_v6  ;;  %v6147_v6 = vld [vmem:[%s11090_s13] sm:$0xff] }
 0x862   : > { %v5965_v43 = vsel %vm1061_vm8, %v5956_v5, %v5964_v63 }
 0x864   : > { %7541 = vmatpush3.bf16.msra.mxu1 %v8661_v22  ;;  %v6148_v22 = vld [vmem:[%s11090_s13 + $0x8] sm:$0xff] }
 0x865   : > { %7542 = vmatprep.subr.bf16.mxu1 %v8662_v7  ;;  %v6149_v7 = vld [vmem:[%s11090_s13 + $0x10] sm:$0xff]  ;;  %v7639_v10 = vpack.c.bf16 %v6148_v22, %v6147_v6 }
 0x868   : > { %7543 = vmatpush3.bf16.msra.mxu1 %v8663_v8  ;;  %v8758_v8 = vmov 0.0|0.0  }
 0x869   : > { %7544 = vmatprep.subr.bf16.mxu1 %v8664_v2 }
 0x86c   : > { %7545 = vmatpush3.bf16.msra.mxu1 %v8665_v4  ;;  %v6152_v4 = vld [vmem:[%s11090_s13 + $0x28] sm:$0xff] }
 0x86d   : > { %7546 = vmatprep.subr.bf16.mxu1 %v8666_v14  ;;  %v7645_v13 = vpack.c.bf16 %v6152_v4, %v6151_v11  ;;  %v6153_v14 = vld [vmem:[%s11090_s13 + $0x30] sm:$0xff] }
 0x86e   : > { %v7648_v18 = vpack.c.bf16 %v6154_v16, %v6153_v14 }
 0x870   : > { %7547 = vmatpush3.bf16.msra.mxu1 %v8667_v19 }
 0x871   : > { %7548 = vmatprep.subr.bf16.mxu1 %v8668_v59 }
 0x874   : > { %7549 = vmatpush3.bf16.msra.mxu1 %v8669_v28 }
 0x875   : > { %7556 = vmatprep.subr.bf16.mxu1 %v8670_v3 }
 0x877   : > { %5902 = vmatmul.mubr.bf16.vlgmr.msra.gmra.mrb[16].mxu1 %v5753_v41 }
 0x878   : > { %7557 = vmatpush3.bf16.msra.mxu1 %v8671_v39  ;;  %6113 = vmatprep.mubr.bf16.mxu1 %v5982_v44  ;;  %v7494_v39 = vld [vmem:[%s11089_s12] ss:$0 sm:$0xff] }
 0x879   : > { %7558 = vmatprep.subr.bf16.mxu1 %v8673_v32 }
 0x87c   : > { %7559 = vmatpush3.bf16.msra.mxu1 %v8674_v38 }
 0x87d   : > { %7560 = vmatprep.subr.bf16.mxu1 %v8675_v45 }
 0x880   : > { %7561 = vmatpush3.bf16.msra.mxu1 %v8676_v0 }
 0x881   : > { %7562 = vmatprep.subr.bf16.mxu1 %v8677_v46 }
 0x884   : > { %7563 = vmatpush3.bf16.msra.mxu1 %v8678_v47 }
 0x885   : > { %7564 = vmatprep.subr.bf16.mxu1 %v8679_v15 }
 0x888   : > { %7565 = vmatpush3.bf16.msra.mxu1 %v8680_v34 }
 0x889   : > { %7566 = vmatprep.subr.bf16.mxu1 %v8681_v50 }
 0x88c   : > { %7567 = vmatpush3.bf16.msra.mxu1 %v8682_v49  ;;  %v6156_v49 = vld [vmem:[%s11090_s13 + $0x48] sm:$0xff] }
 0x88d   : > { %7568 = vmatprep.subr.bf16.mxu1 %v8683_v51  ;;  %v6157_v51 = vld [vmem:[%s11090_s13 + $0x50] sm:$0xff]  ;;  %v7651_v26 = vpack.c.bf16 %v6156_v49, %v6155_v9 }
 0x890   : > { %7569 = vmatpush3.bf16.msra.mxu1 %v8684_v54  ;;  %v7654_v54 = vpack.c.bf16 %v6158_v53, %v6157_v51 }
 0x891   : > { %7570 = vmatprep.subr.bf16.mxu1 %v8685_v30  ;;  %v7657_v30 = vpack.c.bf16 %v6160_v55, %v6159_v20 }
 0x894   : > { %7571 = vmatpush3.bf16.msra.mxu1 %v8686_v24  ;;  %v7660_v24 = vpack.c.bf16 %v6162_v60, %v6161_v42 }
 0x895   : > { %7638 = vmatprep.subr.bf16.mxu1 %v8758_v8 }
 0x897   : > { %6114 = vmatmul.mubr.bf16.vlgmr.msra.gmra.mrb[20].mxu1 %v5965_v43 }
 0x898   : > { %7635 = vmatprep.mubr.msk.f32.mxu1 %vm8756_vm0, %v8755_v1  ;;  %v6150_v1 = vld [vmem:[%s11090_s13 + $0x18] sm:$0xff]  ;;  %7640 = vmatpush3.bf16.msra.mxu1 %v7639_v10 }
 0x899   : > { %v7642_v2 = vpack.c.bf16 %v6150_v1, %v6149_v7  ;;  %7641 = vmatprep.subr.bf16.mxu1 %v8758_v8 }
 0x89c   : > { %7643 = vmatpush3.bf16.msra.mxu1 %v7642_v2 }
 0x89d   : > { %7644 = vmatprep.subr.bf16.mxu1 %v8758_v8 }
 0x8a0   : > { %7646 = vmatpush3.bf16.msra.mxu1 %v7645_v13 }
 0x8a1   : > { %7647 = vmatprep.subr.bf16.mxu1 %v8758_v8 }
 0x8a4   : > { %7649 = vmatpush3.bf16.msra.mxu1 %v7648_v18 }
 0x8a5   : > { %7650 = vmatprep.subr.bf16.mxu1 %v8758_v8 }
 0x8a8   : > { %7652 = vmatpush3.bf16.msra.mxu1 %v7651_v26 }
 0x8a9   : > { %7653 = vmatprep.subr.bf16.mxu1 %v8758_v8 }
 0x8ac   : > { %7655 = vmatpush3.bf16.msra.mxu1 %v7654_v54 }
 0x8ad   : > { %7656 = vmatprep.subr.bf16.mxu1 %v8758_v8 }
 0x8b0   : > { %7658 = vmatpush3.bf16.msra.mxu1 %v7657_v30 }
 0x8b1   : > { %7659 = vmatprep.subr.bf16.mxu1 %v8758_v8 }
 0x8b4   : > { %7661 = vmatpush3.bf16.msra.mxu1 %v7660_v24 }
 0x92a   : > { %v7528_v37 = vpop.f32.mrb[12].mxu1 }
 0x92b   : > { %v7529_v17 = vpop.f32.mrb[13].mxu1 }
 0x92c   : > { %v7530_v19 = vadd.f32 %v7529_v17, %v7528_v37  ;;  %v7531_v48 = vpop.f32.mrb[14].mxu1 }
 0x92d   : > { %v7532_v23 = vpop.f32.mrb[15].mxu1 }
 0x92e   : > { %v7533_v59 = vadd.f32 %v7532_v23, %v7531_v48 }
 0x94a   : > { %v7550_v57 = vpop.f32.mrb[16].mxu1 }
 0x94b   : > { %v7551_v12 = vpop.f32.mrb[17].mxu1 }
 0x94c   : > { %v7552_v25 = vadd.f32 %v7551_v12, %v7550_v57  ;;  %v7553_v27 = vpop.f32.mrb[18].mxu1 }
 0x94d   : > { %v7554_v52 = vpop.f32.mrb[19].mxu1 }
 0x94e   : > { %v5904_v31 = vadd.f32 %v7552_v25, %v7530_v19  ;;  %v7555_v28 = vadd.f32 %v7554_v52, %v7553_v27 }
 0x950   : > { %v5907_v29 = vadd.f32 %v7555_v28, %v7533_v59 }
 0x96a   : > { %v7572_v33 = vpop.f32.mrb[20].mxu1 }
 0x96b   : > { %v7573_v3 = vpop.f32.mrb[21].mxu1 }
 0x96c   : > { %v7574_v35 = vadd.f32 %v7573_v3, %v7572_v33  ;;  %v7575_v36 = vpop.f32.mrb[22].mxu1 }
 0x96d   : > { %v7576_v56 = vpop.f32.mrb[23].mxu1 }
 0x96e   : > { %v6122_v58 = vadd.f32 %v7574_v35, %v5904_v31  ;;  %v7577_v40 = vadd.f32 %v7576_v56, %v7575_v36 }
 0x970   : > { %v6123_v21 = vadd.f32 %v7577_v40, %v5907_v29  ;;  %v6131_v32 = vadd.f32 %v7494_v39, %v6122_v58 }
 0x972   : > { %v6132_v41 = vadd.f32 %v7494_v39, %v6123_v21 }
 0x974   : > { %v6133_v44 = vadd.f32 %v6132_v41, %v6131_v32 }
 0x976   : > { %v6134_v38 = vrot.slane %v6133_v44, 4 }
 0x978   : > { %v6135_v45 = vadd.f32 %v6134_v38, %v6133_v44 }
 0x97a   : > { %v6136_v0 = vrot.slane %v6135_v45, 2 }
 0x97c   : > { %v6137_v46 = vadd.f32 %v6136_v0, %v6135_v45 }
 0x97e   : > { %v6138_v47 = vrot.slane %v6137_v46, 1 }
 0x980   : > { %v6139_v15 = vadd.f32 %v6138_v47, %v6137_v46 }
 0x982   : > { %v6140_v34 = vmul.f32 0.0625, %v6139_v15 }
 0x984   : > { %v6141_v50 = vmul.f32 %v6140_v34, %v6140_v34 }
 0x986   : > { %6142 = vadd.xlane.f32.xlu0 %v6141_v50 }
 0xa13   : > { %v6143_v61 = vpop.xlane.xlu0 %6142 }
 0xa14   : > { %v6144_v62 = vmax.f32 %v6143_v61, 1e-24 }
 0xa16   : > { %8688 = vrsqrt.f32 %v6144_v62 }
 0xa20   : > { %v8689_v63 = vpop.eup %8688 }
 0xa21   : > { %v6146_v5 = vmul.f32 %v8689_v63, %v6140_v34 }
 0xa23   : > { %7636 = vmatmul.mubr.f32.vlgmr.msra.gmra.mrb[24].mxu1 %v6146_v5 }
 0xaf6   : > { %v6229_v43 = vpop.f32.mrb[24].mxu1 }
 0xaf7   : > { %6234 = vst.msk [vmem:[%s459_s21] sm:$0x1] %vm6233_vm10, %v6229_v43  ;;  %v7637_v6 = vpop.f32.mrb[25].mxu1 }
 0xaf8   : > { %8704 = shalt.err (!%p8701_p3)
}
 0xaf9   : > { %s8705_s19 = scalar_lea.hbm %s11035_s22, 16  ;;  %s8709_s1 = scalar_lea.hbm %s11091_s14, 32 }
 0xafa   : > { %p8706_p4 = scmp.ne.s32.totalorder %s11035_s22, %s8705_s19  ;;  %p8710_p9 = scmp.lt.u32.totalorder %s11035_s22, %s11091_s14 }
 0xafb   : > { %p8711_p10 = scmp.lt.u32.totalorder %s8709_s1, %s8705_s19  ;;  %p8713_p12 = scmp.lt.u32.totalorder %s8705_s19, %s11035_s22 }
 0xafc   : > { %p8707_p7 = pnand %p8706_p4, %p8873_p5 }
 0xafd   : > { %p8712_p11 = por %p8711_p10, %p8710_p9 }
 0xafe   : > { %p8708_p8 = pneg %p8707_p7 }
 0xaff   : > { %p8714_p13 = por %p8713_p12, %p8712_p11 }
 0xb01   : > { %p8715_p0 = pnand %p8714_p13, %p8708_p8 }
 0xb03   : > { %8718 = shalt.err (!%p8715_p0)
}
 0xb04   : > { %7726 = dma.vmem_to_hbm [thread:$0]  (%p8873_p5), %s11037_s25, 16, %s11035_s22, %s6236_s27  }
 0xb05 PF: > { %p7732_p1 = scmp.ge.s32.totalorder %s8753_s16, 2  ;;  %s6260_s28 = sand.u32 1, %s8741_s29  }
 0xb06   : > { %s6261_s18 = scalar_lea.sflag [#allocation5], %s6260_s28 }
 0xb07   : > { %p7729_p2 = pnand %p7732_p1, %p8877_p6 }
 0xb09   : > { %8736 = dma.done.wait (!%p7729_p2), %s6261_s18, 16  }
 0xb0a   : > { %8738 = vsyncadd (!%p7729_p2), %s6261_s18, 4294967280  ;;  %s11104_s16 = sld [smem:[#allocation8_spill]]  ;;  %s11105_s15 = sld [smem:[#allocation7_spill]] }
 0xb0b   : > { %s11106_s19 = sld [smem:[#allocation9_spill]]  ;;  %s11107_s29 = smov %s8745_s30 }
 0xb10   : > { %p24_p3 = scmp.ge.s32.totalorder %s11104_s16, 4   ;;  %s11108_s30 = smov %s11105_s15 }
 0xb11   : > { %s11109_s15 = smov %s11106_s19 }
 0xb12   :  { %26 = sbr.rel (!%p24_p3) target bundleno = 5 (0x5), region = 129 }
 0xb19   :  { %6265 = vsyncpa [#allocation5], 1 }
 0xb1a   :  { %6267 = vsyncpa [#allocation5 + $0x1], 1 }

</bundles_post_ra>
